<compile_context>
chip_gen: v7x
topology: tpu7x:2x2x1
jax: 0.10.0
libtpu: 0.0.40
codegen_flags: <defaults>
</compile_context>

<pallas_src>
import functools

import jax
import jax.numpy as jnp
from jax.experimental import pallas as pl
from jax.experimental.pallas import tpu as pltpu

EPS = 1e-5
LANE = 128

# 3x3 / stride-2 / pad-1 conv decomposed over the four input phases
#   phase[pr, pc][i, j, :] = input[2*i + pr, 2*j + pc, :]
# For kernel offset k in {0, 1, 2}, _TAP[k] = (aligned?, phase parity):
#   aligned == 1 -> tap reads phase row/col i;  aligned == 0 -> tap reads
#   phase row/col i-1 with the first output row/col coming from zero padding.
_TAP = {0: (0, 1), 1: (1, 0), 2: (1, 1)}


def _round_up(x, m):
    return (x + m - 1) // m * m


@functools.lru_cache(maxsize=None)
def _vmem_limit_bytes():
    """Per-generation scoped-VMEM limit (~3/4 of physical, capped)."""
    try:
        cap = int(pltpu.get_tpu_info().vmem_capacity_bytes)
    except Exception:
        cap = 64 * 1024 * 1024  # conservative (v7x-sized) fallback
    return max(32 * 1024 * 1024, min((3 * cap) // 4, 100 * 1024 * 1024))


def _compiler_params():
    return pltpu.CompilerParams(dimension_semantics=("parallel",),
                                vmem_limit_bytes=_vmem_limit_bytes())


# ---------------------------------------------------------------------------
# Pallas kernels
# ---------------------------------------------------------------------------
def _conv1_kernel(p_ref, w_ref, y_ref, stats_ref):
    """Layer 1: im2col-patch GEMM (K=27) + per-block BN partial statistics."""
    acc = jnp.dot(p_ref[...], w_ref[...], preferred_element_type=jnp.float32)
    y_ref[...] = acc.astype(y_ref.dtype)
    stats_ref[0:1, :] = jnp.sum(acc, axis=0, keepdims=True)
    stats_ref[1:2, :] = jnp.sum(acc * acc, axis=0, keepdims=True)


def _make_stem_kernel(hh, ww, cinp):
    """One stem layer (layers 2..4):
       fused BN+ReLU of the previous layer -> in-VMEM im2col tap matrix ->
       ONE deep-K MXU matmul -> raw conv output (bf16) + BN partial stats.

    Refs:
      ph_ref   : (4, hh, ww, cinp) bf16  stride-2 phases of the raw layer input
      scale/shift : (1, cinp) f32        fused BN affine of the previous layer
      w_ref    : (9*cinp, coutp) bf16    weight, rows ordered (kh, kw, cin)
      y_ref    : (hh*ww, coutp) bf16     raw (pre-BN) conv output
      stats_ref: (2, coutp) f32          [sum, sum of squares] over this block
      tap_ref  : (hh, ww, 9*cinp) bf16   tap-matrix scratch (VMEM)
    """
    nrow = hh * ww

    def kernel(ph_ref, scale_ref, shift_ref, w_ref, y_ref, stats_ref, tap_ref):
        # BN (previous layer) + ReLU is computed in f32 (v5e has no bf16 VPU).
        scale = scale_ref[...].reshape(1, 1, cinp)
        shift = shift_ref[...].reshape(1, 1, cinp)

        # In-VMEM im2col: every write below is a unit-stride slice at a
        # 128-aligned lane offset (cinp % 128 == 0), so stores are unmasked.
        for kh in range(3):
            rh, pr = _TAP[kh]
            for kw in range(3):
                rw, pc = _TAP[kw]
                p = pr * 2 + pc
                c0 = (kh * 3 + kw) * cinp
                src_r = slice(0, hh) if rh else slice(0, hh - 1)
                src_c = slice(0, ww) if rw else slice(0, ww - 1)
                dst_r = slice(0, hh) if rh else slice(1, hh)
                dst_c = slice(0, ww) if rw else slice(1, ww)
                if not rh:   # conv zero padding (top row of this tap)
                    tap_ref[0:1, :, c0:c0 + cinp] = jnp.zeros(
                        (1, ww, cinp), jnp.bfloat16)
                if not rw:   # conv zero padding (left column of this tap)
                    tap_ref[:, 0:1, c0:c0 + cinp] = jnp.zeros(
                        (hh, 1, cinp), jnp.bfloat16)
                v = ph_ref[p, src_r, src_c, :].astype(jnp.float32)
                v = jnp.maximum(v * scale + shift, 0.0)     # fused BN + ReLU
                tap_ref[dst_r, dst_c, c0:c0 + cinp] = v.astype(jnp.bfloat16)

        # One deep-K MXU matmul: (hh*ww, 9*cinp) @ (9*cinp, coutp), f32 acc.
        taps = tap_ref[...].reshape(nrow, 9 * cinp)
        acc = jnp.dot(taps, w_ref[...], preferred_element_type=jnp.float32)

        y_ref[...] = acc.astype(y_ref.dtype)
        # Partial BatchNorm statistics of this block (global combine in JAX).
        stats_ref[0:1, :] = jnp.sum(acc, axis=0, keepdims=True)
        stats_ref[1:2, :] = jnp.sum(acc * acc, axis=0, keepdims=True)

    return kernel


def _proj_kernel(y_ref, scale_ref, shift_ref, w_ref, b_ref, o_ref):
    """Fused epilogue: BN4 + ReLU + 1x1 projection + bias (lane-dense output)."""
    z = y_ref[...].astype(jnp.float32)
    z = jnp.maximum(z * scale_ref[...] + shift_ref[...], 0.0)
    o_ref[...] = (jnp.dot(z.astype(jnp.bfloat16), w_ref[...],
                          preferred_element_type=jnp.float32) + b_ref[...])
    # TODO(synk): emit bf16 here if the downstream transformer consumes bf16.


# ---------------------------------------------------------------------------
# pallas_call wrappers
# ---------------------------------------------------------------------------
def _conv1_layer(patches, w_mat):
    b, nrow, k = patches.shape
    coutp = w_mat.shape[-1]
    flops = 2 * b * nrow * k * coutp
    bytes_accessed = int(patches.size * 2 + w_mat.size * 2
                         + b * nrow * coutp * 2 + b * 2 * coutp * 4)
    return pl.pallas_call(
        _conv1_kernel,
        out_shape=(jax.ShapeDtypeStruct((b, nrow, coutp), jnp.bfloat16),
                   jax.ShapeDtypeStruct((b, 2, coutp), jnp.float32)),
        grid=(b,),
        in_specs=[
            pl.BlockSpec((None, nrow, k), lambda i: (i, 0, 0)),
            pl.BlockSpec((k, coutp), lambda i: (0, 0)),
        ],
        out_specs=(
            pl.BlockSpec((None, nrow, coutp), lambda i: (i, 0, 0)),
            pl.BlockSpec((None, 2, coutp), lambda i: (i, 0, 0)),
        ),
        compiler_params=_compiler_params(),
        cost_estimate=pl.CostEstimate(flops=flops, transcendentals=0,
                                      bytes_accessed=bytes_accessed),
    )(patches, w_mat)


def _stem_conv_layer(phases, scale, shift, w_mat):
    b, _, hh, ww, cinp = phases.shape
    coutp = w_mat.shape[-1]
    nrow = hh * ww
    kernel = _make_stem_kernel(hh, ww, cinp)
    flops = 2 * b * nrow * (9 * cinp) * coutp
    bytes_accessed = int(phases.size * 2 + w_mat.size * 2
                         + b * nrow * coutp * 2 + b * 2 * coutp * 4
                         + 2 * cinp * 4)
    return pl.pallas_call(
        kernel,
        out_shape=(jax.ShapeDtypeStruct((b, nrow, coutp), jnp.bfloat16),
                   jax.ShapeDtypeStruct((b, 2, coutp), jnp.float32)),
        grid=(b,),
        in_specs=[
            pl.BlockSpec((None, 4, hh, ww, cinp), lambda i: (i, 0, 0, 0, 0)),
            pl.BlockSpec((1, cinp), lambda i: (0, 0)),
            pl.BlockSpec((1, cinp), lambda i: (0, 0)),
            pl.BlockSpec((9 * cinp, coutp), lambda i: (0, 0)),
        ],
        out_specs=(
            pl.BlockSpec((None, nrow, coutp), lambda i: (i, 0, 0)),
            pl.BlockSpec((None, 2, coutp), lambda i: (i, 0, 0)),
        ),
        scratch_shapes=[pltpu.VMEM((hh, ww, 9 * cinp), jnp.bfloat16)],
        compiler_params=_compiler_params(),
        cost_estimate=pl.CostEstimate(flops=flops, transcendentals=0,
                                      bytes_accessed=bytes_accessed),
    )(phases, scale, shift, w_mat)


def _proj_layer(y2d, scale, shift, w_mat, bias):
    rows, c4p = y2d.shape
    ep = w_mat.shape[-1]
    tr = rows if rows <= 512 else 512            # MXU-friendly M tiles
    rows_p = _round_up(rows, tr)
    if rows_p != rows:
        y2d = jnp.pad(y2d, ((0, rows_p - rows), (0, 0)))
    flops = 2 * rows_p * c4p * ep
    bytes_accessed = int(rows_p * c4p * 2 + w_mat.size * 2 + rows_p * ep * 4
                         + (2 * c4p + ep) * 4)
    out = pl.pallas_call(
        _proj_kernel,
        out_shape=jax.ShapeDtypeStruct((rows_p, ep), jnp.float32),
        grid=(rows_p // tr,),
        in_specs=[
            pl.BlockSpec((tr, c4p), lambda i: (i, 0)),
            pl.BlockSpec((1, c4p), lambda i: (0, 0)),
            pl.BlockSpec((1, c4p), lambda i: (0, 0)),
            pl.BlockSpec((c4p, ep), lambda i: (0, 0)),
            pl.BlockSpec((1, ep), lambda i: (0, 0)),
        ],
        out_specs=pl.BlockSpec((tr, ep), lambda i: (i, 0)),
        compiler_params=_compiler_params(),
        cost_estimate=pl.CostEstimate(flops=flops, transcendentals=0,
                                      bytes_accessed=bytes_accessed),
    )(y2d, scale, shift, w_mat, bias)
    return out[:rows]


# ---------------------------------------------------------------------------
# JAX glue (cheap): stride-2 phase split, layer-1 im2col, BN stat combine,
# lane-padded weight packing.
# ---------------------------------------------------------------------------
def _phase_split(x):
    """(B, H, W, C) -> (B, 4, H//2, W//2, C); phase = 2*row_parity + col_parity."""
    b, h, w, c = x.shape
    r = x.reshape(b, h // 2, 2, w // 2, 2, c)
    r = jnp.transpose(r, (0, 2, 4, 1, 3, 5))
    return r.reshape(b, 4, h // 2, w // 2, c)


def _im2col_s2(x):
    """3x3/s2/p1 patches: (B, H, W, C) -> (B, (H//2)*(W//2), 9*C),
    tap order (kh, kw) major with channels fastest."""
    b, h, w, c = x.shape
    xp = jnp.pad(x, ((0, 0), (1, 1), (1, 1), (0, 0)))
    taps = [xp[:, kh:kh + h - 1:2, kw:kw + w - 1:2, :]
            for kh in range(3) for kw in range(3)]
    pat = jnp.concatenate(taps, axis=-1)
    return pat.reshape(b, (h // 2) * (w // 2), 9 * c)


def _pad_last(v, n):
    return jnp.pad(v, [(0, 0)] * (v.ndim - 1) + [(0, n - v.shape[-1])])


def _bn_scale_shift(stats, gamma, beta, count):
    s = jnp.sum(stats, axis=0)                              # (2, C) f32
    mean = s[0] / count
    var = jnp.maximum(s[1] / count - mean * mean, 0.0)      # biased (training BN)
    scale = gamma * jax.lax.rsqrt(var + EPS)
    shift = beta - mean * scale
    return scale.reshape(1, -1), shift.reshape(1, -1)


def _stem_w_mat(wgt, cinp, coutp):
    """Torch OIHW 3x3 weight -> (9*cinp, coutp) bf16, rows (kh, kw, cin),
    zero-padded channels (keeps padded channels exactly zero downstream)."""
    cout, cin, _, _ = wgt.shape
    w = jnp.transpose(wgt, (2, 3, 1, 0)).reshape(9, cin, cout)
    w = jnp.zeros((9, cinp, coutp), jnp.float32).at[:, :cin, :cout].set(w)
    return w.reshape(9 * cinp, coutp).astype(jnp.bfloat16)


# ---------------------------------------------------------------------------
# ConvStem forward (matches the PyTorch module semantics).
# ---------------------------------------------------------------------------
@functools.partial(jax.jit, static_argnames=("img_size",))
def conv_stem_forward(x_nchw, params, img_size):
    b, c, h, w = x_nchw.shape
    assert h == img_size and w == img_size, "input size mismatch"
    assert img_size % 16 == 0 and img_size >= 32, \
        "ConvStem kernels need img_size a multiple of 16 and >= 32"

    x = jnp.transpose(x_nchw, (0, 2, 3, 1)).astype(jnp.bfloat16)  # NHWC bf16

    # ---- layer 1: XLA im2col (3-channel image, tiny) -> Pallas GEMM + stats
    wgt, gamma, beta = params["stem"][0]
    assert wgt.shape[1] == c
    cout = wgt.shape[0]
    coutp = _round_up(cout, LANE)
    w1m = jnp.transpose(wgt, (2, 3, 1, 0)).reshape(9 * c, cout)
    w1m = _pad_last(w1m, coutp).astype(jnp.bfloat16)
    patches = _im2col_s2(x)                                 # (B, nrow1, 27)
    hh, ww = h // 2, w // 2
    y, stats = _conv1_layer(patches, w1m)
    scale, shift = _bn_scale_shift(stats, _pad_last(gamma, coutp),
                                   _pad_last(beta, coutp), b * hh * ww)
    act, cinp = y, coutp                        # raw (pre-BN) bf16, lane-dense

    # ---- layers 2..4: fused BN+ReLU(prev) -> in-VMEM im2col -> deep-K GEMM
    for wgt, gamma, beta in params["stem"][1:]:
        cout = wgt.shape[0]
        coutp = _round_up(cout, LANE)
        phases = _phase_split(act.reshape(b, hh, ww, cinp))
        hh, ww = hh // 2, ww // 2
        w_mat = _stem_w_mat(wgt, cinp, coutp)
        y, stats = _stem_conv_layer(phases, scale, shift, w_mat)
        scale, shift = _bn_scale_shift(stats, _pad_last(gamma, coutp),
                                       _pad_last(beta, coutp), b * hh * ww)
        act, cinp = y, coutp

    # ---- fused BN4 + ReLU + 1x1 projection (+ bias), lane-dense output
    w1, b1 = params["proj"]
    embed, c4 = w1.shape[0], w1.shape[1]
    ep = _round_up(embed, LANE)
    w_proj = jnp.transpose(w1.reshape(embed, c4), (1, 0))
    w_proj = (jnp.zeros((cinp, ep), jnp.float32)
              .at[:c4, :embed].set(w_proj).astype(jnp.bfloat16))
    bias = _pad_last(b1, ep).reshape(1, ep)
    out = _proj_layer(act.reshape(b * hh * ww, cinp), scale, shift,
                      w_proj, bias)
    out = out.reshape(b, hh * ww, ep)[:, :, :embed]
    return out                                  # (B, num_patches, embed)


# ---------------------------------------------------------------------------
# Deterministic parameter init (same shapes as the torch module).
# ---------------------------------------------------------------------------
def init_params(key, in_chans=3, embed_dim=64):
    assert embed_dim % 8 == 0
    stem = []
    input_dim, output_dim = in_chans, embed_dim // 8
    for _ in range(4):
        key, k = jax.random.split(key)
        bound = (1.0 / (input_dim * 9)) ** 0.5
        wgt = jax.random.uniform(k, (output_dim, input_dim, 3, 3), jnp.float32,
                                 -bound, bound)
        gamma = jnp.ones((output_dim,), jnp.float32)
        beta = jnp.zeros((output_dim,), jnp.float32)
        stem.append((wgt, gamma, beta))
        input_dim, output_dim = output_dim, output_dim * 2
    key, k1, k2 = jax.random.split(key, 3)
    bound = (1.0 / input_dim) ** 0.5
    w1 = jax.random.uniform(k1, (embed_dim, input_dim, 1, 1), jnp.float32,
                            -bound, bound)
    b1 = jax.random.uniform(k2, (embed_dim,), jnp.float32, -bound, bound)
    return {"stem": stem, "proj": (w1, b1)}


# ---------------------------------------------------------------------------
# References.
# ---------------------------------------------------------------------------
def reference_forward_matched(x_nchw, params):
    """Pure-JAX reference mirroring the kernel numerics: bf16 conv inputs and
    weights, f32 accumulation, BN stats from the f32 conv output, bf16
    inter-layer activation storage.  Should match the kernels tightly."""
    f32, bf16 = jnp.float32, jnp.bfloat16
    z = jnp.transpose(x_nchw, (0, 2, 3, 1)).astype(bf16)
    for wgt, gamma, beta in params["stem"]:
        wq = jnp.transpose(wgt, (2, 3, 1, 0)).astype(bf16)  # HWIO
        y = jax.lax.conv_general_dilated(
            z, wq, window_strides=(2, 2), padding=((1, 1), (1, 1)),
            dimension_numbers=("NHWC", "HWIO", "NHWC"),
            preferred_element_type=f32)
        mean = jnp.mean(y, axis=(0, 1, 2))
        var = jnp.maximum(jnp.mean(y * y, axis=(0, 1, 2)) - mean * mean, 0.0)
        scale = gamma * jax.lax.rsqrt(var + EPS)
        shift = beta - mean * scale
        y = y.astype(bf16).astype(f32)                      # bf16 HBM storage
        z = jnp.maximum(y * scale + shift, 0.0).astype(bf16)
    w1, b1 = params["proj"]
    embed, c4 = w1.shape[0], w1.shape[1]
    wq = jnp.transpose(w1.reshape(embed, c4), (1, 0)).astype(bf16)
    b, h4, w4, _ = z.shape
    out = jnp.dot(z.reshape(b * h4 * w4, c4), wq,
                  preferred_element_type=f32) + b1.reshape(1, embed)
    return out.reshape(b, h4 * w4, embed)


def reference_forward_f32(x_nchw, params):
    """Full-f32 (HIGHEST precision) reference."""
    x = x_nchw.astype(jnp.float32)
    for wgt, gamma, beta in params["stem"]:
        x = jax.lax.conv_general_dilated(
            x, wgt, window_strides=(2, 2), padding=((1, 1), (1, 1)),
            dimension_numbers=("NCHW", "OIHW", "NCHW"),
            precision=jax.lax.Precision.HIGHEST)
        mean = jnp.mean(x, axis=(0, 2, 3), keepdims=True)
        var = jnp.var(x, axis=(0, 2, 3), keepdims=True)
        x = (x - mean) * jax.lax.rsqrt(var + EPS)
        x = x * gamma.reshape(1, -1, 1, 1) + beta.reshape(1, -1, 1, 1)
        x = jnp.maximum(x, 0.0)
    w1, b1 = params["proj"]
    x = jax.lax.conv_general_dilated(
        x, w1, (1, 1), "VALID",
        dimension_numbers=("NCHW", "OIHW", "NCHW"),
        precision=jax.lax.Precision.HIGHEST)
    x = x + b1.reshape(1, -1, 1, 1)
    b, c, h, w = x.shape
    return jnp.transpose(x.reshape(b, c, h * w), (0, 2, 1))


if __name__ == "__main__":
    # Small config consistent with the module: patch_size=16 -> 4 stride-2
    # convs + 1x1 proj; img_size=32 gives a 2x2 grid of patches.
    IMG, EMBED, IN_CHANS, BATCH = 32, 64, 3, 2

    key = jax.random.PRNGKey(0)
    key, kx, kp = jax.random.split(key, 3)
    x = jax.random.normal(kx, (BATCH, IN_CHANS, IMG, IMG), jnp.float32)  # NCHW
    params = init_params(kp, in_chans=IN_CHANS, embed_dim=EMBED)

    out = jax.block_until_ready(conv_stem_forward(x, params, img_size=IMG))

    num_patches = (IMG // 16) * (IMG // 16)
    assert out.shape == (BATCH, num_patches, EMBED), out.shape
    assert bool(jnp.all(jnp.isfinite(out)))

    # 1) Matched-precision reference (bf16 matmul inputs, f32 accumulation,
    #    bf16 activation storage): should agree tightly.
    ref_m = jax.block_until_ready(reference_forward_matched(x, params))
    assert jnp.allclose(out, ref_m, rtol=2e-3, atol=2e-3), \
        float(jnp.max(jnp.abs(out - ref_m)))

    # 2) Full-f32 reference: the residual difference is the intentional bf16
    #    activation/weight rounding accumulated over 5 layers (~1e-2).
    ref_f = jax.block_until_ready(reference_forward_f32(x, params))
    assert jnp.allclose(out, ref_f, rtol=3e-2, atol=3e-2), \
        float(jnp.max(jnp.abs(out - ref_f)))

    print("KERNEL_OK")
</pallas_src>

<mosaic_0001>
module attributes {stable_mosaic.version = 11 : i64} {
  func.func @_conv1_kernel(%arg0: i32, %arg1: memref<1x256x27xbf16, #tpu.memory_space<vmem>>, %arg2: memref<27x128xbf16, #tpu.memory_space<vmem>>, %arg3: memref<1x256x128xbf16, #tpu.memory_space<vmem>>, %arg4: memref<1x2x128xf32, #tpu.memory_space<vmem>>) attributes {dimension_semantics = [#tpu.dimension_semantics<parallel>], iteration_bounds = array<i64: 2>, scalar_prefetch = 0 : i64, scratch_operands = 0 : i64, tpu.core_type = #tpu.core_type<tc>, window_params = [{transform_indices = @transform_0, window_bounds = array<i64: 1, 256, 27>}, {pipeline_mode = #tpu.pipeline_mode<synchronous>, transform_indices = @transform_1, window_bounds = array<i64: 27, 128>}, {transform_indices = @transform_2, window_bounds = array<i64: 1, 256, 128>}, {transform_indices = @transform_3, window_bounds = array<i64: 1, 2, 128>}]} {
    %c0 = arith.constant 0 : index
    %c0_0 = arith.constant 0 : index
    %c0_1 = arith.constant 0 : index
    %0 = vector.load %arg1[%c0, %c0_0, %c0_1] : memref<1x256x27xbf16, #tpu.memory_space<vmem>>, vector<1x256x27xbf16>
    %1 = vector.shape_cast %0 : vector<1x256x27xbf16> to vector<256x27xbf16>
    %c0_2 = arith.constant 0 : index
    %c0_3 = arith.constant 0 : index
    %2 = vector.load %arg2[%c0_2, %c0_3] : memref<27x128xbf16, #tpu.memory_space<vmem>>, vector<27x128xbf16>
    %cst = arith.constant dense<0.000000e+00> : vector<256x128xf32>
    %3 = tpu.matmul %1, %2, %cst {dimension_numbers = #tpu.dot_dimension_numbers<[1], [0], [0], [1], [0, 0, 1, 1], [], []>} : vector<256x27xbf16>, vector<27x128xbf16>, vector<256x128xf32> -> vector<256x128xf32>
    %4 = arith.truncf %3 : vector<256x128xf32> to vector<256x128xbf16>
    %c0_4 = arith.constant 0 : index
    %c0_5 = arith.constant 0 : index
    %c0_6 = arith.constant 0 : index
    %5 = vector.load %arg3[%c0_4, %c0_5, %c0_6] : memref<1x256x128xbf16, #tpu.memory_space<vmem>>, vector<1x256x128xbf16>
    %6 = vector.shape_cast %5 : vector<1x256x128xbf16> to vector<256x128xbf16>
    %7 = vector.shape_cast %4 : vector<256x128xbf16> to vector<1x256x128xbf16>
    tpu.vector_store %arg3[%c0_4, %c0_5, %c0_6], %7 {strides = array<i32>} : memref<1x256x128xbf16, #tpu.memory_space<vmem>>, vector<1x256x128xbf16>,
    %cst_7 = arith.constant dense<0.000000e+00> : vector<128xf32>
    %8 = vector.multi_reduction <add>, %3, %cst_7 [0] : vector<256x128xf32> to vector<128xf32>
    %9 = vector.shape_cast %8 : vector<128xf32> to vector<1x128xf32>
    %c0_8 = arith.constant 0 : index
    %c0_9 = arith.constant 0 : index
    %c0_10 = arith.constant 0 : index
    %10 = vector.load %arg4[%c0_8, %c0_9, %c0_10] : memref<1x2x128xf32, #tpu.memory_space<vmem>>, vector<1x1x128xf32>
    %11 = vector.shape_cast %10 : vector<1x1x128xf32> to vector<1x128xf32>
    %12 = vector.shape_cast %9 : vector<1x128xf32> to vector<1x1x128xf32>
    tpu.vector_store %arg4[%c0_8, %c0_9, %c0_10], %12 {strides = array<i32>} : memref<1x2x128xf32, #tpu.memory_space<vmem>>, vector<1x1x128xf32>,
    %13 = arith.mulf %3, %3 : vector<256x128xf32>
    %cst_11 = arith.constant dense<0.000000e+00> : vector<128xf32>
    %14 = vector.multi_reduction <add>, %13, %cst_11 [0] : vector<256x128xf32> to vector<128xf32>
    %15 = vector.shape_cast %14 : vector<128xf32> to vector<1x128xf32>
    %c0_12 = arith.constant 0 : index
    %c1 = arith.constant 1 : index
    %c0_13 = arith.constant 0 : index
    %16 = vector.load %arg4[%c0_12, %c1, %c0_13] : memref<1x2x128xf32, #tpu.memory_space<vmem>>, vector<1x1x128xf32>
    %17 = vector.shape_cast %16 : vector<1x1x128xf32> to vector<1x128xf32>
    %18 = vector.shape_cast %15 : vector<1x128xf32> to vector<1x1x128xf32>
    tpu.vector_store %arg4[%c0_12, %c1, %c0_13], %18 {strides = array<i32>} : memref<1x2x128xf32, #tpu.memory_space<vmem>>, vector<1x1x128xf32>,
    return
  }
  func.func @transform_0(%arg0: i32) -> (i32, i32, i32) {
    %c0_i32 = arith.constant 0 : i32
    %c0_i32_0 = arith.constant 0 : i32
    %c0_i32_1 = arith.constant 0 : i32
    return %arg0, %c0_i32, %c0_i32_0 : i32, i32, i32
  }
  func.func @transform_1(%arg0: i32) -> (i32, i32) {
    %c0_i32 = arith.constant 0 : i32
    %c0_i32_0 = arith.constant 0 : i32
    %c0_i32_1 = arith.constant 0 : i32
    return %c0_i32, %c0_i32_0 : i32, i32
  }
  func.func @transform_2(%arg0: i32) -> (i32, i32, i32) {
    %c0_i32 = arith.constant 0 : i32
    %c0_i32_0 = arith.constant 0 : i32
    %c0_i32_1 = arith.constant 0 : i32
    return %arg0, %c0_i32, %c0_i32_0 : i32, i32, i32
  }
  func.func @transform_3(%arg0: i32) -> (i32, i32, i32) {
    %c0_i32 = arith.constant 0 : i32
    %c0_i32_0 = arith.constant 0 : i32
    %c0_i32_1 = arith.constant 0 : i32
    return %arg0, %c0_i32, %c0_i32_0 : i32, i32, i32
  }
}

module attributes {stable_mosaic.version = 11 : i64} {
  func.func @kernel(%arg0: i32, %arg1: memref<1x4x8x8x128xbf16, #tpu.memory_space<vmem>>, %arg2: memref<1x128xf32, #tpu.memory_space<vmem>>, %arg3: memref<1x128xf32, #tpu.memory_space<vmem>>, %arg4: memref<1152x128xbf16, #tpu.memory_space<vmem>>, %arg5: memref<1x64x128xbf16, #tpu.memory_space<vmem>>, %arg6: memref<1x2x128xf32, #tpu.memory_space<vmem>>, %arg7: memref<8x8x1152xbf16, #tpu.memory_space<vmem>>) attributes {dimension_semantics = [#tpu.dimension_semantics<parallel>], iteration_bounds = array<i64: 2>, scalar_prefetch = 0 : i64, scratch_operands = 1 : i64, tpu.core_type = #tpu.core_type<tc>, window_params = [{transform_indices = @transform_0, window_bounds = array<i64: 1, 4, 8, 8, 128>}, {pipeline_mode = #tpu.pipeline_mode<synchronous>, transform_indices = @transform_1, window_bounds = array<i64: 1, 128>}, {pipeline_mode = #tpu.pipeline_mode<synchronous>, transform_indices = @transform_2, window_bounds = array<i64: 1, 128>}, {pipeline_mode = #tpu.pipeline_mode<synchronous>, transform_indices = @transform_3, window_bounds = array<i64: 1152, 128>}, {transform_indices = @transform_4, window_bounds = array<i64: 1, 64, 128>}, {transform_indices = @transform_5, window_bounds = array<i64: 1, 2, 128>}]} {
    %c0 = arith.constant 0 : index
    %c0_0 = arith.constant 0 : index
    %0 = vector.load %arg2[%c0, %c0_0] : memref<1x128xf32, #tpu.memory_space<vmem>>, vector<1x128xf32>
    %1 = vector.shape_cast %0 : vector<1x128xf32> to vector<1x1x128xf32>
    %c0_1 = arith.constant 0 : index
    %c0_2 = arith.constant 0 : index
    %2 = vector.load %arg3[%c0_1, %c0_2] : memref<1x128xf32, #tpu.memory_space<vmem>>, vector<1x128xf32>
    %3 = vector.shape_cast %2 : vector<1x128xf32> to vector<1x1x128xf32>
    %cst = arith.constant 0.000000e+00 : bf16
    %4 = vector.broadcast %cst : bf16 to vector<1x8x128xbf16>
    %c0_3 = arith.constant 0 : index
    %c0_4 = arith.constant 0 : index
    %c0_5 = arith.constant 0 : index
    %5 = vector.load %arg7[%c0_3, %c0_4, %c0_5] : memref<8x8x1152xbf16, #tpu.memory_space<vmem>>, vector<1x8x128xbf16>
    tpu.vector_store %arg7[%c0_3, %c0_4, %c0_5], %4 {strides = array<i32>} : memref<8x8x1152xbf16, #tpu.memory_space<vmem>>, vector<1x8x128xbf16>,
    %cst_6 = arith.constant 0.000000e+00 : bf16
    %6 = vector.broadcast %cst_6 : bf16 to vector<8x1x128xbf16>
    %c0_7 = arith.constant 0 : index
    %c0_8 = arith.constant 0 : index
    %c0_9 = arith.constant 0 : index
    %7 = vector.load %arg7[%c0_7, %c0_8, %c0_9] : memref<8x8x1152xbf16, #tpu.memory_space<vmem>>, vector<8x1x128xbf16>
    tpu.vector_store %arg7[%c0_7, %c0_8, %c0_9], %6 {strides = array<i32>} : memref<8x8x1152xbf16, #tpu.memory_space<vmem>>, vector<8x1x128xbf16>,
    %c0_10 = arith.constant 0 : index
    %c3 = arith.constant 3 : index
    %c0_11 = arith.constant 0 : index
    %c0_12 = arith.constant 0 : index
    %c0_13 = arith.constant 0 : index
    %8 = vector.load %arg1[%c0_10, %c3, %c0_11, %c0_12, %c0_13] : memref<1x4x8x8x128xbf16, #tpu.memory_space<vmem>>, vector<1x1x7x7x128xbf16>
    %9 = vector.shape_cast %8 : vector<1x1x7x7x128xbf16> to vector<7x7x128xbf16>
    %10 = arith.extf %9 : vector<7x7x128xbf16> to vector<7x7x128xf32>
    %11 = vector.broadcast %1 : vector<1x1x128xf32> to vector<7x7x128xf32>
    %12 = arith.mulf %10, %11 : vector<7x7x128xf32>
    %13 = vector.broadcast %3 : vector<1x1x128xf32> to vector<7x7x128xf32>
    %14 = arith.addf %12, %13 : vector<7x7x128xf32>
    %cst_14 = arith.constant 0.000000e+00 : f32
    %15 = vector.broadcast %cst_14 : f32 to vector<7x7x128xf32>
    %16 = arith.maximumf %14, %15 : vector<7x7x128xf32>
    %17 = arith.truncf %16 : vector<7x7x128xf32> to vector<7x7x128xbf16>
    %c1 = arith.constant 1 : index
    %c1_15 = arith.constant 1 : index
    %c0_16 = arith.constant 0 : index
    %18 = vector.load %arg7[%c1, %c1_15, %c0_16] : memref<8x8x1152xbf16, #tpu.memory_space<vmem>>, vector<7x7x128xbf16>
    tpu.vector_store %arg7[%c1, %c1_15, %c0_16], %17 {strides = array<i32>} : memref<8x8x1152xbf16, #tpu.memory_space<vmem>>, vector<7x7x128xbf16>,
    %cst_17 = arith.constant 0.000000e+00 : bf16
    %19 = vector.broadcast %cst_17 : bf16 to vector<1x8x128xbf16>
    %c0_18 = arith.constant 0 : index
    %c0_19 = arith.constant 0 : index
    %c128 = arith.constant 128 : index
    %20 = vector.load %arg7[%c0_18, %c0_19, %c128] : memref<8x8x1152xbf16, #tpu.memory_space<vmem>>, vector<1x8x128xbf16>
    tpu.vector_store %arg7[%c0_18, %c0_19, %c128], %19 {strides = array<i32>} : memref<8x8x1152xbf16, #tpu.memory_space<vmem>>, vector<1x8x128xbf16>,
    %c0_20 = arith.constant 0 : index
    %c2 = arith.constant 2 : index
    %c0_21 = arith.constant 0 : index
    %c0_22 = arith.constant 0 : index
    %c0_23 = arith.constant 0 : index
    %21 = vector.load %arg1[%c0_20, %c2, %c0_21, %c0_22, %c0_23] : memref<1x4x8x8x128xbf16, #tpu.memory_space<vmem>>, vector<1x1x7x8x128xbf16>
    %22 = vector.shape_cast %21 : vector<1x1x7x8x128xbf16> to vector<7x8x128xbf16>
    %23 = arith.extf %22 : vector<7x8x128xbf16> to vector<7x8x128xf32>
    %24 = vector.broadcast %1 : vector<1x1x128xf32> to vector<7x8x128xf32>
    %25 = arith.mulf %23, %24 : vector<7x8x128xf32>
    %26 = vector.broadcast %3 : vector<1x1x128xf32> to vector<7x8x128xf32>
    %27 = arith.addf %25, %26 : vector<7x8x128xf32>
    %cst_24 = arith.constant 0.000000e+00 : f32
    %28 = vector.broadcast %cst_24 : f32 to vector<7x8x128xf32>
    %29 = arith.maximumf %27, %28 : vector<7x8x128xf32>
    %30 = arith.truncf %29 : vector<7x8x128xf32> to vector<7x8x128xbf16>
    %c1_25 = arith.constant 1 : index
    %c0_26 = arith.constant 0 : index
    %c128_27 = arith.constant 128 : index
    %31 = vector.load %arg7[%c1_25, %c0_26, %c128_27] : memref<8x8x1152xbf16, #tpu.memory_space<vmem>>, vector<7x8x128xbf16>
    tpu.vector_store %arg7[%c1_25, %c0_26, %c128_27], %30 {strides = array<i32>} : memref<8x8x1152xbf16, #tpu.memory_space<vmem>>, vector<7x8x128xbf16>,
    %cst_28 = arith.constant 0.000000e+00 : bf16
    %32 = vector.broadcast %cst_28 : bf16 to vector<1x8x128xbf16>
    %c0_29 = arith.constant 0 : index
    %c0_30 = arith.constant 0 : index
    %c256 = arith.constant 256 : index
    %33 = vector.load %arg7[%c0_29, %c0_30, %c256] : memref<8x8x1152xbf16, #tpu.memory_space<vmem>>, vector<1x8x128xbf16>
    tpu.vector_store %arg7[%c0_29, %c0_30, %c256], %32 {strides = array<i32>} : memref<8x8x1152xbf16, #tpu.memory_space<vmem>>, vector<1x8x128xbf16>,
    %c0_31 = arith.constant 0 : index
    %c3_32 = arith.constant 3 : index
    %c0_33 = arith.constant 0 : index
    %c0_34 = arith.constant 0 : index
    %c0_35 = arith.constant 0 : index
    %34 = vector.load %arg1[%c0_31, %c3_32, %c0_33, %c0_34, %c0_35] : memref<1x4x8x8x128xbf16, #tpu.memory_space<vmem>>, vector<1x1x7x8x128xbf16>
    %35 = vector.shape_cast %34 : vector<1x1x7x8x128xbf16> to vector<7x8x128xbf16>
    %36 = arith.extf %35 : vector<7x8x128xbf16> to vector<7x8x128xf32>
    %37 = vector.broadcast %1 : vector<1x1x128xf32> to vector<7x8x128xf32>
    %38 = arith.mulf %36, %37 : vector<7x8x128xf32>
    %39 = vector.broadcast %3 : vector<1x1x128xf32> to vector<7x8x128xf32>
    %40 = arith.addf %38, %39 : vector<7x8x128xf32>
    %cst_36 = arith.constant 0.000000e+00 : f32
    %41 = vector.broadcast %cst_36 : f32 to vector<7x8x128xf32>
    %42 = arith.maximumf %40, %41 : vector<7x8x128xf32>
    %43 = arith.truncf %42 : vector<7x8x128xf32> to vector<7x8x128xbf16>
    %c1_37 = arith.constant 1 : index
    %c0_38 = arith.constant 0 : index
    %c256_39 = arith.constant 256 : index
    %44 = vector.load %arg7[%c1_37, %c0_38, %c256_39] : memref<8x8x1152xbf16, #tpu.memory_space<vmem>>, vector<7x8x128xbf16>
    tpu.vector_store %arg7[%c1_37, %c0_38, %c256_39], %43 {strides = array<i32>} : memref<8x8x1152xbf16, #tpu.memory_space<vmem>>, vector<7x8x128xbf16>,
    %cst_40 = arith.constant 0.000000e+00 : bf16
    %45 = vector.broadcast %cst_40 : bf16 to vector<8x1x128xbf16>
    %c0_41 = arith.constant 0 : index
    %c0_42 = arith.constant 0 : index
    %c384 = arith.constant 384 : index
    %46 = vector.load %arg7[%c0_41, %c0_42, %c384] : memref<8x8x1152xbf16, #tpu.memory_space<vmem>>, vector<8x1x128xbf16>
    tpu.vector_store %arg7[%c0_41, %c0_42, %c384], %45 {strides = array<i32>} : memref<8x8x1152xbf16, #tpu.memory_space<vmem>>, vector<8x1x128xbf16>,
    %c0_43 = arith.constant 0 : index
    %c1_44 = arith.constant 1 : index
    %c0_45 = arith.constant 0 : index
    %c0_46 = arith.constant 0 : index
    %c0_47 = arith.constant 0 : index
    %47 = vector.load %arg1[%c0_43, %c1_44, %c0_45, %c0_46, %c0_47] : memref<1x4x8x8x128xbf16, #tpu.memory_space<vmem>>, vector<1x1x8x7x128xbf16>
    %48 = vector.shape_cast %47 : vector<1x1x8x7x128xbf16> to vector<8x7x128xbf16>
    %49 = arith.extf %48 : vector<8x7x128xbf16> to vector<8x7x128xf32>
    %50 = vector.broadcast %1 : vector<1x1x128xf32> to vector<8x7x128xf32>
    %51 = arith.mulf %49, %50 : vector<8x7x128xf32>
    %52 = vector.broadcast %3 : vector<1x1x128xf32> to vector<8x7x128xf32>
    %53 = arith.addf %51, %52 : vector<8x7x128xf32>
    %cst_48 = arith.constant 0.000000e+00 : f32
    %54 = vector.broadcast %cst_48 : f32 to vector<8x7x128xf32>
    %55 = arith.maximumf %53, %54 : vector<8x7x128xf32>
    %56 = arith.truncf %55 : vector<8x7x128xf32> to vector<8x7x128xbf16>
    %c0_49 = arith.constant 0 : index
    %c1_50 = arith.constant 1 : index
    %c384_51 = arith.constant 384 : index
    %57 = vector.load %arg7[%c0_49, %c1_50, %c384_51] : memref<8x8x1152xbf16, #tpu.memory_space<vmem>>, vector<8x7x128xbf16>
    tpu.vector_store %arg7[%c0_49, %c1_50, %c384_51], %56 {strides = array<i32>} : memref<8x8x1152xbf16, #tpu.memory_space<vmem>>, vector<8x7x128xbf16>,
    %c0_52 = arith.constant 0 : index
    %c0_53 = arith.constant 0 : index
    %c0_54 = arith.constant 0 : index
    %c0_55 = arith.constant 0 : index
    %c0_56 = arith.constant 0 : index
    %58 = vector.load %arg1[%c0_52, %c0_53, %c0_54, %c0_55, %c0_56] : memref<1x4x8x8x128xbf16, #tpu.memory_space<vmem>>, vector<1x1x8x8x128xbf16>
    %59 = vector.shape_cast %58 : vector<1x1x8x8x128xbf16> to vector<8x8x128xbf16>
    %60 = arith.extf %59 : vector<8x8x128xbf16> to vector<8x8x128xf32>
    %61 = vector.broadcast %1 : vector<1x1x128xf32> to vector<8x8x128xf32>
    %62 = arith.mulf %60, %61 : vector<8x8x128xf32>
    %63 = vector.broadcast %3 : vector<1x1x128xf32> to vector<8x8x128xf32>
    %64 = arith.addf %62, %63 : vector<8x8x128xf32>
    %cst_57 = arith.constant 0.000000e+00 : f32
    %65 = vector.broadcast %cst_57 : f32 to vector<8x8x128xf32>
    %66 = arith.maximumf %64, %65 : vector<8x8x128xf32>
    %67 = arith.truncf %66 : vector<8x8x128xf32> to vector<8x8x128xbf16>
    %c0_58 = arith.constant 0 : index
    %c0_59 = arith.constant 0 : index
    %c512 = arith.constant 512 : index
    %68 = vector.load %arg7[%c0_58, %c0_59, %c512] : memref<8x8x1152xbf16, #tpu.memory_space<vmem>>, vector<8x8x128xbf16>
    tpu.vector_store %arg7[%c0_58, %c0_59, %c512], %67 {strides = array<i32>} : memref<8x8x1152xbf16, #tpu.memory_space<vmem>>, vector<8x8x128xbf16>,
    %c0_60 = arith.constant 0 : index
    %c1_61 = arith.constant 1 : index
    %c0_62 = arith.constant 0 : index
    %c0_63 = arith.constant 0 : index
    %c0_64 = arith.constant 0 : index
    %69 = vector.load %arg1[%c0_60, %c1_61, %c0_62, %c0_63, %c0_64] : memref<1x4x8x8x128xbf16, #tpu.memory_space<vmem>>, vector<1x1x8x8x128xbf16>
    %70 = vector.shape_cast %69 : vector<1x1x8x8x128xbf16> to vector<8x8x128xbf16>
    %71 = arith.extf %70 : vector<8x8x128xbf16> to vector<8x8x128xf32>
    %72 = vector.broadcast %1 : vector<1x1x128xf32> to vector<8x8x128xf32>
    %73 = arith.mulf %71, %72 : vector<8x8x128xf32>
    %74 = vector.broadcast %3 : vector<1x1x128xf32> to vector<8x8x128xf32>
    %75 = arith.addf %73, %74 : vector<8x8x128xf32>
    %cst_65 = arith.constant 0.000000e+00 : f32
    %76 = vector.broadcast %cst_65 : f32 to vector<8x8x128xf32>
    %77 = arith.maximumf %75, %76 : vector<8x8x128xf32>
    %78 = arith.truncf %77 : vector<8x8x128xf32> to vector<8x8x128xbf16>
    %c0_66 = arith.constant 0 : index
    %c0_67 = arith.constant 0 : index
    %c640 = arith.constant 640 : index
    %79 = vector.load %arg7[%c0_66, %c0_67, %c640] : memref<8x8x1152xbf16, #tpu.memory_space<vmem>>, vector<8x8x128xbf16>
    tpu.vector_store %arg7[%c0_66, %c0_67, %c640], %78 {strides = array<i32>} : memref<8x8x1152xbf16, #tpu.memory_space<vmem>>, vector<8x8x128xbf16>,
    %cst_68 = arith.constant 0.000000e+00 : bf16
    %80 = vector.broadcast %cst_68 : bf16 to vector<8x1x128xbf16>
    %c0_69 = arith.constant 0 : index
    %c0_70 = arith.constant 0 : index
    %c768 = arith.constant 768 : index
    %81 = vector.load %arg7[%c0_69, %c0_70, %c768] : memref<8x8x1152xbf16, #tpu.memory_space<vmem>>, vector<8x1x128xbf16>
    tpu.vector_store %arg7[%c0_69, %c0_70, %c768], %80 {strides = array<i32>} : memref<8x8x1152xbf16, #tpu.memory_space<vmem>>, vector<8x1x128xbf16>,
    %c0_71 = arith.constant 0 : index
    %c3_72 = arith.constant 3 : index
    %c0_73 = arith.constant 0 : index
    %c0_74 = arith.constant 0 : index
    %c0_75 = arith.constant 0 : index
    %82 = vector.load %arg1[%c0_71, %c3_72, %c0_73, %c0_74, %c0_75] : memref<1x4x8x8x128xbf16, #tpu.memory_space<vmem>>, vector<1x1x8x7x128xbf16>
    %83 = vector.shape_cast %82 : vector<1x1x8x7x128xbf16> to vector<8x7x128xbf16>
    %84 = arith.extf %83 : vector<8x7x128xbf16> to vector<8x7x128xf32>
    %85 = vector.broadcast %1 : vector<1x1x128xf32> to vector<8x7x128xf32>
    %86 = arith.mulf %84, %85 : vector<8x7x128xf32>
    %87 = vector.broadcast %3 : vector<1x1x128xf32> to vector<8x7x128xf32>
    %88 = arith.addf %86, %87 : vector<8x7x128xf32>
    %cst_76 = arith.constant 0.000000e+00 : f32
    %89 = vector.broadcast %cst_76 : f32 to vector<8x7x128xf32>
    %90 = arith.maximumf %88, %89 : vector<8x7x128xf32>
    %91 = arith.truncf %90 : vector<8x7x128xf32> to vector<8x7x128xbf16>
    %c0_77 = arith.constant 0 : index
    %c1_78 = arith.constant 1 : index
    %c768_79 = arith.constant 768 : index
    %92 = vector.load %arg7[%c0_77, %c1_78, %c768_79] : memref<8x8x1152xbf16, #tpu.memory_space<vmem>>, vector<8x7x128xbf16>
    tpu.vector_store %arg7[%c0_77, %c1_78, %c768_79], %91 {strides = array<i32>} : memref<8x8x1152xbf16, #tpu.memory_space<vmem>>, vector<8x7x128xbf16>,
    %c0_80 = arith.constant 0 : index
    %c2_81 = arith.constant 2 : index
    %c0_82 = arith.constant 0 : index
    %c0_83 = arith.constant 0 : index
    %c0_84 = arith.constant 0 : index
    %93 = vector.load %arg1[%c0_80, %c2_81, %c0_82, %c0_83, %c0_84] : memref<1x4x8x8x128xbf16, #tpu.memory_space<vmem>>, vector<1x1x8x8x128xbf16>
    %94 = vector.shape_cast %93 : vector<1x1x8x8x128xbf16> to vector<8x8x128xbf16>
    %95 = arith.extf %94 : vector<8x8x128xbf16> to vector<8x8x128xf32>
    %96 = vector.broadcast %1 : vector<1x1x128xf32> to vector<8x8x128xf32>
    %97 = arith.mulf %95, %96 : vector<8x8x128xf32>
    %98 = vector.broadcast %3 : vector<1x1x128xf32> to vector<8x8x128xf32>
    %99 = arith.addf %97, %98 : vector<8x8x128xf32>
    %cst_85 = arith.constant 0.000000e+00 : f32
    %100 = vector.broadcast %cst_85 : f32 to vector<8x8x128xf32>
    %101 = arith.maximumf %99, %100 : vector<8x8x128xf32>
    %102 = arith.truncf %101 : vector<8x8x128xf32> to vector<8x8x128xbf16>
    %c0_86 = arith.constant 0 : index
    %c0_87 = arith.constant 0 : index
    %c896 = arith.constant 896 : index
    %103 = vector.load %arg7[%c0_86, %c0_87, %c896] : memref<8x8x1152xbf16, #tpu.memory_space<vmem>>, vector<8x8x128xbf16>
    tpu.vector_store %arg7[%c0_86, %c0_87, %c896], %102 {strides = array<i32>} : memref<8x8x1152xbf16, #tpu.memory_space<vmem>>, vector<8x8x128xbf16>,
    %c0_88 = arith.constant 0 : index
    %c3_89 = arith.constant 3 : index
    %c0_90 = arith.constant 0 : index
    %c0_91 = arith.constant 0 : index
    %c0_92 = arith.constant 0 : index
    %104 = vector.load %arg1[%c0_88, %c3_89, %c0_90, %c0_91, %c0_92] : memref<1x4x8x8x128xbf16, #tpu.memory_space<vmem>>, vector<1x1x8x8x128xbf16>
    %105 = vector.shape_cast %104 : vector<1x1x8x8x128xbf16> to vector<8x8x128xbf16>
    %106 = arith.extf %105 : vector<8x8x128xbf16> to vector<8x8x128xf32>
    %107 = vector.broadcast %1 : vector<1x1x128xf32> to vector<8x8x128xf32>
    %108 = arith.mulf %106, %107 : vector<8x8x128xf32>
    %109 = vector.broadcast %3 : vector<1x1x128xf32> to vector<8x8x128xf32>
    %110 = arith.addf %108, %109 : vector<8x8x128xf32>
    %cst_93 = arith.constant 0.000000e+00 : f32
    %111 = vector.broadcast %cst_93 : f32 to vector<8x8x128xf32>
    %112 = arith.maximumf %110, %111 : vector<8x8x128xf32>
    %113 = arith.truncf %112 : vector<8x8x128xf32> to vector<8x8x128xbf16>
    %c0_94 = arith.constant 0 : index
    %c0_95 = arith.constant 0 : index
    %c1024 = arith.constant 1024 : index
    %114 = vector.load %arg7[%c0_94, %c0_95, %c1024] : memref<8x8x1152xbf16, #tpu.memory_space<vmem>>, vector<8x8x128xbf16>
    tpu.vector_store %arg7[%c0_94, %c0_95, %c1024], %113 {strides = array<i32>} : memref<8x8x1152xbf16, #tpu.memory_space<vmem>>, vector<8x8x128xbf16>,
    %c0_96 = arith.constant 0 : index
    %c0_97 = arith.constant 0 : index
    %c0_98 = arith.constant 0 : index
    %115 = vector.load %arg7[%c0_96, %c0_97, %c0_98] : memref<8x8x1152xbf16, #tpu.memory_space<vmem>>, vector<8x8x1152xbf16>
    %116 = vector.shape_cast %115 : vector<8x8x1152xbf16> to vector<64x1152xbf16>
    %c0_99 = arith.constant 0 : index
    %c0_100 = arith.constant 0 : index
    %117 = vector.load %arg4[%c0_99, %c0_100] : memref<1152x128xbf16, #tpu.memory_space<vmem>>, vector<1152x128xbf16>
    %cst_101 = arith.constant dense<0.000000e+00> : vector<64x128xf32>
    %118 = tpu.matmul %116, %117, %cst_101 {dimension_numbers = #tpu.dot_dimension_numbers<[1], [0], [0], [1], [0, 0, 1, 1], [], []>} : vector<64x1152xbf16>, vector<1152x128xbf16>, vector<64x128xf32> -> vector<64x128xf32>
    %119 = arith.truncf %118 : vector<64x128xf32> to vector<64x128xbf16>
    %c0_102 = arith.constant 0 : index
    %c0_103 = arith.constant 0 : index
    %c0_104 = arith.constant 0 : index
    %120 = vector.load %arg5[%c0_102, %c0_103, %c0_104] : memref<1x64x128xbf16, #tpu.memory_space<vmem>>, vector<1x64x128xbf16>
    %121 = vector.shape_cast %120 : vector<1x64x128xbf16> to vector<64x128xbf16>
    %122 = vector.shape_cast %119 : vector<64x128xbf16> to vector<1x64x128xbf16>
    tpu.vector_store %arg5[%c0_102, %c0_103, %c0_104], %122 {strides = array<i32>} : memref<1x64x128xbf16, #tpu.memory_space<vmem>>, vector<1x64x128xbf16>,
    %cst_105 = arith.constant dense<0.000000e+00> : vector<128xf32>
    %123 = vector.multi_reduction <add>, %118, %cst_105 [0] : vector<64x128xf32> to vector<128xf32>
    %124 = vector.shape_cast %123 : vector<128xf32> to vector<1x128xf32>
    %c0_106 = arith.constant 0 : index
    %c0_107 = arith.constant 0 : index
    %c0_108 = arith.constant 0 : index
    %125 = vector.load %arg6[%c0_106, %c0_107, %c0_108] : memref<1x2x128xf32, #tpu.memory_space<vmem>>, vector<1x1x128xf32>
    %126 = vector.shape_cast %125 : vector<1x1x128xf32> to vector<1x128xf32>
    %127 = vector.shape_cast %124 : vector<1x128xf32> to vector<1x1x128xf32>
    tpu.vector_store %arg6[%c0_106, %c0_107, %c0_108], %127 {strides = array<i32>} : memref<1x2x128xf32, #tpu.memory_space<vmem>>, vector<1x1x128xf32>,
    %128 = arith.mulf %118, %118 : vector<64x128xf32>
    %cst_109 = arith.constant dense<0.000000e+00> : vector<128xf32>
    %129 = vector.multi_reduction <add>, %128, %cst_109 [0] : vector<64x128xf32> to vector<128xf32>
    %130 = vector.shape_cast %129 : vector<128xf32> to vector<1x128xf32>
    %c0_110 = arith.constant 0 : index
    %c1_111 = arith.constant 1 : index
    %c0_112 = arith.constant 0 : index
    %131 = vector.load %arg6[%c0_110, %c1_111, %c0_112] : memref<1x2x128xf32, #tpu.memory_space<vmem>>, vector<1x1x128xf32>
    %132 = vector.shape_cast %131 : vector<1x1x128xf32> to vector<1x128xf32>
    %133 = vector.shape_cast %130 : vector<1x128xf32> to vector<1x1x128xf32>
    tpu.vector_store %arg6[%c0_110, %c1_111, %c0_112], %133 {strides = array<i32>} : memref<1x2x128xf32, #tpu.memory_space<vmem>>, vector<1x1x128xf32>,
    return
  }
  func.func @transform_0(%arg0: i32) -> (i32, i32, i32, i32, i32) {
    %c0_i32 = arith.constant 0 : i32
    %c0_i32_0 = arith.constant 0 : i32
    %c0_i32_1 = arith.constant 0 : i32
    %c0_i32_2 = arith.constant 0 : i32
    %c0_i32_3 = arith.constant 0 : i32
    return %arg0, %c0_i32, %c0_i32_0, %c0_i32_1, %c0_i32_2 : i32, i32, i32, i32, i32
  }
  func.func @transform_1(%arg0: i32) -> (i32, i32) {
    %c0_i32 = arith.constant 0 : i32
    %c0_i32_0 = arith.constant 0 : i32
    %c0_i32_1 = arith.constant 0 : i32
    return %c0_i32, %c0_i32_0 : i32, i32
  }
  func.func @transform_2(%arg0: i32) -> (i32, i32) {
    %c0_i32 = arith.constant 0 : i32
    %c0_i32_0 = arith.constant 0 : i32
    %c0_i32_1 = arith.constant 0 : i32
    return %c0_i32, %c0_i32_0 : i32, i32
  }
  func.func @transform_3(%arg0: i32) -> (i32, i32) {
    %c0_i32 = arith.constant 0 : i32
    %c0_i32_0 = arith.constant 0 : i32
    %c0_i32_1 = arith.constant 0 : i32
    return %c0_i32, %c0_i32_0 : i32, i32
  }
  func.func @transform_4(%arg0: i32) -> (i32, i32, i32) {
    %c0_i32 = arith.constant 0 : i32
    %c0_i32_0 = arith.constant 0 : i32
    %c0_i32_1 = arith.constant 0 : i32
    return %arg0, %c0_i32, %c0_i32_0 : i32, i32, i32
  }
  func.func @transform_5(%arg0: i32) -> (i32, i32, i32) {
    %c0_i32 = arith.constant 0 : i32
    %c0_i32_0 = arith.constant 0 : i32
    %c0_i32_1 = arith.constant 0 : i32
    return %arg0, %c0_i32, %c0_i32_0 : i32, i32, i32
  }
}

module attributes {stable_mosaic.version = 11 : i64} {
  func.func @kernel(%arg0: i32, %arg1: memref<1x4x4x4x128xbf16, #tpu.memory_space<vmem>>, %arg2: memref<1x128xf32, #tpu.memory_space<vmem>>, %arg3: memref<1x128xf32, #tpu.memory_space<vmem>>, %arg4: memref<1152x128xbf16, #tpu.memory_space<vmem>>, %arg5: memref<1x16x128xbf16, #tpu.memory_space<vmem>>, %arg6: memref<1x2x128xf32, #tpu.memory_space<vmem>>, %arg7: memref<4x4x1152xbf16, #tpu.memory_space<vmem>>) attributes {dimension_semantics = [#tpu.dimension_semantics<parallel>], iteration_bounds = array<i64: 2>, scalar_prefetch = 0 : i64, scratch_operands = 1 : i64, tpu.core_type = #tpu.core_type<tc>, window_params = [{transform_indices = @transform_0, window_bounds = array<i64: 1, 4, 4, 4, 128>}, {pipeline_mode = #tpu.pipeline_mode<synchronous>, transform_indices = @transform_1, window_bounds = array<i64: 1, 128>}, {pipeline_mode = #tpu.pipeline_mode<synchronous>, transform_indices = @transform_2, window_bounds = array<i64: 1, 128>}, {pipeline_mode = #tpu.pipeline_mode<synchronous>, transform_indices = @transform_3, window_bounds = array<i64: 1152, 128>}, {transform_indices = @transform_4, window_bounds = array<i64: 1, 16, 128>}, {transform_indices = @transform_5, window_bounds = array<i64: 1, 2, 128>}]} {
    %c0 = arith.constant 0 : index
    %c0_0 = arith.constant 0 : index
    %0 = vector.load %arg2[%c0, %c0_0] : memref<1x128xf32, #tpu.memory_space<vmem>>, vector<1x128xf32>
    %1 = vector.shape_cast %0 : vector<1x128xf32> to vector<1x1x128xf32>
    %c0_1 = arith.constant 0 : index
    %c0_2 = arith.constant 0 : index
    %2 = vector.load %arg3[%c0_1, %c0_2] : memref<1x128xf32, #tpu.memory_space<vmem>>, vector<1x128xf32>
    %3 = vector.shape_cast %2 : vector<1x128xf32> to vector<1x1x128xf32>
    %cst = arith.constant 0.000000e+00 : bf16
    %4 = vector.broadcast %cst : bf16 to vector<1x4x128xbf16>
    %c0_3 = arith.constant 0 : index
    %c0_4 = arith.constant 0 : index
    %c0_5 = arith.constant 0 : index
    %5 = vector.load %arg7[%c0_3, %c0_4, %c0_5] : memref<4x4x1152xbf16, #tpu.memory_space<vmem>>, vector<1x4x128xbf16>
    tpu.vector_store %arg7[%c0_3, %c0_4, %c0_5], %4 {strides = array<i32>} : memref<4x4x1152xbf16, #tpu.memory_space<vmem>>, vector<1x4x128xbf16>,
    %cst_6 = arith.constant 0.000000e+00 : bf16
    %6 = vector.broadcast %cst_6 : bf16 to vector<4x1x128xbf16>
    %c0_7 = arith.constant 0 : index
    %c0_8 = arith.constant 0 : index
    %c0_9 = arith.constant 0 : index
    %7 = vector.load %arg7[%c0_7, %c0_8, %c0_9] : memref<4x4x1152xbf16, #tpu.memory_space<vmem>>, vector<4x1x128xbf16>
    tpu.vector_store %arg7[%c0_7, %c0_8, %c0_9], %6 {strides = array<i32>} : memref<4x4x1152xbf16, #tpu.memory_space<vmem>>, vector<4x1x128xbf16>,
    %c0_10 = arith.constant 0 : index
    %c3 = arith.constant 3 : index
    %c0_11 = arith.constant 0 : index
    %c0_12 = arith.constant 0 : index
    %c0_13 = arith.constant 0 : index
    %8 = vector.load %arg1[%c0_10, %c3, %c0_11, %c0_12, %c0_13] : memref<1x4x4x4x128xbf16, #tpu.memory_space<vmem>>, vector<1x1x3x3x128xbf16>
    %9 = vector.shape_cast %8 : vector<1x1x3x3x128xbf16> to vector<3x3x128xbf16>
    %10 = arith.extf %9 : vector<3x3x128xbf16> to vector<3x3x128xf32>
    %11 = vector.broadcast %1 : vector<1x1x128xf32> to vector<3x3x128xf32>
    %12 = arith.mulf %10, %11 : vector<3x3x128xf32>
    %13 = vector.broadcast %3 : vector<1x1x128xf32> to vector<3x3x128xf32>
    %14 = arith.addf %12, %13 : vector<3x3x128xf32>
    %cst_14 = arith.constant 0.000000e+00 : f32
    %15 = vector.broadcast %cst_14 : f32 to vector<3x3x128xf32>
    %16 = arith.maximumf %14, %15 : vector<3x3x128xf32>
    %17 = arith.truncf %16 : vector<3x3x128xf32> to vector<3x3x128xbf16>
    %c1 = arith.constant 1 : index
    %c1_15 = arith.constant 1 : index
    %c0_16 = arith.constant 0 : index
    %18 = vector.load %arg7[%c1, %c1_15, %c0_16] : memref<4x4x1152xbf16, #tpu.memory_space<vmem>>, vector<3x3x128xbf16>
    tpu.vector_store %arg7[%c1, %c1_15, %c0_16], %17 {strides = array<i32>} : memref<4x4x1152xbf16, #tpu.memory_space<vmem>>, vector<3x3x128xbf16>,
    %cst_17 = arith.constant 0.000000e+00 : bf16
    %19 = vector.broadcast %cst_17 : bf16 to vector<1x4x128xbf16>
    %c0_18 = arith.constant 0 : index
    %c0_19 = arith.constant 0 : index
    %c128 = arith.constant 128 : index
    %20 = vector.load %arg7[%c0_18, %c0_19, %c128] : memref<4x4x1152xbf16, #tpu.memory_space<vmem>>, vector<1x4x128xbf16>
    tpu.vector_store %arg7[%c0_18, %c0_19, %c128], %19 {strides = array<i32>} : memref<4x4x1152xbf16, #tpu.memory_space<vmem>>, vector<1x4x128xbf16>,
    %c0_20 = arith.constant 0 : index
    %c2 = arith.constant 2 : index
    %c0_21 = arith.constant 0 : index
    %c0_22 = arith.constant 0 : index
    %c0_23 = arith.constant 0 : index
    %21 = vector.load %arg1[%c0_20, %c2, %c0_21, %c0_22, %c0_23] : memref<1x4x4x4x128xbf16, #tpu.memory_space<vmem>>, vector<1x1x3x4x128xbf16>
    %22 = vector.shape_cast %21 : vector<1x1x3x4x128xbf16> to vector<3x4x128xbf16>
    %23 = arith.extf %22 : vector<3x4x128xbf16> to vector<3x4x128xf32>
    %24 = vector.broadcast %1 : vector<1x1x128xf32> to vector<3x4x128xf32>
    %25 = arith.mulf %23, %24 : vector<3x4x128xf32>
    %26 = vector.broadcast %3 : vector<1x1x128xf32> to vector<3x4x128xf32>
    %27 = arith.addf %25, %26 : vector<3x4x128xf32>
    %cst_24 = arith.constant 0.000000e+00 : f32
    %28 = vector.broadcast %cst_24 : f32 to vector<3x4x128xf32>
    %29 = arith.maximumf %27, %28 : vector<3x4x128xf32>
    %30 = arith.truncf %29 : vector<3x4x128xf32> to vector<3x4x128xbf16>
    %c1_25 = arith.constant 1 : index
    %c0_26 = arith.constant 0 : index
    %c128_27 = arith.constant 128 : index
    %31 = vector.load %arg7[%c1_25, %c0_26, %c128_27] : memref<4x4x1152xbf16, #tpu.memory_space<vmem>>, vector<3x4x128xbf16>
    tpu.vector_store %arg7[%c1_25, %c0_26, %c128_27], %30 {strides = array<i32>} : memref<4x4x1152xbf16, #tpu.memory_space<vmem>>, vector<3x4x128xbf16>,
    %cst_28 = arith.constant 0.000000e+00 : bf16
    %32 = vector.broadcast %cst_28 : bf16 to vector<1x4x128xbf16>
    %c0_29 = arith.constant 0 : index
    %c0_30 = arith.constant 0 : index
    %c256 = arith.constant 256 : index
    %33 = vector.load %arg7[%c0_29, %c0_30, %c256] : memref<4x4x1152xbf16, #tpu.memory_space<vmem>>, vector<1x4x128xbf16>
    tpu.vector_store %arg7[%c0_29, %c0_30, %c256], %32 {strides = array<i32>} : memref<4x4x1152xbf16, #tpu.memory_space<vmem>>, vector<1x4x128xbf16>,
    %c0_31 = arith.constant 0 : index
    %c3_32 = arith.constant 3 : index
    %c0_33 = arith.constant 0 : index
    %c0_34 = arith.constant 0 : index
    %c0_35 = arith.constant 0 : index
    %34 = vector.load %arg1[%c0_31, %c3_32, %c0_33, %c0_34, %c0_35] : memref<1x4x4x4x128xbf16, #tpu.memory_space<vmem>>, vector<1x1x3x4x128xbf16>
    %35 = vector.shape_cast %34 : vector<1x1x3x4x128xbf16> to vector<3x4x128xbf16>
    %36 = arith.extf %35 : vector<3x4x128xbf16> to vector<3x4x128xf32>
    %37 = vector.broadcast %1 : vector<1x1x128xf32> to vector<3x4x128xf32>
    %38 = arith.mulf %36, %37 : vector<3x4x128xf32>
    %39 = vector.broadcast %3 : vector<1x1x128xf32> to vector<3x4x128xf32>
    %40 = arith.addf %38, %39 : vector<3x4x128xf32>
    %cst_36 = arith.constant 0.000000e+00 : f32
    %41 = vector.broadcast %cst_36 : f32 to vector<3x4x128xf32>
    %42 = arith.maximumf %40, %41 : vector<3x4x128xf32>
    %43 = arith.truncf %42 : vector<3x4x128xf32> to vector<3x4x128xbf16>
    %c1_37 = arith.constant 1 : index
    %c0_38 = arith.constant 0 : index
    %c256_39 = arith.constant 256 : index
    %44 = vector.load %arg7[%c1_37, %c0_38, %c256_39] : memref<4x4x1152xbf16, #tpu.memory_space<vmem>>, vector<3x4x128xbf16>
    tpu.vector_store %arg7[%c1_37, %c0_38, %c256_39], %43 {strides = array<i32>} : memref<4x4x1152xbf16, #tpu.memory_space<vmem>>, vector<3x4x128xbf16>,
    %cst_40 = arith.constant 0.000000e+00 : bf16
    %45 = vector.broadcast %cst_40 : bf16 to vector<4x1x128xbf16>
    %c0_41 = arith.constant 0 : index
    %c0_42 = arith.constant 0 : index
    %c384 = arith.constant 384 : index
    %46 = vector.load %arg7[%c0_41, %c0_42, %c384] : memref<4x4x1152xbf16, #tpu.memory_space<vmem>>, vector<4x1x128xbf16>
    tpu.vector_store %arg7[%c0_41, %c0_42, %c384], %45 {strides = array<i32>} : memref<4x4x1152xbf16, #tpu.memory_space<vmem>>, vector<4x1x128xbf16>,
    %c0_43 = arith.constant 0 : index
    %c1_44 = arith.constant 1 : index
    %c0_45 = arith.constant 0 : index
    %c0_46 = arith.constant 0 : index
    %c0_47 = arith.constant 0 : index
    %47 = vector.load %arg1[%c0_43, %c1_44, %c0_45, %c0_46, %c0_47] : memref<1x4x4x4x128xbf16, #tpu.memory_space<vmem>>, vector<1x1x4x3x128xbf16>
    %48 = vector.shape_cast %47 : vector<1x1x4x3x128xbf16> to vector<4x3x128xbf16>
    %49 = arith.extf %48 : vector<4x3x128xbf16> to vector<4x3x128xf32>
    %50 = vector.broadcast %1 : vector<1x1x128xf32> to vector<4x3x128xf32>
    %51 = arith.mulf %49, %50 : vector<4x3x128xf32>
    %52 = vector.broadcast %3 : vector<1x1x128xf32> to vector<4x3x128xf32>
    %53 = arith.addf %51, %52 : vector<4x3x128xf32>
    %cst_48 = arith.constant 0.000000e+00 : f32
    %54 = vector.broadcast %cst_48 : f32 to vector<4x3x128xf32>
    %55 = arith.maximumf %53, %54 : vector<4x3x128xf32>
    %56 = arith.truncf %55 : vector<4x3x128xf32> to vector<4x3x128xbf16>
    %c0_49 = arith.constant 0 : index
    %c1_50 = arith.constant 1 : index
    %c384_51 = arith.constant 384 : index
    %57 = vector.load %arg7[%c0_49, %c1_50, %c384_51] : memref<4x4x1152xbf16, #tpu.memory_space<vmem>>, vector<4x3x128xbf16>
    tpu.vector_store %arg7[%c0_49, %c1_50, %c384_51], %56 {strides = array<i32>} : memref<4x4x1152xbf16, #tpu.memory_space<vmem>>, vector<4x3x128xbf16>,
    %c0_52 = arith.constant 0 : index
    %c0_53 = arith.constant 0 : index
    %c0_54 = arith.constant 0 : index
    %c0_55 = arith.constant 0 : index
    %c0_56 = arith.constant 0 : index
    %58 = vector.load %arg1[%c0_52, %c0_53, %c0_54, %c0_55, %c0_56] : memref<1x4x4x4x128xbf16, #tpu.memory_space<vmem>>, vector<1x1x4x4x128xbf16>
    %59 = vector.shape_cast %58 : vector<1x1x4x4x128xbf16> to vector<4x4x128xbf16>
    %60 = arith.extf %59 : vector<4x4x128xbf16> to vector<4x4x128xf32>
    %61 = vector.broadcast %1 : vector<1x1x128xf32> to vector<4x4x128xf32>
    %62 = arith.mulf %60, %61 : vector<4x4x128xf32>
    %63 = vector.broadcast %3 : vector<1x1x128xf32> to vector<4x4x128xf32>
    %64 = arith.addf %62, %63 : vector<4x4x128xf32>
    %cst_57 = arith.constant 0.000000e+00 : f32
    %65 = vector.broadcast %cst_57 : f32 to vector<4x4x128xf32>
    %66 = arith.maximumf %64, %65 : vector<4x4x128xf32>
    %67 = arith.truncf %66 : vector<4x4x128xf32> to vector<4x4x128xbf16>
    %c0_58 = arith.constant 0 : index
    %c0_59 = arith.constant 0 : index
    %c512 = arith.constant 512 : index
    %68 = vector.load %arg7[%c0_58, %c0_59, %c512] : memref<4x4x1152xbf16, #tpu.memory_space<vmem>>, vector<4x4x128xbf16>
    tpu.vector_store %arg7[%c0_58, %c0_59, %c512], %67 {strides = array<i32>} : memref<4x4x1152xbf16, #tpu.memory_space<vmem>>, vector<4x4x128xbf16>,
    %c0_60 = arith.constant 0 : index
    %c1_61 = arith.constant 1 : index
    %c0_62 = arith.constant 0 : index
    %c0_63 = arith.constant 0 : index
    %c0_64 = arith.constant 0 : index
    %69 = vector.load %arg1[%c0_60, %c1_61, %c0_62, %c0_63, %c0_64] : memref<1x4x4x4x128xbf16, #tpu.memory_space<vmem>>, vector<1x1x4x4x128xbf16>
    %70 = vector.shape_cast %69 : vector<1x1x4x4x128xbf16> to vector<4x4x128xbf16>
    %71 = arith.extf %70 : vector<4x4x128xbf16> to vector<4x4x128xf32>
    %72 = vector.broadcast %1 : vector<1x1x128xf32> to vector<4x4x128xf32>
    %73 = arith.mulf %71, %72 : vector<4x4x128xf32>
    %74 = vector.broadcast %3 : vector<1x1x128xf32> to vector<4x4x128xf32>
    %75 = arith.addf %73, %74 : vector<4x4x128xf32>
    %cst_65 = arith.constant 0.000000e+00 : f32
    %76 = vector.broadcast %cst_65 : f32 to vector<4x4x128xf32>
    %77 = arith.maximumf %75, %76 : vector<4x4x128xf32>
    %78 = arith.truncf %77 : vector<4x4x128xf32> to vector<4x4x128xbf16>
    %c0_66 = arith.constant 0 : index
    %c0_67 = arith.constant 0 : index
    %c640 = arith.constant 640 : index
    %79 = vector.load %arg7[%c0_66, %c0_67, %c640] : memref<4x4x1152xbf16, #tpu.memory_space<vmem>>, vector<4x4x128xbf16>
    tpu.vector_store %arg7[%c0_66, %c0_67, %c640], %78 {strides = array<i32>} : memref<4x4x1152xbf16, #tpu.memory_space<vmem>>, vector<4x4x128xbf16>,
    %cst_68 = arith.constant 0.000000e+00 : bf16
    %80 = vector.broadcast %cst_68 : bf16 to vector<4x1x128xbf16>
    %c0_69 = arith.constant 0 : index
    %c0_70 = arith.constant 0 : index
    %c768 = arith.constant 768 : index
    %81 = vector.load %arg7[%c0_69, %c0_70, %c768] : memref<4x4x1152xbf16, #tpu.memory_space<vmem>>, vector<4x1x128xbf16>
    tpu.vector_store %arg7[%c0_69, %c0_70, %c768], %80 {strides = array<i32>} : memref<4x4x1152xbf16, #tpu.memory_space<vmem>>, vector<4x1x128xbf16>,
    %c0_71 = arith.constant 0 : index
    %c3_72 = arith.constant 3 : index
    %c0_73 = arith.constant 0 : index
    %c0_74 = arith.constant 0 : index
    %c0_75 = arith.constant 0 : index
    %82 = vector.load %arg1[%c0_71, %c3_72, %c0_73, %c0_74, %c0_75] : memref<1x4x4x4x128xbf16, #tpu.memory_space<vmem>>, vector<1x1x4x3x128xbf16>
    %83 = vector.shape_cast %82 : vector<1x1x4x3x128xbf16> to vector<4x3x128xbf16>
    %84 = arith.extf %83 : vector<4x3x128xbf16> to vector<4x3x128xf32>
    %85 = vector.broadcast %1 : vector<1x1x128xf32> to vector<4x3x128xf32>
    %86 = arith.mulf %84, %85 : vector<4x3x128xf32>
    %87 = vector.broadcast %3 : vector<1x1x128xf32> to vector<4x3x128xf32>
    %88 = arith.addf %86, %87 : vector<4x3x128xf32>
    %cst_76 = arith.constant 0.000000e+00 : f32
    %89 = vector.broadcast %cst_76 : f32 to vector<4x3x128xf32>
    %90 = arith.maximumf %88, %89 : vector<4x3x128xf32>
    %91 = arith.truncf %90 : vector<4x3x128xf32> to vector<4x3x128xbf16>
    %c0_77 = arith.constant 0 : index
    %c1_78 = arith.constant 1 : index
    %c768_79 = arith.constant 768 : index
    %92 = vector.load %arg7[%c0_77, %c1_78, %c768_79] : memref<4x4x1152xbf16, #tpu.memory_space<vmem>>, vector<4x3x128xbf16>
    tpu.vector_store %arg7[%c0_77, %c1_78, %c768_79], %91 {strides = array<i32>} : memref<4x4x1152xbf16, #tpu.memory_space<vmem>>, vector<4x3x128xbf16>,
    %c0_80 = arith.constant 0 : index
    %c2_81 = arith.constant 2 : index
    %c0_82 = arith.constant 0 : index
    %c0_83 = arith.constant 0 : index
    %c0_84 = arith.constant 0 : index
    %93 = vector.load %arg1[%c0_80, %c2_81, %c0_82, %c0_83, %c0_84] : memref<1x4x4x4x128xbf16, #tpu.memory_space<vmem>>, vector<1x1x4x4x128xbf16>
    %94 = vector.shape_cast %93 : vector<1x1x4x4x128xbf16> to vector<4x4x128xbf16>
    %95 = arith.extf %94 : vector<4x4x128xbf16> to vector<4x4x128xf32>
    %96 = vector.broadcast %1 : vector<1x1x128xf32> to vector<4x4x128xf32>
    %97 = arith.mulf %95, %96 : vector<4x4x128xf32>
    %98 = vector.broadcast %3 : vector<1x1x128xf32> to vector<4x4x128xf32>
    %99 = arith.addf %97, %98 : vector<4x4x128xf32>
    %cst_85 = arith.constant 0.000000e+00 : f32
    %100 = vector.broadcast %cst_85 : f32 to vector<4x4x128xf32>
    %101 = arith.maximumf %99, %100 : vector<4x4x128xf32>
    %102 = arith.truncf %101 : vector<4x4x128xf32> to vector<4x4x128xbf16>
    %c0_86 = arith.constant 0 : index
    %c0_87 = arith.constant 0 : index
    %c896 = arith.constant 896 : index
    %103 = vector.load %arg7[%c0_86, %c0_87, %c896] : memref<4x4x1152xbf16, #tpu.memory_space<vmem>>, vector<4x4x128xbf16>
    tpu.vector_store %arg7[%c0_86, %c0_87, %c896], %102 {strides = array<i32>} : memref<4x4x1152xbf16, #tpu.memory_space<vmem>>, vector<4x4x128xbf16>,
    %c0_88 = arith.constant 0 : index
    %c3_89 = arith.constant 3 : index
    %c0_90 = arith.constant 0 : index
    %c0_91 = arith.constant 0 : index
    %c0_92 = arith.constant 0 : index
    %104 = vector.load %arg1[%c0_88, %c3_89, %c0_90, %c0_91, %c0_92] : memref<1x4x4x4x128xbf16, #tpu.memory_space<vmem>>, vector<1x1x4x4x128xbf16>
    %105 = vector.shape_cast %104 : vector<1x1x4x4x128xbf16> to vector<4x4x128xbf16>
    %106 = arith.extf %105 : vector<4x4x128xbf16> to vector<4x4x128xf32>
    %107 = vector.broadcast %1 : vector<1x1x128xf32> to vector<4x4x128xf32>
    %108 = arith.mulf %106, %107 : vector<4x4x128xf32>
    %109 = vector.broadcast %3 : vector<1x1x128xf32> to vector<4x4x128xf32>
    %110 = arith.addf %108, %109 : vector<4x4x128xf32>
    %cst_93 = arith.constant 0.000000e+00 : f32
    %111 = vector.broadcast %cst_93 : f32 to vector<4x4x128xf32>
    %112 = arith.maximumf %110, %111 : vector<4x4x128xf32>
    %113 = arith.truncf %112 : vector<4x4x128xf32> to vector<4x4x128xbf16>
    %c0_94 = arith.constant 0 : index
    %c0_95 = arith.constant 0 : index
    %c1024 = arith.constant 1024 : index
    %114 = vector.load %arg7[%c0_94, %c0_95, %c1024] : memref<4x4x1152xbf16, #tpu.memory_space<vmem>>, vector<4x4x128xbf16>
    tpu.vector_store %arg7[%c0_94, %c0_95, %c1024], %113 {strides = array<i32>} : memref<4x4x1152xbf16, #tpu.memory_space<vmem>>, vector<4x4x128xbf16>,
    %c0_96 = arith.constant 0 : index
    %c0_97 = arith.constant 0 : index
    %c0_98 = arith.constant 0 : index
    %115 = vector.load %arg7[%c0_96, %c0_97, %c0_98] : memref<4x4x1152xbf16, #tpu.memory_space<vmem>>, vector<4x4x1152xbf16>
    %116 = vector.shape_cast %115 : vector<4x4x1152xbf16> to vector<16x1152xbf16>
    %c0_99 = arith.constant 0 : index
    %c0_100 = arith.constant 0 : index
    %117 = vector.load %arg4[%c0_99, %c0_100] : memref<1152x128xbf16, #tpu.memory_space<vmem>>, vector<1152x128xbf16>
    %cst_101 = arith.constant dense<0.000000e+00> : vector<16x128xf32>
    %118 = tpu.matmul %116, %117, %cst_101 {dimension_numbers = #tpu.dot_dimension_numbers<[1], [0], [0], [1], [0, 0, 1, 1], [], []>} : vector<16x1152xbf16>, vector<1152x128xbf16>, vector<16x128xf32> -> vector<16x128xf32>
    %119 = arith.truncf %118 : vector<16x128xf32> to vector<16x128xbf16>
    %c0_102 = arith.constant 0 : index
    %c0_103 = arith.constant 0 : index
    %c0_104 = arith.constant 0 : index
    %120 = vector.load %arg5[%c0_102, %c0_103, %c0_104] : memref<1x16x128xbf16, #tpu.memory_space<vmem>>, vector<1x16x128xbf16>
    %121 = vector.shape_cast %120 : vector<1x16x128xbf16> to vector<16x128xbf16>
    %122 = vector.shape_cast %119 : vector<16x128xbf16> to vector<1x16x128xbf16>
    tpu.vector_store %arg5[%c0_102, %c0_103, %c0_104], %122 {strides = array<i32>} : memref<1x16x128xbf16, #tpu.memory_space<vmem>>, vector<1x16x128xbf16>,
    %cst_105 = arith.constant dense<0.000000e+00> : vector<128xf32>
    %123 = vector.multi_reduction <add>, %118, %cst_105 [0] : vector<16x128xf32> to vector<128xf32>
    %124 = vector.shape_cast %123 : vector<128xf32> to vector<1x128xf32>
    %c0_106 = arith.constant 0 : index
    %c0_107 = arith.constant 0 : index
    %c0_108 = arith.constant 0 : index
    %125 = vector.load %arg6[%c0_106, %c0_107, %c0_108] : memref<1x2x128xf32, #tpu.memory_space<vmem>>, vector<1x1x128xf32>
    %126 = vector.shape_cast %125 : vector<1x1x128xf32> to vector<1x128xf32>
    %127 = vector.shape_cast %124 : vector<1x128xf32> to vector<1x1x128xf32>
    tpu.vector_store %arg6[%c0_106, %c0_107, %c0_108], %127 {strides = array<i32>} : memref<1x2x128xf32, #tpu.memory_space<vmem>>, vector<1x1x128xf32>,
    %128 = arith.mulf %118, %118 : vector<16x128xf32>
    %cst_109 = arith.constant dense<0.000000e+00> : vector<128xf32>
    %129 = vector.multi_reduction <add>, %128, %cst_109 [0] : vector<16x128xf32> to vector<128xf32>
    %130 = vector.shape_cast %129 : vector<128xf32> to vector<1x128xf32>
    %c0_110 = arith.constant 0 : index
    %c1_111 = arith.constant 1 : index
    %c0_112 = arith.constant 0 : index
    %131 = vector.load %arg6[%c0_110, %c1_111, %c0_112] : memref<1x2x128xf32, #tpu.memory_space<vmem>>, vector<1x1x128xf32>
    %132 = vector.shape_cast %131 : vector<1x1x128xf32> to vector<1x128xf32>
    %133 = vector.shape_cast %130 : vector<1x128xf32> to vector<1x1x128xf32>
    tpu.vector_store %arg6[%c0_110, %c1_111, %c0_112], %133 {strides = array<i32>} : memref<1x2x128xf32, #tpu.memory_space<vmem>>, vector<1x1x128xf32>,
    return
  }
  func.func @transform_0(%arg0: i32) -> (i32, i32, i32, i32, i32) {
    %c0_i32 = arith.constant 0 : i32
    %c0_i32_0 = arith.constant 0 : i32
    %c0_i32_1 = arith.constant 0 : i32
    %c0_i32_2 = arith.constant 0 : i32
    %c0_i32_3 = arith.constant 0 : i32
    return %arg0, %c0_i32, %c0_i32_0, %c0_i32_1, %c0_i32_2 : i32, i32, i32, i32, i32
  }
  func.func @transform_1(%arg0: i32) -> (i32, i32) {
    %c0_i32 = arith.constant 0 : i32
    %c0_i32_0 = arith.constant 0 : i32
    %c0_i32_1 = arith.constant 0 : i32
    return %c0_i32, %c0_i32_0 : i32, i32
  }
  func.func @transform_2(%arg0: i32) -> (i32, i32) {
    %c0_i32 = arith.constant 0 : i32
    %c0_i32_0 = arith.constant 0 : i32
    %c0_i32_1 = arith.constant 0 : i32
    return %c0_i32, %c0_i32_0 : i32, i32
  }
  func.func @transform_3(%arg0: i32) -> (i32, i32) {
    %c0_i32 = arith.constant 0 : i32
    %c0_i32_0 = arith.constant 0 : i32
    %c0_i32_1 = arith.constant 0 : i32
    return %c0_i32, %c0_i32_0 : i32, i32
  }
  func.func @transform_4(%arg0: i32) -> (i32, i32, i32) {
    %c0_i32 = arith.constant 0 : i32
    %c0_i32_0 = arith.constant 0 : i32
    %c0_i32_1 = arith.constant 0 : i32
    return %arg0, %c0_i32, %c0_i32_0 : i32, i32, i32
  }
  func.func @transform_5(%arg0: i32) -> (i32, i32, i32) {
    %c0_i32 = arith.constant 0 : i32
    %c0_i32_0 = arith.constant 0 : i32
    %c0_i32_1 = arith.constant 0 : i32
    return %arg0, %c0_i32, %c0_i32_0 : i32, i32, i32
  }
}

module attributes {stable_mosaic.version = 11 : i64} {
  func.func @kernel(%arg0: i32, %arg1: memref<1x4x2x2x128xbf16, #tpu.memory_space<vmem>>, %arg2: memref<1x128xf32, #tpu.memory_space<vmem>>, %arg3: memref<1x128xf32, #tpu.memory_space<vmem>>, %arg4: memref<1152x128xbf16, #tpu.memory_space<vmem>>, %arg5: memref<1x4x128xbf16, #tpu.memory_space<vmem>>, %arg6: memref<1x2x128xf32, #tpu.memory_space<vmem>>, %arg7: memref<2x2x1152xbf16, #tpu.memory_space<vmem>>) attributes {dimension_semantics = [#tpu.dimension_semantics<parallel>], iteration_bounds = array<i64: 2>, scalar_prefetch = 0 : i64, scratch_operands = 1 : i64, tpu.core_type = #tpu.core_type<tc>, window_params = [{transform_indices = @transform_0, window_bounds = array<i64: 1, 4, 2, 2, 128>}, {pipeline_mode = #tpu.pipeline_mode<synchronous>, transform_indices = @transform_1, window_bounds = array<i64: 1, 128>}, {pipeline_mode = #tpu.pipeline_mode<synchronous>, transform_indices = @transform_2, window_bounds = array<i64: 1, 128>}, {pipeline_mode = #tpu.pipeline_mode<synchronous>, transform_indices = @transform_3, window_bounds = array<i64: 1152, 128>}, {transform_indices = @transform_4, window_bounds = array<i64: 1, 4, 128>}, {transform_indices = @transform_5, window_bounds = array<i64: 1, 2, 128>}]} {
    %c0 = arith.constant 0 : index
    %c0_0 = arith.constant 0 : index
    %0 = vector.load %arg2[%c0, %c0_0] : memref<1x128xf32, #tpu.memory_space<vmem>>, vector<1x128xf32>
    %1 = vector.shape_cast %0 : vector<1x128xf32> to vector<1x1x128xf32>
    %c0_1 = arith.constant 0 : index
    %c0_2 = arith.constant 0 : index
    %2 = vector.load %arg3[%c0_1, %c0_2] : memref<1x128xf32, #tpu.memory_space<vmem>>, vector<1x128xf32>
    %3 = vector.shape_cast %2 : vector<1x128xf32> to vector<1x1x128xf32>
    %cst = arith.constant 0.000000e+00 : bf16
    %4 = vector.broadcast %cst : bf16 to vector<1x2x128xbf16>
    %c0_3 = arith.constant 0 : index
    %c0_4 = arith.constant 0 : index
    %c0_5 = arith.constant 0 : index
    %5 = vector.load %arg7[%c0_3, %c0_4, %c0_5] : memref<2x2x1152xbf16, #tpu.memory_space<vmem>>, vector<1x2x128xbf16>
    tpu.vector_store %arg7[%c0_3, %c0_4, %c0_5], %4 {strides = array<i32>} : memref<2x2x1152xbf16, #tpu.memory_space<vmem>>, vector<1x2x128xbf16>,
    %cst_6 = arith.constant 0.000000e+00 : bf16
    %6 = vector.broadcast %cst_6 : bf16 to vector<2x1x128xbf16>
    %c0_7 = arith.constant 0 : index
    %c0_8 = arith.constant 0 : index
    %c0_9 = arith.constant 0 : index
    %7 = vector.load %arg7[%c0_7, %c0_8, %c0_9] : memref<2x2x1152xbf16, #tpu.memory_space<vmem>>, vector<2x1x128xbf16>
    tpu.vector_store %arg7[%c0_7, %c0_8, %c0_9], %6 {strides = array<i32>} : memref<2x2x1152xbf16, #tpu.memory_space<vmem>>, vector<2x1x128xbf16>,
    %c0_10 = arith.constant 0 : index
    %c3 = arith.constant 3 : index
    %c0_11 = arith.constant 0 : index
    %c0_12 = arith.constant 0 : index
    %c0_13 = arith.constant 0 : index
    %8 = vector.load %arg1[%c0_10, %c3, %c0_11, %c0_12, %c0_13] : memref<1x4x2x2x128xbf16, #tpu.memory_space<vmem>>, vector<1x1x1x1x128xbf16>
    %9 = vector.shape_cast %8 : vector<1x1x1x1x128xbf16> to vector<1x1x128xbf16>
    %10 = arith.extf %9 : vector<1x1x128xbf16> to vector<1x1x128xf32>
    %11 = arith.mulf %10, %1 : vector<1x1x128xf32>
    %12 = arith.addf %11, %3 : vector<1x1x128xf32>
    %cst_14 = arith.constant 0.000000e+00 : f32
    %13 = vector.broadcast %cst_14 : f32 to vector<1x1x128xf32>
    %14 = arith.maximumf %12, %13 : vector<1x1x128xf32>
    %15 = arith.truncf %14 : vector<1x1x128xf32> to vector<1x1x128xbf16>
    %c1 = arith.constant 1 : index
    %c1_15 = arith.constant 1 : index
    %c0_16 = arith.constant 0 : index
    %16 = vector.load %arg7[%c1, %c1_15, %c0_16] : memref<2x2x1152xbf16, #tpu.memory_space<vmem>>, vector<1x1x128xbf16>
    tpu.vector_store %arg7[%c1, %c1_15, %c0_16], %15 {strides = array<i32>} : memref<2x2x1152xbf16, #tpu.memory_space<vmem>>, vector<1x1x128xbf16>,
    %cst_17 = arith.constant 0.000000e+00 : bf16
    %17 = vector.broadcast %cst_17 : bf16 to vector<1x2x128xbf16>
    %c0_18 = arith.constant 0 : index
    %c0_19 = arith.constant 0 : index
    %c128 = arith.constant 128 : index
    %18 = vector.load %arg7[%c0_18, %c0_19, %c128] : memref<2x2x1152xbf16, #tpu.memory_space<vmem>>, vector<1x2x128xbf16>
    tpu.vector_store %arg7[%c0_18, %c0_19, %c128], %17 {strides = array<i32>} : memref<2x2x1152xbf16, #tpu.memory_space<vmem>>, vector<1x2x128xbf16>,
    %c0_20 = arith.constant 0 : index
    %c2 = arith.constant 2 : index
    %c0_21 = arith.constant 0 : index
    %c0_22 = arith.constant 0 : index
    %c0_23 = arith.constant 0 : index
    %19 = vector.load %arg1[%c0_20, %c2, %c0_21, %c0_22, %c0_23] : memref<1x4x2x2x128xbf16, #tpu.memory_space<vmem>>, vector<1x1x1x2x128xbf16>
    %20 = vector.shape_cast %19 : vector<1x1x1x2x128xbf16> to vector<1x2x128xbf16>
    %21 = arith.extf %20 : vector<1x2x128xbf16> to vector<1x2x128xf32>
    %22 = vector.broadcast %1 : vector<1x1x128xf32> to vector<1x2x128xf32>
    %23 = arith.mulf %21, %22 : vector<1x2x128xf32>
    %24 = vector.broadcast %3 : vector<1x1x128xf32> to vector<1x2x128xf32>
    %25 = arith.addf %23, %24 : vector<1x2x128xf32>
    %cst_24 = arith.constant 0.000000e+00 : f32
    %26 = vector.broadcast %cst_24 : f32 to vector<1x2x128xf32>
    %27 = arith.maximumf %25, %26 : vector<1x2x128xf32>
    %28 = arith.truncf %27 : vector<1x2x128xf32> to vector<1x2x128xbf16>
    %c1_25 = arith.constant 1 : index
    %c0_26 = arith.constant 0 : index
    %c128_27 = arith.constant 128 : index
    %29 = vector.load %arg7[%c1_25, %c0_26, %c128_27] : memref<2x2x1152xbf16, #tpu.memory_space<vmem>>, vector<1x2x128xbf16>
    tpu.vector_store %arg7[%c1_25, %c0_26, %c128_27], %28 {strides = array<i32>} : memref<2x2x1152xbf16, #tpu.memory_space<vmem>>, vector<1x2x128xbf16>,
    %cst_28 = arith.constant 0.000000e+00 : bf16
    %30 = vector.broadcast %cst_28 : bf16 to vector<1x2x128xbf16>
    %c0_29 = arith.constant 0 : index
    %c0_30 = arith.constant 0 : index
    %c256 = arith.constant 256 : index
    %31 = vector.load %arg7[%c0_29, %c0_30, %c256] : memref<2x2x1152xbf16, #tpu.memory_space<vmem>>, vector<1x2x128xbf16>
    tpu.vector_store %arg7[%c0_29, %c0_30, %c256], %30 {strides = array<i32>} : memref<2x2x1152xbf16, #tpu.memory_space<vmem>>, vector<1x2x128xbf16>,
    %c0_31 = arith.constant 0 : index
    %c3_32 = arith.constant 3 : index
    %c0_33 = arith.constant 0 : index
    %c0_34 = arith.constant 0 : index
    %c0_35 = arith.constant 0 : index
    %32 = vector.load %arg1[%c0_31, %c3_32, %c0_33, %c0_34, %c0_35] : memref<1x4x2x2x128xbf16, #tpu.memory_space<vmem>>, vector<1x1x1x2x128xbf16>
    %33 = vector.shape_cast %32 : vector<1x1x1x2x128xbf16> to vector<1x2x128xbf16>
    %34 = arith.extf %33 : vector<1x2x128xbf16> to vector<1x2x128xf32>
    %35 = vector.broadcast %1 : vector<1x1x128xf32> to vector<1x2x128xf32>
    %36 = arith.mulf %34, %35 : vector<1x2x128xf32>
    %37 = vector.broadcast %3 : vector<1x1x128xf32> to vector<1x2x128xf32>
    %38 = arith.addf %36, %37 : vector<1x2x128xf32>
    %cst_36 = arith.constant 0.000000e+00 : f32
    %39 = vector.broadcast %cst_36 : f32 to vector<1x2x128xf32>
    %40 = arith.maximumf %38, %39 : vector<1x2x128xf32>
    %41 = arith.truncf %40 : vector<1x2x128xf32> to vector<1x2x128xbf16>
    %c1_37 = arith.constant 1 : index
    %c0_38 = arith.constant 0 : index
    %c256_39 = arith.constant 256 : index
    %42 = vector.load %arg7[%c1_37, %c0_38, %c256_39] : memref<2x2x1152xbf16, #tpu.memory_space<vmem>>, vector<1x2x128xbf16>
    tpu.vector_store %arg7[%c1_37, %c0_38, %c256_39], %41 {strides = array<i32>} : memref<2x2x1152xbf16, #tpu.memory_space<vmem>>, vector<1x2x128xbf16>,
    %cst_40 = arith.constant 0.000000e+00 : bf16
    %43 = vector.broadcast %cst_40 : bf16 to vector<2x1x128xbf16>
    %c0_41 = arith.constant 0 : index
    %c0_42 = arith.constant 0 : index
    %c384 = arith.constant 384 : index
    %44 = vector.load %arg7[%c0_41, %c0_42, %c384] : memref<2x2x1152xbf16, #tpu.memory_space<vmem>>, vector<2x1x128xbf16>
    tpu.vector_store %arg7[%c0_41, %c0_42, %c384], %43 {strides = array<i32>} : memref<2x2x1152xbf16, #tpu.memory_space<vmem>>, vector<2x1x128xbf16>,
    %c0_43 = arith.constant 0 : index
    %c1_44 = arith.constant 1 : index
    %c0_45 = arith.constant 0 : index
    %c0_46 = arith.constant 0 : index
    %c0_47 = arith.constant 0 : index
    %45 = vector.load %arg1[%c0_43, %c1_44, %c0_45, %c0_46, %c0_47] : memref<1x4x2x2x128xbf16, #tpu.memory_space<vmem>>, vector<1x1x2x1x128xbf16>
    %46 = vector.shape_cast %45 : vector<1x1x2x1x128xbf16> to vector<2x1x128xbf16>
    %47 = arith.extf %46 : vector<2x1x128xbf16> to vector<2x1x128xf32>
    %48 = vector.broadcast %1 : vector<1x1x128xf32> to vector<2x1x128xf32>
    %49 = arith.mulf %47, %48 : vector<2x1x128xf32>
    %50 = vector.broadcast %3 : vector<1x1x128xf32> to vector<2x1x128xf32>
    %51 = arith.addf %49, %50 : vector<2x1x128xf32>
    %cst_48 = arith.constant 0.000000e+00 : f32
    %52 = vector.broadcast %cst_48 : f32 to vector<2x1x128xf32>
    %53 = arith.maximumf %51, %52 : vector<2x1x128xf32>
    %54 = arith.truncf %53 : vector<2x1x128xf32> to vector<2x1x128xbf16>
    %c0_49 = arith.constant 0 : index
    %c1_50 = arith.constant 1 : index
    %c384_51 = arith.constant 384 : index
    %55 = vector.load %arg7[%c0_49, %c1_50, %c384_51] : memref<2x2x1152xbf16, #tpu.memory_space<vmem>>, vector<2x1x128xbf16>
    tpu.vector_store %arg7[%c0_49, %c1_50, %c384_51], %54 {strides = array<i32>} : memref<2x2x1152xbf16, #tpu.memory_space<vmem>>, vector<2x1x128xbf16>,
    %c0_52 = arith.constant 0 : index
    %c0_53 = arith.constant 0 : index
    %c0_54 = arith.constant 0 : index
    %c0_55 = arith.constant 0 : index
    %c0_56 = arith.constant 0 : index
    %56 = vector.load %arg1[%c0_52, %c0_53, %c0_54, %c0_55, %c0_56] : memref<1x4x2x2x128xbf16, #tpu.memory_space<vmem>>, vector<1x1x2x2x128xbf16>
    %57 = vector.shape_cast %56 : vector<1x1x2x2x128xbf16> to vector<2x2x128xbf16>
    %58 = arith.extf %57 : vector<2x2x128xbf16> to vector<2x2x128xf32>
    %59 = vector.broadcast %1 : vector<1x1x128xf32> to vector<2x2x128xf32>
    %60 = arith.mulf %58, %59 : vector<2x2x128xf32>
    %61 = vector.broadcast %3 : vector<1x1x128xf32> to vector<2x2x128xf32>
    %62 = arith.addf %60, %61 : vector<2x2x128xf32>
    %cst_57 = arith.constant 0.000000e+00 : f32
    %63 = vector.broadcast %cst_57 : f32 to vector<2x2x128xf32>
    %64 = arith.maximumf %62, %63 : vector<2x2x128xf32>
    %65 = arith.truncf %64 : vector<2x2x128xf32> to vector<2x2x128xbf16>
    %c0_58 = arith.constant 0 : index
    %c0_59 = arith.constant 0 : index
    %c512 = arith.constant 512 : index
    %66 = vector.load %arg7[%c0_58, %c0_59, %c512] : memref<2x2x1152xbf16, #tpu.memory_space<vmem>>, vector<2x2x128xbf16>
    tpu.vector_store %arg7[%c0_58, %c0_59, %c512], %65 {strides = array<i32>} : memref<2x2x1152xbf16, #tpu.memory_space<vmem>>, vector<2x2x128xbf16>,
    %c0_60 = arith.constant 0 : index
    %c1_61 = arith.constant 1 : index
    %c0_62 = arith.constant 0 : index
    %c0_63 = arith.constant 0 : index
    %c0_64 = arith.constant 0 : index
    %67 = vector.load %arg1[%c0_60, %c1_61, %c0_62, %c0_63, %c0_64] : memref<1x4x2x2x128xbf16, #tpu.memory_space<vmem>>, vector<1x1x2x2x128xbf16>
    %68 = vector.shape_cast %67 : vector<1x1x2x2x128xbf16> to vector<2x2x128xbf16>
    %69 = arith.extf %68 : vector<2x2x128xbf16> to vector<2x2x128xf32>
    %70 = vector.broadcast %1 : vector<1x1x128xf32> to vector<2x2x128xf32>
    %71 = arith.mulf %69, %70 : vector<2x2x128xf32>
    %72 = vector.broadcast %3 : vector<1x1x128xf32> to vector<2x2x128xf32>
    %73 = arith.addf %71, %72 : vector<2x2x128xf32>
    %cst_65 = arith.constant 0.000000e+00 : f32
    %74 = vector.broadcast %cst_65 : f32 to vector<2x2x128xf32>
    %75 = arith.maximumf %73, %74 : vector<2x2x128xf32>
    %76 = arith.truncf %75 : vector<2x2x128xf32> to vector<2x2x128xbf16>
    %c0_66 = arith.constant 0 : index
    %c0_67 = arith.constant 0 : index
    %c640 = arith.constant 640 : index
    %77 = vector.load %arg7[%c0_66, %c0_67, %c640] : memref<2x2x1152xbf16, #tpu.memory_space<vmem>>, vector<2x2x128xbf16>
    tpu.vector_store %arg7[%c0_66, %c0_67, %c640], %76 {strides = array<i32>} : memref<2x2x1152xbf16, #tpu.memory_space<vmem>>, vector<2x2x128xbf16>,
    %cst_68 = arith.constant 0.000000e+00 : bf16
    %78 = vector.broadcast %cst_68 : bf16 to vector<2x1x128xbf16>
    %c0_69 = arith.constant 0 : index
    %c0_70 = arith.constant 0 : index
    %c768 = arith.constant 768 : index
    %79 = vector.load %arg7[%c0_69, %c0_70, %c768] : memref<2x2x1152xbf16, #tpu.memory_space<vmem>>, vector<2x1x128xbf16>
    tpu.vector_store %arg7[%c0_69, %c0_70, %c768], %78 {strides = array<i32>} : memref<2x2x1152xbf16, #tpu.memory_space<vmem>>, vector<2x1x128xbf16>,
    %c0_71 = arith.constant 0 : index
    %c3_72 = arith.constant 3 : index
    %c0_73 = arith.constant 0 : index
    %c0_74 = arith.constant 0 : index
    %c0_75 = arith.constant 0 : index
    %80 = vector.load %arg1[%c0_71, %c3_72, %c0_73, %c0_74, %c0_75] : memref<1x4x2x2x128xbf16, #tpu.memory_space<vmem>>, vector<1x1x2x1x128xbf16>
    %81 = vector.shape_cast %80 : vector<1x1x2x1x128xbf16> to vector<2x1x128xbf16>
    %82 = arith.extf %81 : vector<2x1x128xbf16> to vector<2x1x128xf32>
    %83 = vector.broadcast %1 : vector<1x1x128xf32> to vector<2x1x128xf32>
    %84 = arith.mulf %82, %83 : vector<2x1x128xf32>
    %85 = vector.broadcast %3 : vector<1x1x128xf32> to vector<2x1x128xf32>
    %86 = arith.addf %84, %85 : vector<2x1x128xf32>
    %cst_76 = arith.constant 0.000000e+00 : f32
    %87 = vector.broadcast %cst_76 : f32 to vector<2x1x128xf32>
    %88 = arith.maximumf %86, %87 : vector<2x1x128xf32>
    %89 = arith.truncf %88 : vector<2x1x128xf32> to vector<2x1x128xbf16>
    %c0_77 = arith.constant 0 : index
    %c1_78 = arith.constant 1 : index
    %c768_79 = arith.constant 768 : index
    %90 = vector.load %arg7[%c0_77, %c1_78, %c768_79] : memref<2x2x1152xbf16, #tpu.memory_space<vmem>>, vector<2x1x128xbf16>
    tpu.vector_store %arg7[%c0_77, %c1_78, %c768_79], %89 {strides = array<i32>} : memref<2x2x1152xbf16, #tpu.memory_space<vmem>>, vector<2x1x128xbf16>,
    %c0_80 = arith.constant 0 : index
    %c2_81 = arith.constant 2 : index
    %c0_82 = arith.constant 0 : index
    %c0_83 = arith.constant 0 : index
    %c0_84 = arith.constant 0 : index
    %91 = vector.load %arg1[%c0_80, %c2_81, %c0_82, %c0_83, %c0_84] : memref<1x4x2x2x128xbf16, #tpu.memory_space<vmem>>, vector<1x1x2x2x128xbf16>
    %92 = vector.shape_cast %91 : vector<1x1x2x2x128xbf16> to vector<2x2x128xbf16>
    %93 = arith.extf %92 : vector<2x2x128xbf16> to vector<2x2x128xf32>
    %94 = vector.broadcast %1 : vector<1x1x128xf32> to vector<2x2x128xf32>
    %95 = arith.mulf %93, %94 : vector<2x2x128xf32>
    %96 = vector.broadcast %3 : vector<1x1x128xf32> to vector<2x2x128xf32>
    %97 = arith.addf %95, %96 : vector<2x2x128xf32>
    %cst_85 = arith.constant 0.000000e+00 : f32
    %98 = vector.broadcast %cst_85 : f32 to vector<2x2x128xf32>
    %99 = arith.maximumf %97, %98 : vector<2x2x128xf32>
    %100 = arith.truncf %99 : vector<2x2x128xf32> to vector<2x2x128xbf16>
    %c0_86 = arith.constant 0 : index
    %c0_87 = arith.constant 0 : index
    %c896 = arith.constant 896 : index
    %101 = vector.load %arg7[%c0_86, %c0_87, %c896] : memref<2x2x1152xbf16, #tpu.memory_space<vmem>>, vector<2x2x128xbf16>
    tpu.vector_store %arg7[%c0_86, %c0_87, %c896], %100 {strides = array<i32>} : memref<2x2x1152xbf16, #tpu.memory_space<vmem>>, vector<2x2x128xbf16>,
    %c0_88 = arith.constant 0 : index
    %c3_89 = arith.constant 3 : index
    %c0_90 = arith.constant 0 : index
    %c0_91 = arith.constant 0 : index
    %c0_92 = arith.constant 0 : index
    %102 = vector.load %arg1[%c0_88, %c3_89, %c0_90, %c0_91, %c0_92] : memref<1x4x2x2x128xbf16, #tpu.memory_space<vmem>>, vector<1x1x2x2x128xbf16>
    %103 = vector.shape_cast %102 : vector<1x1x2x2x128xbf16> to vector<2x2x128xbf16>
    %104 = arith.extf %103 : vector<2x2x128xbf16> to vector<2x2x128xf32>
    %105 = vector.broadcast %1 : vector<1x1x128xf32> to vector<2x2x128xf32>
    %106 = arith.mulf %104, %105 : vector<2x2x128xf32>
    %107 = vector.broadcast %3 : vector<1x1x128xf32> to vector<2x2x128xf32>
    %108 = arith.addf %106, %107 : vector<2x2x128xf32>
    %cst_93 = arith.constant 0.000000e+00 : f32
    %109 = vector.broadcast %cst_93 : f32 to vector<2x2x128xf32>
    %110 = arith.maximumf %108, %109 : vector<2x2x128xf32>
    %111 = arith.truncf %110 : vector<2x2x128xf32> to vector<2x2x128xbf16>
    %c0_94 = arith.constant 0 : index
    %c0_95 = arith.constant 0 : index
    %c1024 = arith.constant 1024 : index
    %112 = vector.load %arg7[%c0_94, %c0_95, %c1024] : memref<2x2x1152xbf16, #tpu.memory_space<vmem>>, vector<2x2x128xbf16>
    tpu.vector_store %arg7[%c0_94, %c0_95, %c1024], %111 {strides = array<i32>} : memref<2x2x1152xbf16, #tpu.memory_space<vmem>>, vector<2x2x128xbf16>,
    %c0_96 = arith.constant 0 : index
    %c0_97 = arith.constant 0 : index
    %c0_98 = arith.constant 0 : index
    %113 = vector.load %arg7[%c0_96, %c0_97, %c0_98] : memref<2x2x1152xbf16, #tpu.memory_space<vmem>>, vector<2x2x1152xbf16>
    %114 = vector.shape_cast %113 : vector<2x2x1152xbf16> to vector<4x1152xbf16>
    %c0_99 = arith.constant 0 : index
    %c0_100 = arith.constant 0 : index
    %115 = vector.load %arg4[%c0_99, %c0_100] : memref<1152x128xbf16, #tpu.memory_space<vmem>>, vector<1152x128xbf16>
    %cst_101 = arith.constant dense<0.000000e+00> : vector<4x128xf32>
    %116 = tpu.matmul %114, %115, %cst_101 {dimension_numbers = #tpu.dot_dimension_numbers<[1], [0], [0], [1], [0, 0, 1, 1], [], []>} : vector<4x1152xbf16>, vector<1152x128xbf16>, vector<4x128xf32> -> vector<4x128xf32>
    %117 = arith.truncf %116 : vector<4x128xf32> to vector<4x128xbf16>
    %c0_102 = arith.constant 0 : index
    %c0_103 = arith.constant 0 : index
    %c0_104 = arith.constant 0 : index
    %118 = vector.load %arg5[%c0_102, %c0_103, %c0_104] : memref<1x4x128xbf16, #tpu.memory_space<vmem>>, vector<1x4x128xbf16>
    %119 = vector.shape_cast %118 : vector<1x4x128xbf16> to vector<4x128xbf16>
    %120 = vector.shape_cast %117 : vector<4x128xbf16> to vector<1x4x128xbf16>
    tpu.vector_store %arg5[%c0_102, %c0_103, %c0_104], %120 {strides = array<i32>} : memref<1x4x128xbf16, #tpu.memory_space<vmem>>, vector<1x4x128xbf16>,
    %cst_105 = arith.constant dense<0.000000e+00> : vector<128xf32>
    %121 = vector.multi_reduction <add>, %116, %cst_105 [0] : vector<4x128xf32> to vector<128xf32>
    %122 = vector.shape_cast %121 : vector<128xf32> to vector<1x128xf32>
    %c0_106 = arith.constant 0 : index
    %c0_107 = arith.constant 0 : index
    %c0_108 = arith.constant 0 : index
    %123 = vector.load %arg6[%c0_106, %c0_107, %c0_108] : memref<1x2x128xf32, #tpu.memory_space<vmem>>, vector<1x1x128xf32>
    %124 = vector.shape_cast %123 : vector<1x1x128xf32> to vector<1x128xf32>
    %125 = vector.shape_cast %122 : vector<1x128xf32> to vector<1x1x128xf32>
    tpu.vector_store %arg6[%c0_106, %c0_107, %c0_108], %125 {strides = array<i32>} : memref<1x2x128xf32, #tpu.memory_space<vmem>>, vector<1x1x128xf32>,
    %126 = arith.mulf %116, %116 : vector<4x128xf32>
    %cst_109 = arith.constant dense<0.000000e+00> : vector<128xf32>
    %127 = vector.multi_reduction <add>, %126, %cst_109 [0] : vector<4x128xf32> to vector<128xf32>
    %128 = vector.shape_cast %127 : vector<128xf32> to vector<1x128xf32>
    %c0_110 = arith.constant 0 : index
    %c1_111 = arith.constant 1 : index
    %c0_112 = arith.constant 0 : index
    %129 = vector.load %arg6[%c0_110, %c1_111, %c0_112] : memref<1x2x128xf32, #tpu.memory_space<vmem>>, vector<1x1x128xf32>
    %130 = vector.shape_cast %129 : vector<1x1x128xf32> to vector<1x128xf32>
    %131 = vector.shape_cast %128 : vector<1x128xf32> to vector<1x1x128xf32>
    tpu.vector_store %arg6[%c0_110, %c1_111, %c0_112], %131 {strides = array<i32>} : memref<1x2x128xf32, #tpu.memory_space<vmem>>, vector<1x1x128xf32>,
    return
  }
  func.func @transform_0(%arg0: i32) -> (i32, i32, i32, i32, i32) {
    %c0_i32 = arith.constant 0 : i32
    %c0_i32_0 = arith.constant 0 : i32
    %c0_i32_1 = arith.constant 0 : i32
    %c0_i32_2 = arith.constant 0 : i32
    %c0_i32_3 = arith.constant 0 : i32
    return %arg0, %c0_i32, %c0_i32_0, %c0_i32_1, %c0_i32_2 : i32, i32, i32, i32, i32
  }
  func.func @transform_1(%arg0: i32) -> (i32, i32) {
    %c0_i32 = arith.constant 0 : i32
    %c0_i32_0 = arith.constant 0 : i32
    %c0_i32_1 = arith.constant 0 : i32
    return %c0_i32, %c0_i32_0 : i32, i32
  }
  func.func @transform_2(%arg0: i32) -> (i32, i32) {
    %c0_i32 = arith.constant 0 : i32
    %c0_i32_0 = arith.constant 0 : i32
    %c0_i32_1 = arith.constant 0 : i32
    return %c0_i32, %c0_i32_0 : i32, i32
  }
  func.func @transform_3(%arg0: i32) -> (i32, i32) {
    %c0_i32 = arith.constant 0 : i32
    %c0_i32_0 = arith.constant 0 : i32
    %c0_i32_1 = arith.constant 0 : i32
    return %c0_i32, %c0_i32_0 : i32, i32
  }
  func.func @transform_4(%arg0: i32) -> (i32, i32, i32) {
    %c0_i32 = arith.constant 0 : i32
    %c0_i32_0 = arith.constant 0 : i32
    %c0_i32_1 = arith.constant 0 : i32
    return %arg0, %c0_i32, %c0_i32_0 : i32, i32, i32
  }
  func.func @transform_5(%arg0: i32) -> (i32, i32, i32) {
    %c0_i32 = arith.constant 0 : i32
    %c0_i32_0 = arith.constant 0 : i32
    %c0_i32_1 = arith.constant 0 : i32
    return %arg0, %c0_i32, %c0_i32_0 : i32, i32, i32
  }
}

module attributes {stable_mosaic.version = 11 : i64} {
  func.func @_proj_kernel(%arg0: i32, %arg1: memref<8x128xbf16, #tpu.memory_space<vmem>>, %arg2: memref<1x128xf32, #tpu.memory_space<vmem>>, %arg3: memref<1x128xf32, #tpu.memory_space<vmem>>, %arg4: memref<128x128xbf16, #tpu.memory_space<vmem>>, %arg5: memref<1x128xf32, #tpu.memory_space<vmem>>, %arg6: memref<8x128xf32, #tpu.memory_space<vmem>>) attributes {dimension_semantics = [#tpu.dimension_semantics<parallel>], iteration_bounds = array<i64: 1>, scalar_prefetch = 0 : i64, scratch_operands = 0 : i64, tpu.core_type = #tpu.core_type<tc>, window_params = [{transform_indices = @transform_0, window_bounds = array<i64: 8, 128>}, {pipeline_mode = #tpu.pipeline_mode<synchronous>, transform_indices = @transform_1, window_bounds = array<i64: 1, 128>}, {pipeline_mode = #tpu.pipeline_mode<synchronous>, transform_indices = @transform_2, window_bounds = array<i64: 1, 128>}, {pipeline_mode = #tpu.pipeline_mode<synchronous>, transform_indices = @transform_3, window_bounds = array<i64: 128, 128>}, {pipeline_mode = #tpu.pipeline_mode<synchronous>, transform_indices = @transform_4, window_bounds = array<i64: 1, 128>}, {transform_indices = @transform_5, window_bounds = array<i64: 8, 128>}]} {
    %c0 = arith.constant 0 : index
    %c0_0 = arith.constant 0 : index
    %0 = vector.load %arg1[%c0, %c0_0] : memref<8x128xbf16, #tpu.memory_space<vmem>>, vector<8x128xbf16>
    %1 = arith.extf %0 : vector<8x128xbf16> to vector<8x128xf32>
    %c0_1 = arith.constant 0 : index
    %c0_2 = arith.constant 0 : index
    %2 = vector.load %arg2[%c0_1, %c0_2] : memref<1x128xf32, #tpu.memory_space<vmem>>, vector<1x128xf32>
    %3 = vector.broadcast %2 : vector<1x128xf32> to vector<8x128xf32>
    %4 = arith.mulf %1, %3 : vector<8x128xf32>
    %c0_3 = arith.constant 0 : index
    %c0_4 = arith.constant 0 : index
    %5 = vector.load %arg3[%c0_3, %c0_4] : memref<1x128xf32, #tpu.memory_space<vmem>>, vector<1x128xf32>
    %6 = vector.broadcast %5 : vector<1x128xf32> to vector<8x128xf32>
    %7 = arith.addf %4, %6 : vector<8x128xf32>
    %cst = arith.constant 0.000000e+00 : f32
    %8 = vector.broadcast %cst : f32 to vector<8x128xf32>
    %9 = arith.maximumf %7, %8 : vector<8x128xf32>
    %10 = arith.truncf %9 : vector<8x128xf32> to vector<8x128xbf16>
    %c0_5 = arith.constant 0 : index
    %c0_6 = arith.constant 0 : index
    %11 = vector.load %arg4[%c0_5, %c0_6] : memref<128x128xbf16, #tpu.memory_space<vmem>>, vector<128x128xbf16>
    %cst_7 = arith.constant dense<0.000000e+00> : vector<8x128xf32>
    %12 = tpu.matmul %10, %11, %cst_7 {dimension_numbers = #tpu.dot_dimension_numbers<[1], [0], [0], [1], [0, 0, 1, 1], [], []>} : vector<8x128xbf16>, vector<128x128xbf16>, vector<8x128xf32> -> vector<8x128xf32>
    %c0_8 = arith.constant 0 : index
    %c0_9 = arith.constant 0 : index
    %13 = vector.load %arg5[%c0_8, %c0_9] : memref<1x128xf32, #tpu.memory_space<vmem>>, vector<1x128xf32>
    %14 = vector.broadcast %13 : vector<1x128xf32> to vector<8x128xf32>
    %15 = arith.addf %12, %14 : vector<8x128xf32>
    %c0_10 = arith.constant 0 : index
    %c0_11 = arith.constant 0 : index
    %16 = vector.load %arg6[%c0_10, %c0_11] : memref<8x128xf32, #tpu.memory_space<vmem>>, vector<8x128xf32>
    tpu.vector_store %arg6[%c0_10, %c0_11], %15 {strides = array<i32>} : memref<8x128xf32, #tpu.memory_space<vmem>>, vector<8x128xf32>,
    return
  }
  func.func @transform_0(%arg0: i32) -> (i32, i32) {
    %c0_i32 = arith.constant 0 : i32
    %c0_i32_0 = arith.constant 0 : i32
    return %arg0, %c0_i32 : i32, i32
  }
  func.func @transform_1(%arg0: i32) -> (i32, i32) {
    %c0_i32 = arith.constant 0 : i32
    %c0_i32_0 = arith.constant 0 : i32
    %c0_i32_1 = arith.constant 0 : i32
    return %c0_i32, %c0_i32_0 : i32, i32
  }
  func.func @transform_2(%arg0: i32) -> (i32, i32) {
    %c0_i32 = arith.constant 0 : i32
    %c0_i32_0 = arith.constant 0 : i32
    %c0_i32_1 = arith.constant 0 : i32
    return %c0_i32, %c0_i32_0 : i32, i32
  }
  func.func @transform_3(%arg0: i32) -> (i32, i32) {
    %c0_i32 = arith.constant 0 : i32
    %c0_i32_0 = arith.constant 0 : i32
    %c0_i32_1 = arith.constant 0 : i32
    return %c0_i32, %c0_i32_0 : i32, i32
  }
  func.func @transform_4(%arg0: i32) -> (i32, i32) {
    %c0_i32 = arith.constant 0 : i32
    %c0_i32_0 = arith.constant 0 : i32
    %c0_i32_1 = arith.constant 0 : i32
    return %c0_i32, %c0_i32_0 : i32, i32
  }
  func.func @transform_5(%arg0: i32) -> (i32, i32) {
    %c0_i32 = arith.constant 0 : i32
    %c0_i32_0 = arith.constant 0 : i32
    return %arg0, %c0_i32 : i32, i32
  }
}

</mosaic_0001>

<bundles_post_ra>
// kernel: conv_stem_forward.5
= control target key start
LH: loop header
LB: loop body
LE: loop exit
PB: predicated region body
PF: predicated region fallthrough
CT: control target
= control target key end

     0   :  { %s1202_s12 = smov 0   ;;  %s1348_s0 = inlined_call_operand.vmem [shape: bf16[2,256,27], index: 0, kind: input, shape index: {}]   ;;  %s1349_s1 = inlined_call_operand.vmem [shape: bf16[27,128], index: 1, kind: input, shape index: {}]   ;;  %s1350_s2 = inlined_call_operand.vmem [shape: bf16[2,256,128], index: 2, kind: output, shape index: {0}]   ;;  %s1351_s3 = inlined_call_operand.vmem [shape: f32[2,2,128], index: 3, kind: output, shape index: {1}]  }
   0x1 LB: > { %s881_s13 = sadd.s32 4294967295, %s1179_s12   ;;  %p885_p0 = scmp.ge.s32.totalorder %s1179_s12, 1  ;;  %s1179_s12 = sphi %s1202_s12, %s14_s12  }
   0x2   : > { %p140_p1 = scmp.lt.s32.totalorder %s1179_s12, 3 }
   0x4   : > { %p141_p2 = pnand %p885_p0, %p140_p1 }
   0x5   : > { %v1155_v0 = vld [vmem:[%s1349_s1] sm:$0xff] (!%p141_p2)   ;;  %vm359_vm0 = vcmask (!%p141_p2), 1044480   ;;  %v1156_v1 = vld [vmem:[%s1349_s1 + $0x8] sm:$0x3f] (!%p141_p2)   ;;  %vm360_vm1 = vcmask (!%p141_p2), 1045504   ;;  %p168_p3 = scmp.lt.s32.totalorder (!%p141_p2), %s881_s13, 1 }
   0x6   : > { %144 = sbr.rel (%p141_p2) target bundleno = 310 (0x136), region = 28  ;;  %1106 = vmatprep.subr.bf16.mxu0 (!%p141_p2), %v1155_v0  ;;  %1142 = vmatprep.subr.bf16.mxu1 (!%p141_p2), %v1155_v0  ;;  %v1181_v2 = vmov (!%p141_p2), 65535   ;;  %vm310_vm2 = vcmask (!%p141_p2), 220160  }
   0x7   : > { %1107 = vmatpush3.bf16.msra.mxu0 (!%p141_p2), %v1155_v0  ;;  %v361_v3 = vsel (!%p141_p2), %vm359_vm0, 4294967295, %v1181_v2  ;;  %1144 = vmatpush3.bf16.msra.mxu1 (!%p141_p2), %v1155_v0 }
   0x8   : > { %v362_v4 = vsel (!%p141_p2), %vm360_vm1, %v361_v3, 0 }
   0x9   : > { %v364_v5 = vand.u32 (!%p141_p2), %v1156_v1, %v362_v4 }
   0xb   : > { %1108 = vmatprep.subr.bf16.mxu0 (!%p141_p2), %v364_v5  ;;  %1143 = vmatprep.subr.bf16.mxu1 (!%p141_p2), %v364_v5 }
   0xc   : > { %1109 = vmatpush3.bf16.msra.mxu0 (!%p141_p2), %v364_v5  ;;  %1145 = vmatpush3.bf16.msra.mxu1 (!%p141_p2), %v364_v5 }
   0xd   : > { %s1353_s13 = smov (!%p168_p3, %s881_s13), 1 }
   0xe   : > { %s959_s18 = sshll.u32 %s1353_s13, 7  ;;  %s890_s25 = sshll.u32 %s1353_s13, 1 }
   0xf   : > { %s1224_s21 = scalar_lea.vmem %s1348_s0, %s959_s18  ;;  %s1263_s24 = scalar_lea.vmem %s1350_s2, %s959_s18 }
  0x10   : > { %v1157_v6 = vld [vmem:[%s1224_s21] sm:$0xff]   ;;  %v1158_v7 = vld [vmem:[%s1224_s21 + $0x8] sm:$0xff]   ;;  %v1159_v8 = vld [vmem:[%s1224_s21 + $0x10] sm:$0xff]   ;;  %s181_s28 = scalar_lea.vmem %s1351_s3, %s890_s25 }
  0x11   : > { %1110 = vmatprep.mubr.msk.bf16.mxu0 %vm310_vm2, %v1157_v6  ;;  %v1160_v9 = vld [vmem:[%s1224_s21 + $0x18] sm:$0xff]   ;;  %v1161_v10 = vld [vmem:[%s1224_s21 + $0x20] sm:$0xff]   ;;  %v1166_v12 = vld [vmem:[%s1224_s21 + $0x48] sm:$0xff]  }
  0x12   : > { %1111 = vmatmul.mubr.msk.bf16.vlgmr.msra.gmra.mrb[0].mxu0 %vm310_vm2, %v1158_v7  ;;  %v1165_v11 = vld [vmem:[%s1224_s21 + $0x40] sm:$0xff]   ;;  %v1167_v13 = vld [vmem:[%s1224_s21 + $0x50] sm:$0xff]   ;;  %v1162_v14 = vld [vmem:[%s1224_s21 + $0x28] sm:$0xff]  }
  0x13   : > { %1114 = vmatprep.mubr.msk.bf16.mxu0 %vm310_vm2, %v1159_v8  ;;  %1126 = vmatprep.mubr.msk.bf16.mxu1 %vm310_vm2, %v1165_v11  ;;  %v1168_v15 = vld [vmem:[%s1224_s21 + $0x58] sm:$0xff]   ;;  %v1163_v16 = vld [vmem:[%s1224_s21 + $0x30] sm:$0xff]   ;;  %v1169_v17 = vld [vmem:[%s1224_s21 + $0x60] sm:$0xff]  }
  0x14   : > { %1127 = vmatmul.mubr.msk.bf16.vlgmr.msra.gmra.mrb[0].mxu1 %vm310_vm2, %v1166_v12  ;;  %v1164_v18 = vld [vmem:[%s1224_s21 + $0x38] sm:$0xff]   ;;  %v1170_v19 = vld [vmem:[%s1224_s21 + $0x68] sm:$0xff]   ;;  %v1171_v20 = vld [vmem:[%s1224_s21 + $0x70] sm:$0xff]  }
  0x15   : > { %1130 = vmatprep.mubr.msk.bf16.mxu1 %vm310_vm2, %v1167_v13  ;;  %v1172_v21 = vld [vmem:[%s1224_s21 + $0x78] sm:$0xff]  }
  0x1a   : > { %1115 = vmatmul.mubr.msk.bf16.gmra.mrb[4].mxu0 %vm310_vm2, %v1160_v9 }
  0x1b   : > { %1118 = vmatprep.mubr.msk.bf16.mxu0 %vm310_vm2, %v1161_v10 }
  0x1c   : > { %1131 = vmatmul.mubr.msk.bf16.gmra.mrb[4].mxu1 %vm310_vm2, %v1168_v15 }
  0x1d   : > { %1134 = vmatprep.mubr.msk.bf16.mxu1 %vm310_vm2, %v1169_v17 }
  0x22   : > { %1119 = vmatmul.mubr.msk.bf16.gmra.mrb[8].mxu0 %vm310_vm2, %v1162_v14 }
  0x23   : > { %1122 = vmatprep.mubr.msk.bf16.mxu0 %vm310_vm2, %v1163_v16 }
  0x24   : > { %1135 = vmatmul.mubr.msk.bf16.gmra.mrb[8].mxu1 %vm310_vm2, %v1170_v19 }
  0x25   : > { %1138 = vmatprep.mubr.msk.bf16.mxu1 %vm310_vm2, %v1171_v20 }
  0x2a   : > { %1123 = vmatmul.mubr.msk.bf16.gmra.mrb[12].mxu0 %vm310_vm2, %v1164_v18 }
  0x2c   : > { %1139 = vmatmul.mubr.msk.bf16.gmra.mrb[12].mxu1 %vm310_vm2, %v1172_v21 }
  0xe5   : > { %v1112_v22 = vpop.f32.mrb[0].mxu0 }
  0xe6   : > { %v400_v23 = vpop.f32.mrb[1].mxu0  ;;  %v727_v31 = vmul.f32 %v1112_v22, %v1112_v22 }
  0xe7   : > { %v1113_v24 = vpop.f32.mrb[2].mxu0  ;;  %v725_v27 = vmul.f32 %v400_v23, %v400_v23  ;;  %v1267_v38 = vpop.f32.mrb[0].mxu1 }
  0xe8   : > { %v1001_v25 = vpack.c.bf16 %v1113_v24, %v1112_v22  ;;  %v403_v26 = vpop.f32.mrb[3].mxu0  ;;  %v728_v34 = vmul.f32 %v1113_v24, %v1113_v24  ;;  %v1269_v40 = vpop.f32.mrb[1].mxu1 }
  0xe9   : > { %v996_v28 = vpack.c.bf16 %v403_v26, %v400_v23  ;;  %v687_v29 = vadd.f32 %v403_v26, %v400_v23  ;;  %v726_v30 = vmul.f32 %v403_v26, %v403_v26  ;;  %v1271_v45 = vpop.f32.mrb[2].mxu1 }
  0xea   : > { %1073 = vst [vmem:[%s1263_s24 + $0x8] sm:$0xff] %v1001_v25   ;;  %v1041_v48 = vpack.c.bf16 %v1271_v45, %v1267_v38  ;;  %v1275_v49 = vpop.f32.mrb[3].mxu1 }
  0xeb   : > { %997 = vst [vmem:[%s1263_s24] sm:$0xff] %v996_v28   ;;  %v688_v32 = vadd.f32 %v1112_v22, %v687_v29  ;;  %v757_v33 = vadd.f32 %v726_v30, %v725_v27  ;;  %v1036_v54 = vpack.c.bf16 %v1275_v49, %v1269_v40 }
  0xec   : > { %1081 = vst [vmem:[%s1263_s24 + $0x48] sm:$0xff] %v1041_v48   ;;  %v741_v48 = vmul.f32 %v1269_v40, %v1269_v40 }
  0xed   : > { %v758_v35 = vadd.f32 %v757_v33, %v727_v31  ;;  %v1116_v36 = vpop.f32.mrb[4].mxu0  ;;  %v689_v37 = vadd.f32 %v1113_v24, %v688_v32  ;;  %1080 = vst [vmem:[%s1263_s24 + $0x40] sm:$0xff] %v1036_v54  }
  0xee   : > { %v416_v39 = vpop.f32.mrb[5].mxu0  ;;  %v731_v55 = vmul.f32 %v1116_v36, %v1116_v36 }
  0xef   : > { %v690_v41 = vadd.f32 %v689_v37, %v416_v39  ;;  %v729_v42 = vmul.f32 %v416_v39, %v416_v39  ;;  %v759_v43 = vadd.f32 %v758_v35, %v728_v34  ;;  %v1117_v44 = vpop.f32.mrb[6].mxu0  ;;  %v1283_v62 = vpop.f32.mrb[4].mxu1 }
  0xf0   : > { %v1011_v46 = vpack.c.bf16 %v1117_v44, %v1116_v36  ;;  %v419_v47 = vpop.f32.mrb[7].mxu0  ;;  %v732_v58 = vmul.f32 %v1117_v44, %v1117_v44  ;;  %v1285_v0 = vpop.f32.mrb[5].mxu1 }
  0xf1   : > { %v760_v50 = vadd.f32 %v759_v43, %v729_v42  ;;  %v1006_v51 = vpack.c.bf16 %v419_v47, %v416_v39  ;;  %v691_v52 = vadd.f32 %v690_v41, %v419_v47  ;;  %v730_v53 = vmul.f32 %v419_v47, %v419_v47  ;;  %v1287_v5 = vpop.f32.mrb[6].mxu1 }
  0xf2   : > { %1075 = vst [vmem:[%s1263_s24 + $0x18] sm:$0xff] %v1011_v46   ;;  %v1051_v8 = vpack.c.bf16 %v1287_v5, %v1283_v62  ;;  %v1291_v9 = vpop.f32.mrb[7].mxu1 }
  0xf3   : > { %1074 = vst [vmem:[%s1263_s24 + $0x10] sm:$0xff] %v1006_v51   ;;  %v692_v56 = vadd.f32 %v1116_v36, %v691_v52  ;;  %v761_v57 = vadd.f32 %v760_v50, %v730_v53  ;;  %v1046_v14 = vpack.c.bf16 %v1291_v9, %v1285_v0 }
  0xf4   : > { %1083 = vst [vmem:[%s1263_s24 + $0x58] sm:$0xff] %v1051_v8  }
  0xf5   : > { %v762_v59 = vadd.f32 %v761_v57, %v731_v55  ;;  %v1120_v60 = vpop.f32.mrb[8].mxu0  ;;  %v693_v61 = vadd.f32 %v1117_v44, %v692_v56  ;;  %1082 = vst [vmem:[%s1263_s24 + $0x50] sm:$0xff] %v1046_v14  }
  0xf6   : > { %v432_v63 = vpop.f32.mrb[9].mxu0  ;;  %v735_v15 = vmul.f32 %v1120_v60, %v1120_v60 }
  0xf7   : > { %v694_v1 = vadd.f32 %v693_v61, %v432_v63  ;;  %v733_v2 = vmul.f32 %v432_v63, %v432_v63  ;;  %v763_v3 = vadd.f32 %v762_v59, %v732_v58  ;;  %v1121_v4 = vpop.f32.mrb[10].mxu0  ;;  %v1299_v22 = vpop.f32.mrb[8].mxu1  ;;  %v742_v59 = vmul.f32 %v1275_v49, %v1275_v49 }
  0xf8   : > { %v1021_v6 = vpack.c.bf16 %v1121_v4, %v1120_v60  ;;  %v435_v7 = vpop.f32.mrb[11].mxu0  ;;  %v736_v18 = vmul.f32 %v1121_v4, %v1121_v4  ;;  %v496_v24 = vpop.f32.mrb[9].mxu1  ;;  %v743_v61 = vmul.f32 %v1267_v38, %v1267_v38 }
  0xf9   : > { %v764_v10 = vadd.f32 %v763_v3, %v733_v2  ;;  %v1016_v11 = vpack.c.bf16 %v435_v7, %v432_v63  ;;  %v695_v12 = vadd.f32 %v694_v1, %v435_v7  ;;  %v734_v13 = vmul.f32 %v435_v7, %v435_v7  ;;  %v1301_v29 = vpop.f32.mrb[10].mxu1 }
  0xfa   : > { %1077 = vst [vmem:[%s1263_s24 + $0x28] sm:$0xff] %v1021_v6   ;;  %v1061_v32 = vpack.c.bf16 %v1301_v29, %v1299_v22  ;;  %v499_v33 = vpop.f32.mrb[11].mxu1 }
  0xfb   : > { %1076 = vst [vmem:[%s1263_s24 + $0x20] sm:$0xff] %v1016_v11   ;;  %v696_v16 = vadd.f32 %v1120_v60, %v695_v12  ;;  %v765_v17 = vadd.f32 %v764_v10, %v734_v13  ;;  %v1056_v39 = vpack.c.bf16 %v499_v33, %v496_v24  ;;  %v747_v10 = vmul.f32 %v1283_v62, %v1283_v62 }
  0xfc   : > { %1085 = vst [vmem:[%s1263_s24 + $0x68] sm:$0xff] %v1061_v32  }
  0xfd   : > { %v766_v19 = vadd.f32 %v765_v17, %v735_v15  ;;  %v1124_v20 = vpop.f32.mrb[12].mxu0  ;;  %v697_v21 = vadd.f32 %v1121_v4, %v696_v16  ;;  %1084 = vst [vmem:[%s1263_s24 + $0x60] sm:$0xff] %v1056_v39   ;;  %v745_v4 = vmul.f32 %v1285_v0, %v1285_v0 }
  0xfe   : > { %v448_v23 = vpop.f32.mrb[13].mxu0  ;;  %v739_v41 = vmul.f32 %v1124_v20, %v1124_v20 }
  0xff   : > { %v698_v25 = vadd.f32 %v697_v21, %v448_v23  ;;  %v737_v26 = vmul.f32 %v448_v23, %v448_v23  ;;  %v767_v27 = vadd.f32 %v766_v19, %v736_v18  ;;  %v1125_v28 = vpop.f32.mrb[14].mxu0  ;;  %v1140_v50 = vpop.f32.mrb[12].mxu1  ;;  %v750_v19 = vmul.f32 %v499_v33, %v499_v33 }
 0x100   : > { %v1031_v30 = vpack.c.bf16 %v1125_v28, %v1124_v20  ;;  %v451_v31 = vpop.f32.mrb[15].mxu0  ;;  %v740_v44 = vmul.f32 %v1125_v28, %v1125_v28  ;;  %v512_v51 = vpop.f32.mrb[13].mxu1 }
 0x101   : > { %v768_v34 = vadd.f32 %v767_v27, %v737_v26  ;;  %v1026_v35 = vpack.c.bf16 %v451_v31, %v448_v23  ;;  %v699_v36 = vadd.f32 %v698_v25, %v451_v31  ;;  %v738_v37 = vmul.f32 %v451_v31, %v451_v31  ;;  %v1141_v54 = vpop.f32.mrb[14].mxu1 }
 0x102   : > { %1079 = vst [vmem:[%s1263_s24 + $0x38] sm:$0xff] %v1031_v30   ;;  %v1071_v55 = vpack.c.bf16 %v1141_v54, %v1140_v50  ;;  %v515_v56 = vpop.f32.mrb[15].mxu1  ;;  %v753_v26 = vmul.f32 %v512_v51, %v512_v51  ;;  %v755_v31 = vmul.f32 %v1140_v50, %v1140_v50 }
 0x103   : > { %1078 = vst [vmem:[%s1263_s24 + $0x30] sm:$0xff] %v1026_v35   ;;  %v700_v42 = vadd.f32 %v1124_v20, %v699_v36  ;;  %v769_v43 = vadd.f32 %v768_v34, %v738_v37  ;;  %v1066_v60 = vpack.c.bf16 %v515_v56, %v512_v51  ;;  %v754_v30 = vmul.f32 %v515_v56, %v515_v56 }
 0x104   : > { %1087 = vst [vmem:[%s1263_s24 + $0x78] sm:$0xff] %v1071_v55   ;;  %v756_v34 = vmul.f32 %v1141_v54, %v1141_v54 }
 0x105   : > { %v770_v46 = vadd.f32 %v769_v43, %v739_v41  ;;  %v701_v47 = vadd.f32 %v1125_v28, %v700_v42  ;;  %1086 = vst [vmem:[%s1263_s24 + $0x70] sm:$0xff] %v1066_v60  }
 0x107   : > { %v702_v52 = vadd.f32 %v701_v47, %v1269_v40  ;;  %v771_v53 = vadd.f32 %v770_v46, %v740_v44  ;;  %v744_v40 = vmul.f32 %v1271_v45, %v1271_v45 }
 0x109   : > { %v772_v57 = vadd.f32 %v771_v53, %v741_v48  ;;  %v703_v58 = vadd.f32 %v702_v52, %v1275_v49 }
 0x10b   : > { %v704_v63 = vadd.f32 %v1267_v38, %v703_v58  ;;  %v773_v1 = vadd.f32 %v772_v57, %v742_v59  ;;  %v746_v38 = vmul.f32 %v1291_v9, %v1291_v9 }
 0x10d   : > { %v774_v2 = vadd.f32 %v773_v1, %v743_v61  ;;  %v705_v3 = vadd.f32 %v1271_v45, %v704_v63  ;;  %v748_v45 = vmul.f32 %v1287_v5, %v1287_v5 }
 0x10f   : > { %v706_v49 = vadd.f32 %v705_v3, %v1285_v0  ;;  %v775_v6 = vadd.f32 %v774_v2, %v744_v40  ;;  %v749_v0 = vmul.f32 %v496_v24, %v496_v24 }
 0x111   : > { %v776_v7 = vadd.f32 %v775_v6, %v745_v4  ;;  %v707_v8 = vadd.f32 %v706_v49, %v1291_v9  ;;  %v751_v9 = vmul.f32 %v1299_v22, %v1299_v22 }
 0x113   : > { %v708_v11 = vadd.f32 %v1283_v62, %v707_v8  ;;  %v777_v12 = vadd.f32 %v776_v7, %v746_v38  ;;  %v752_v62 = vmul.f32 %v1301_v29, %v1301_v29 }
 0x115   : > { %v778_v13 = vadd.f32 %v777_v12, %v747_v10  ;;  %v709_v14 = vadd.f32 %v1287_v5, %v708_v11 }
 0x117   : > { %v710_v15 = vadd.f32 %v709_v14, %v496_v24  ;;  %v779_v16 = vadd.f32 %v778_v13, %v748_v45 }
 0x119   : > { %v780_v17 = vadd.f32 %v779_v16, %v749_v0  ;;  %v711_v18 = vadd.f32 %v710_v15, %v499_v33 }
 0x11b   : > { %v712_v20 = vadd.f32 %v1299_v22, %v711_v18  ;;  %v781_v21 = vadd.f32 %v780_v17, %v750_v19 }
 0x11d   : > { %v782_v23 = vadd.f32 %v781_v21, %v751_v9  ;;  %v713_v25 = vadd.f32 %v1301_v29, %v712_v20 }
 0x11f   : > { %v714_v5 = vadd.f32 %v713_v25, %v512_v51  ;;  %v783_v27 = vadd.f32 %v782_v23, %v752_v62 }
 0x121   : > { %v784_v24 = vadd.f32 %v783_v27, %v753_v26  ;;  %v715_v28 = vadd.f32 %v714_v5, %v515_v56 }
 0x123   : > { %v716_v32 = vadd.f32 %v1140_v50, %v715_v28  ;;  %v785_v33 = vadd.f32 %v784_v24, %v754_v30 }
 0x125   : > { %v717_v35 = vadd.f32 %v1141_v54, %v716_v32  ;;  %v786_v22 = vadd.f32 %v785_v33, %v755_v31 }
 0x127   : > { %v718_v36 = vrot.slane %v717_v35, 4  ;;  %v787_v37 = vadd.f32 %v786_v22, %v756_v34 }
 0x129   : > { %v719_v39 = vadd.f32 %v718_v36, %v717_v35  ;;  %v788_v41 = vrot.slane %v787_v37, 4 }
 0x12b   : > { %v720_v42 = vrot.slane %v719_v39, 2  ;;  %v789_v43 = vadd.f32 %v788_v41, %v787_v37 }
 0x12d   : > { %v721_v29 = vadd.f32 %v720_v42, %v719_v39  ;;  %v790_v44 = vrot.slane %v789_v43, 2 }
 0x12f   : > { %v722_v46 = vrot.slane %v721_v29, 1  ;;  %v791_v47 = vadd.f32 %v790_v44, %v789_v43 }
 0x131   : > { %v723_v48 = vadd.f32 %v722_v46, %v721_v29  ;;  %v792_v50 = vrot.slane %v791_v47, 1 }
 0x133   : > { %724 = vst [vmem:[%s181_s28] sm:$0x1] %v723_v48  ;;  %v793_v51 = vadd.f32 %v792_v50, %v791_v47 }
 0x135   : > { %794 = vst [vmem:[%s181_s28 + $0x1] sm:$0x1] %v793_v51 }
 0x136 PF: > { %s14_s12 = sadd.s32 1, %s1179_s12  }
 0x137   : > { %p11_p4 = scmp.ge.s32.totalorder %s14_s12, 4  }
 0x139   :  { %13 = sbr.rel (!%p11_p4) target bundleno = 1 (0x1), region = 70 }

// kernel: conv_stem_forward.6
= control target key start
LH: loop header
LB: loop body
LE: loop exit
PB: predicated region body
PF: predicated region fallthrough
CT: control target
= control target key end

     0   :  { %s3219_s18 = smov 0   ;;  %s3766_s0 = inlined_call_operand.vmem [shape: bf16[2,4,8,8,128], index: 0, kind: input, shape index: {}]   ;;  %s3767_s1 = inlined_call_operand.vmem [shape: f32[1,128], index: 1, kind: input, shape index: {}]   ;;  %s3768_s2 = inlined_call_operand.vmem [shape: f32[1,128], index: 2, kind: input, shape index: {}]   ;;  %s3769_s3 = inlined_call_operand.vmem [shape: bf16[1152,128], index: 3, kind: input, shape index: {}]   ;;  %s3770_s4 = inlined_call_operand.vmem [shape: bf16[2,64,128], index: 4, kind: output, shape index: {0}]   ;;  %s3771_s5 = inlined_call_operand.vmem [shape: f32[2,2,128], index: 5, kind: output, shape index: {1}]  }
   0x1 LB: > { %s2405_s19 = sadd.s32 4294967295, %s3186_s18   ;;  %p2409_p0 = scmp.ge.s32.totalorder %s3186_s18, 1  ;;  %s3186_s18 = sphi %s3219_s18, %s16_s18  }
   0x2   : > { %p190_p1 = scmp.lt.s32.totalorder %s3186_s18, 3 }
   0x4   : > { %p191_p2 = pnand %p2409_p0, %p190_p1 }
   0x5   : > { %v3060_v0 = vld [vmem:[%s3769_s3 + $0x40] sm:$0xff] (!%p191_p2)   ;;  %v3188_v3 = vmov (!%p191_p2), 0   ;;  %v3064_v5 = vld [vmem:[%s3769_s3 + $0x48] sm:$0xff] (!%p191_p2)   ;;  %v3068_v9 = vld [vmem:[%s3769_s3 + $0x50] sm:$0xff] (!%p191_p2)   ;;  %p222_p3 = scmp.lt.s32.totalorder (!%p191_p2), %s2405_s19, 1  ;;  %vm240_vm0 = vcmask (!%p191_p2), 1040384  }
   0x6   : > { %194 = sbr.rel (%p191_p2) target bundleno = 375 (0x177), region = 36  ;;  %v3061_v1 = vld [vmem:[%s3769_s3 + $0xc0] sm:$0xff] (!%p191_p2)   ;;  %2839 = vmatprep.subr.bf16.mxu0 (!%p191_p2), %v3060_v0  ;;  %239 = vst [vmem:[#allocation2] sm:$0xf] (!%p191_p2), %v3188_v3  ;;  %424 = vst [vmem:[#allocation2 + $0x4] sm:$0xf] (!%p191_p2), %v3188_v3 }
   0x7   : > { %v3062_v2 = vld [vmem:[%s3769_s3] sm:$0xff] (!%p191_p2)   ;;  %475 = vst [vmem:[#allocation2 + $0x8] sm:$0xf] (!%p191_p2), %v3188_v3  ;;  %2879 = vmatprep.subr.bf16.mxu1 (!%p191_p2), %v3061_v1  ;;  %v3065_v6 = vld [vmem:[%s3769_s3 + $0xc8] sm:$0xff] (!%p191_p2)   ;;  %v3069_v10 = vld [vmem:[%s3769_s3 + $0xd0] sm:$0xff] (!%p191_p2)   ;;  %vm400_vm4 = vcmask (!%p191_p2), 1043456  }
   0x8   : > { %v3063_v4 = vld [vmem:[%s3769_s3 + $0x80] sm:$0xff] (!%p191_p2)   ;;  %2840 = vmatpush3.bf16.msra.mxu0 (!%p191_p2), %v3062_v2  ;;  %v3066_v7 = vld [vmem:[%s3769_s3 + $0x8] sm:$0xff] (!%p191_p2)   ;;  %v3070_v11 = vld [vmem:[%s3769_s3 + $0x10] sm:$0xff] (!%p191_p2)   ;;  %vm241_vm1 = vsmask.f32 (!%p191_p2), 256 }
   0x9   : > { %2880 = vmatpush3.bf16.msra.mxu1 (!%p191_p2), %v3063_v4  ;;  %2841 = vmatprep.subr.bf16.mxu0 (!%p191_p2), %v3064_v5  ;;  %v3067_v8 = vld [vmem:[%s3769_s3 + $0x88] sm:$0xff] (!%p191_p2)   ;;  %v3071_v12 = vld [vmem:[%s3769_s3 + $0x90] sm:$0xff] (!%p191_p2)   ;;  %v3072_v13 = vld [vmem:[%s3769_s3 + $0x58] sm:$0xff] (!%p191_p2)   ;;  %vm401_vm3 = vsmask.f32 (!%p191_p2), 7938 }
   0xa   : > { %2881 = vmatprep.subr.bf16.mxu1 (!%p191_p2), %v3065_v6  ;;  %v3073_v14 = vld [vmem:[%s3769_s3 + $0xd8] sm:$0xff] (!%p191_p2)   ;;  %v3076_v17 = vld [vmem:[%s3769_s3 + $0x60] sm:$0xff] (!%p191_p2)   ;;  %v3080_v21 = vld [vmem:[%s3769_s3 + $0x68] sm:$0xff] (!%p191_p2)  }
   0xb   : > { %v3074_v15 = vld [vmem:[%s3769_s3 + $0x18] sm:$0xff] (!%p191_p2)   ;;  %v3077_v18 = vld [vmem:[%s3769_s3 + $0xe0] sm:$0xff] (!%p191_p2)   ;;  %v3081_v22 = vld [vmem:[%s3769_s3 + $0xe8] sm:$0xff] (!%p191_p2)  }
   0xc   : > { %2842 = vmatpush3.bf16.msra.mxu0 (!%p191_p2), %v3066_v7  ;;  %v3075_v16 = vld [vmem:[%s3769_s3 + $0x98] sm:$0xff] (!%p191_p2)   ;;  %v3078_v19 = vld [vmem:[%s3769_s3 + $0x20] sm:$0xff] (!%p191_p2)   ;;  %v3082_v23 = vld [vmem:[%s3769_s3 + $0x28] sm:$0xff] (!%p191_p2)  }
   0xd   : > { %2882 = vmatpush3.bf16.msra.mxu1 %v3067_v8  ;;  %2843 = vmatprep.subr.bf16.mxu0 %v3068_v9  ;;  %v3079_v20 = vld [vmem:[%s3769_s3 + $0xa0] sm:$0xff]   ;;  %v3083_v24 = vld [vmem:[%s3769_s3 + $0xa8] sm:$0xff]   ;;  %v3084_v25 = vld [vmem:[%s3769_s3 + $0x70] sm:$0xff]   ;;  %s3777_s19 = smov (!%p222_p3, %s2405_s19), 1 }
   0xe   : > { %2883 = vmatprep.subr.bf16.mxu1 %v3069_v10  ;;  %v3085_v26 = vld [vmem:[%s3769_s3 + $0xf0] sm:$0xff]   ;;  %v3088_v29 = vld [vmem:[%s3769_s3 + $0x78] sm:$0xff]   ;;  %s2619_s7 = sshll.u32 %s3777_s19, 7  ;;  %v3338_v33 = vld [vmem:[%s3767_s1] ss:$0 sm:$0xff]  ;;  %s2620_s15 = sshll.u32 %s3777_s19, 5 }
   0xf   : > { %v3086_v27 = vld [vmem:[%s3769_s3 + $0x30] sm:$0xff]   ;;  %v3089_v30 = vld [vmem:[%s3769_s3 + $0xf8] sm:$0xff]   ;;  %s3333_s16 = scalar_lea.vmem %s3766_s0, %s2619_s7  ;;  %vm3340_vm2 = vmand %vm240_vm0, %vm241_vm1  ;;  %s3753_s21 = scalar_lea.vmem %s3770_s4, %s2620_s15 }
  0x10   : > { %2844 = vmatpush3.bf16.msra.mxu0 %v3070_v11  ;;  %v3087_v28 = vld [vmem:[%s3769_s3 + $0xb0] sm:$0xff]   ;;  %v3090_v31 = vld [vmem:[%s3769_s3 + $0x38] sm:$0xff]   ;;  %v243_v35 = vld [vmem:[#allocation2] sm:$0x1]  ;;  %s2414_s22 = sshll.u32 %s3777_s19, 1 }
  0x11   : > { %2884 = vmatpush3.bf16.msra.mxu1 %v3071_v12  ;;  %2845 = vmatprep.subr.bf16.mxu0 %v3072_v13  ;;  %v3091_v32 = vld [vmem:[%s3769_s3 + $0xb8] sm:$0xff]   ;;  %v246_v36 = vld [vmem:[#allocation2 + $0x24] sm:$0x1]  ;;  %v3347_v37 = vld [vmem:[%s3768_s2] ss:$0 sm:$0xff]  ;;  %v244_v38 = vsel %vm3340_vm2, 0, %v243_v35  ;;  %s235_s25 = scalar_lea.vmem %s3771_s5, %s2414_s22 }
  0x12   : > { %2885 = vmatprep.subr.bf16.mxu1 %v3073_v14  ;;  %v247_v39 = vsel %vm3340_vm2, 0, %v246_v36  ;;  %v2804_v40 = vld [vmem:[%s3333_s16 + $0x60] sm:$0xff]   ;;  %245 = vst [vmem:[#allocation2] sm:$0x1] %v244_v38  ;;  %v525_v45 = vld [vmem:[#allocation2 + $0xc] sm:$0x1]  ;;  %vm3387_vm5 = vmand %vm400_vm4, %vm401_vm3 }
  0x13   : > { %v2807_v41 = vld [vmem:[%s3333_s16 + $0x40] sm:$0xff]   ;;  %248 = vst [vmem:[#allocation2 + $0x24] sm:$0x1] %v247_v39  ;;  %v2654_v42 = vunpack.c.l.bf16 %v2804_v40  ;;  %v2655_v43 = vunpack.c.h.bf16 %v2804_v40  ;;  %v528_v46 = vld [vmem:[#allocation2 + $0x30] sm:$0x1]  ;;  %v526_v48 = vsel %vm3340_vm2, 0, %v525_v45 }
  0x14   : > { %2846 = vmatpush3.bf16.msra.mxu0 %v3074_v15  ;;  %v2666_v44 = vunpack.c.l.bf16 %v2807_v41  ;;  %v2813_v47 = vld [vmem:[%s3333_s16 + $0x20] sm:$0xff]   ;;  %v529_v49 = vsel %vm3340_vm2, 0, %v528_v46  ;;  %v2667_v53 = vunpack.c.h.bf16 %v2807_v41  ;;  %527 = vst [vmem:[#allocation2 + $0xc] sm:$0x1] %v526_v48  ;;  %v3378_v12 = vld [vmem:[%s3333_s16 + $0x68] sm:$0xff]  }
  0x15   : > { %2886 = vmatpush3.bf16.msra.mxu1 %v3075_v16  ;;  %2847 = vmatprep.subr.bf16.mxu0 %v3076_v17  ;;  %v2690_v50 = vunpack.c.l.bf16 %v2813_v47  ;;  %v2691_v51 = vunpack.c.h.bf16 %v2813_v47  ;;  %v288_v52 = vmul.f32 %v2654_v42, %v3338_v33  ;;  %530 = vst [vmem:[#allocation2 + $0x30] sm:$0x1] %v529_v49  ;;  %v3098_v55 = vld [vmem:[%s3769_s3 + $0x140] sm:$0xff]   ;;  %v289_v61 = vmul.f32 %v2655_v43, %v3338_v33  ;;  %v531_v35 = vld [vmem:[#allocation2 + $0x54] sm:$0x1]  ;;  %v2814_v46 = vld [vmem:[%s3333_s16 + $0x28] sm:$0xff]  }
  0x16   : > { %2887 = vmatprep.subr.bf16.mxu1 %v3077_v18  ;;  %v440_v54 = vmul.f32 %v2666_v44, %v3338_v33  ;;  %v3099_v58 = vld [vmem:[%s3769_s3 + $0x1c0] sm:$0xff]   ;;  %v441_v2 = vmul.f32 %v2667_v53, %v3338_v33  ;;  %v534_v41 = vld [vmem:[#allocation2 + $0x78] sm:$0x1]  ;;  %v532_v45 = vsel %vm3340_vm2, 0, %v531_v35  ;;  %v258_v35 = vld [vmem:[#allocation2 + $0xb4] sm:$0x1] }
  0x17   : > { %v566_v56 = vmul.f32 %v2690_v50, %v3338_v33  ;;  %v567_v57 = vmul.f32 %v2691_v51, %v3338_v33  ;;  %v301_v59 = vadd.f32 %v3347_v37, %v288_v52  ;;  %v302_v7 = vadd.f32 %v3347_v37, %v289_v61  ;;  %533 = vst [vmem:[#allocation2 + $0x54] sm:$0x1] %v532_v45 }
  0x18   : > { %2848 = vmatpush3.bf16.msra.mxu0 %v3078_v19  ;;  %v447_v60 = vadd.f32 %v3347_v37, %v440_v54  ;;  %v448_v13 = vadd.f32 %v3347_v37, %v441_v2  ;;  %v249_v19 = vld [vmem:[#allocation2 + $0x48] sm:$0x1]  ;;  %v2659_v61 = vunpack.c.h.bf16 %v3378_v12 }
  0x19   : > { %2888 = vmatpush3.bf16.msra.mxu1 %v3079_v20  ;;  %2849 = vmatprep.subr.bf16.mxu0 %v3080_v21  ;;  %v574_v62 = vadd.f32 %v3347_v37, %v566_v56  ;;  %v575_v63 = vadd.f32 %v3347_v37, %v567_v57  ;;  %v308_v0 = vmax.f32 %v301_v59, 0.0  ;;  %v535_v57 = vsel %vm3340_vm2, 0, %v534_v41 }
  0x1a   : > { %2889 = vmatprep.subr.bf16.mxu1 %v3081_v22  ;;  %v454_v1 = vmax.f32 %v447_v60, 0.0  ;;  %v403_v14 = vld [vmem:[#allocation2 + $0x24] sm:$0xf]  ;;  %v455_v40 = vmax.f32 %v448_v13, 0.0  ;;  %536 = vst [vmem:[#allocation2 + $0x78] sm:$0x1] %v535_v57  ;;  %v2695_v60 = vunpack.c.h.bf16 %v2814_v46 }
  0x1b   : > { %v582_v3 = vmax.f32 %v574_v62, 0.0  ;;  %v583_v4 = vmax.f32 %v575_v63, 0.0  ;;  %v2621_v5 = vpack.c.bf16 %v308_v0, %v308_v0  ;;  %v686_v21 = vld [vmem:[#allocation2 + $0xc] sm:$0xf] }
  0x1c   : > { %2850 = vmatpush3.bf16.msra.mxu0 %v3082_v23  ;;  %v461_v6 = vpack.c.bf16 %v454_v1, %v454_v1  ;;  %v689_v22 = vld [vmem:[#allocation2 + $0x30] sm:$0xf]  ;;  %v250_v23 = vsel %vm3340_vm2, 0, %v249_v19  ;;  %v462_v54 = vpack.c.bf16 %v455_v40, %v455_v40  ;;  %v3105_v40 = vld [vmem:[%s3769_s3 + $0x188] sm:$0xff]  }
  0x1d   : > { %2890 = vmatpush3.bf16.msra.mxu1 %v3083_v24  ;;  %2851 = vmatprep.subr.bf16.mxu0 %v3084_v25  ;;  %v2628_v8 = vpack.c.bf16 %v582_v3, %v582_v3  ;;  %v2629_v9 = vpack.c.bf16 %v583_v4, %v583_v4  ;;  %v344_v10 = vshrl.u32 %v2621_v5, 16  ;;  %v347_v11 = vshll.u32 %v2621_v5, 16  ;;  %518 = vst [vmem:[#allocation2 + $0x2c] sm:$0xf] %v2621_v5  ;;  %v252_v24 = vld [vmem:[#allocation2 + $0x6c] sm:$0x1] }
  0x1e   : > { %2891 = vmatprep.subr.bf16.mxu1 %v3085_v26  ;;  %468 = vst [vmem:[#allocation2 + $0x28] sm:$0xf] %v461_v6  ;;  %v2658_v25 = vunpack.c.l.bf16 %v3378_v12  ;;  %v309_v26 = vmax.f32 %v302_v7, 0.0  ;;  %251 = vst [vmem:[#allocation2 + $0x48] sm:$0x1] %v250_v23  ;;  %v569_v4 = vmul.f32 %v2695_v60, %v3338_v33  ;;  %v291_v5 = vmul.f32 %v2659_v61, %v3338_v33  ;;  %v3100_v7 = vld [vmem:[%s3769_s3 + $0x100] sm:$0xff]  }
  0x1f   : > { %v623_v15 = vshrl.u32 %v2628_v8, 16  ;;  %v626_v16 = vshll.u32 %v2628_v8, 16  ;;  %v630_v17 = vshrl.u32 %v2629_v9, 16  ;;  %v633_v18 = vshll.u32 %v2629_v9, 16  ;;  %814 = vst [vmem:[#allocation2 + $0x14] sm:$0xf] %v2628_v8 }
  0x20   : > { %2852 = vmatpush3.bf16.msra.mxu0 %v3086_v27  ;;  %815 = vst [vmem:[#allocation2 + $0x38] sm:$0xf] %v2629_v9  ;;  %v346_v20 = vrot.slane %v344_v10, 7  ;;  %v2808_v27 = vld [vmem:[%s3333_s16 + $0x48] sm:$0xff]   ;;  %v290_v38 = vmul.f32 %v2658_v25, %v3338_v33  ;;  %v2622_v39 = vpack.c.bf16 %v309_v26, %v309_v26  ;;  %469 = vst [vmem:[#allocation2 + $0x4c] sm:$0xf] %v462_v54 }
  0x21   : > { %2892 = vmatpush3.bf16.msra.mxu1 %v3087_v28  ;;  %2853 = vmatprep.subr.bf16.mxu0 %v3088_v29  ;;  %v625_v29 = vrot.slane %v623_v15, 7  ;;  %v2671_v62 = vunpack.c.h.bf16 %v2808_v27  ;;  %v3102_v12 = vld [vmem:[%s3769_s3 + $0x148] sm:$0xff]   ;;  %v304_v15 = vadd.f32 %v3347_v37, %v291_v5  ;;  %v3113_v54 = vld [vmem:[%s3769_s3 + $0x110] sm:$0xff]  }
  0x22   : > { %2893 = vmatprep.subr.bf16.mxu1 %v3089_v30  ;;  %v632_v30 = vrot.slane %v630_v17, 7  ;;  %v349_v36 = vor.u32 %v347_v11, %v346_v20  ;;  %v303_v48 = vadd.f32 %v3347_v37, %v290_v38  ;;  %v351_v49 = vshrl.u32 %v2622_v39, 16  ;;  %519 = vst [vmem:[#allocation2 + $0x50] sm:$0xf] %v2622_v39  ;;  %v3104_v25 = vld [vmem:[%s3769_s3 + $0x108] sm:$0xff]  }
  0x23   : > { %v628_v42 = vor.u32 %v626_v16, %v625_v29  ;;  %v354_v50 = vshll.u32 %v2622_v39, 16  ;;  %v443_v6 = vmul.f32 %v2671_v62, %v3338_v33  ;;  %v311_v38 = vmax.f32 %v304_v15, 0.0  ;;  %v3440_v39 = vld [vmem:[%s3333_s16 + $0x50] sm:$0xff]   ;;  %v3115_v62 = vld [vmem:[%s3769_s3 + $0x158] sm:$0xff]  }
  0x24   : > { %2854 = vmatpush3.bf16.msra.mxu0 %v3090_v31  ;;  %v253_v31 = vsel %vm3340_vm2, 0, %v252_v24  ;;  %v635_v43 = vor.u32 %v633_v18, %v632_v30  ;;  %v404_v47 = vsel %vm3387_vm5, %v349_v36, %v403_v14  ;;  %v353_v56 = vrot.slane %v351_v49, 7  ;;  %v3101_v18 = vld [vmem:[%s3769_s3 + $0x180] sm:$0xff]   ;;  %v3095_v20 = vld [vmem:[#allocation2 + $0x8] ss:$36 sps:$4 sm:$0xff]   ;;  %v3437_v36 = vld [vmem:[%s3333_s16 + $0x70] sm:$0xff]  }
  0x25   : > { %2894 = vmatpush3.bf16.msra.mxu1 %v3091_v32  ;;  %2919 = vmatprep.subr.bf16.mxu0 %v3098_v55  ;;  %v2670_v32 = vunpack.c.l.bf16 %v2808_v27  ;;  %254 = vst [vmem:[#allocation2 + $0x6c] sm:$0x1] %v253_v31  ;;  %405 = vst [vmem:[#allocation2 + $0x24] sm:$0xf] %v404_v47  ;;  %v687_v51 = vsel %vm3387_vm5, %v628_v42, %v686_v21  ;;  %v310_v55 = vmax.f32 %v303_v48, 0.0  ;;  %v3103_v21 = vld [vmem:[%s3769_s3 + $0x1c8] sm:$0xff]   ;;  %v2674_v45 = vunpack.c.l.bf16 %v3440_v39 }
  0x26   : > { %2959 = vmatprep.subr.bf16.mxu1 %v3099_v58  ;;  %v690_v52 = vsel %vm3387_vm5, %v635_v43, %v689_v22  ;;  %688 = vst [vmem:[#allocation2 + $0xc] sm:$0xf] %v687_v51  ;;  %v2694_v58 = vunpack.c.l.bf16 %v2814_v46  ;;  %v356_v0 = vor.u32 %v354_v50, %v353_v56  ;;  %v406_v1 = vld [vmem:[#allocation2 + $0x48] sm:$0xf]  ;;  %v577_v14 = vadd.f32 %v3347_v37, %v569_v4  ;;  %v255_v27 = vld [vmem:[#allocation2 + $0x90] sm:$0x1] }
  0x27   : > { %v442_v44 = vmul.f32 %v2670_v32, %v3338_v33  ;;  %691 = vst [vmem:[#allocation2 + $0x30] sm:$0xf] %v690_v52  ;;  %v2623_v63 = vpack.c.bf16 %v310_v55, %v310_v55  ;;  %v3094_v17 = vld [vmem:[#allocation2 + $0x4] ss:$36 sps:$4 sm:$0xff]   ;;  %v450_v29 = vadd.f32 %v3347_v37, %v443_v6  ;;  %v256_v32 = vsel %vm3340_vm2, 0, %v255_v27  ;;  %v3111_v42 = vld [vmem:[%s3769_s3 + $0x150] sm:$0xff]  }
  0x28   : > { %v568_v2 = vmul.f32 %v2694_v58, %v3338_v33  ;;  %v407_v10 = vsel %vm3387_vm5, %v356_v0, %v406_v1  ;;  %v585_v23 = vmax.f32 %v577_v14, 0.0  ;;  %1950 = vmatprep.mubr.bf16.mxu0 %v3094_v17  ;;  %257 = vst [vmem:[#allocation2 + $0x90] sm:$0x1] %v256_v32  ;;  %v259_v43 = vsel %vm3340_vm2, 0, %v258_v35  ;;  %v537_v46 = vld [vmem:[#allocation2 + $0x9c] sm:$0x1] }
  0x29   : > { %v449_v53 = vadd.f32 %v3347_v37, %v442_v44  ;;  %v358_v8 = vshrl.u32 %v2623_v63, 16  ;;  %v361_v9 = vshll.u32 %v2623_v63, 16  ;;  %520 = vst [vmem:[#allocation2 + $0x74] sm:$0xf] %v2623_v63  ;;  %408 = vst [vmem:[#allocation2 + $0x48] sm:$0xf] %v407_v10  ;;  %v2662_v44 = vunpack.c.l.bf16 %v3437_v36 }
  0x2a   : > { %v576_v11 = vadd.f32 %v3347_v37, %v568_v2  ;;  %v2631_v31 = vpack.c.bf16 %v585_v23, %v585_v23  ;;  %v540_v47 = vld [vmem:[#allocation2 + $0xc0] sm:$0x1]  ;;  %v3112_v52 = vld [vmem:[%s3769_s3 + $0x1d0] sm:$0xff]   ;;  %260 = vst [vmem:[#allocation2 + $0xb4] sm:$0x1] %v259_v43  ;;  %v2624_v56 = vpack.c.bf16 %v311_v38, %v311_v38  ;;  %v444_v57 = vmul.f32 %v2674_v45, %v3338_v33  ;;  %v3118_v38 = vld [vmem:[%s3769_s3 + $0x198] sm:$0xff]  }
  0x2b   : > { %v456_v59 = vmax.f32 %v449_v53, 0.0  ;;  %v360_v19 = vrot.slane %v358_v8, 7  ;;  %v692_v53 = vld [vmem:[#allocation2 + $0x54] sm:$0xf]  ;;  %v292_v55 = vmul.f32 %v2662_v44, %v3338_v33  ;;  %v457_v58 = vmax.f32 %v450_v29, 0.0  ;;  %v3124_v32 = vld [vmem:[%s3769_s3 + $0x160] sm:$0xff]  }
  0x2c   : > { %v409_v13 = vld [vmem:[#allocation2 + $0x6c] sm:$0xf]  ;;  %v3092_v16 = vld [vmem:[#allocation2] ss:$36 sps:$4 sm:$0xff]   ;;  %v584_v22 = vmax.f32 %v576_v11, 0.0  ;;  %v644_v50 = vshrl.u32 %v2631_v31, 16  ;;  %v451_v6 = vadd.f32 %v3347_v37, %v444_v57 }
  0x2d   : > { %v463_v3 = vpack.c.bf16 %v456_v59, %v456_v59  ;;  %v363_v26 = vor.u32 %v361_v9, %v360_v19  ;;  %1951 = vmatmul.mubr.bf16.vlgmr.msra.gmra.mrb[0].mxu0 %v3092_v16  ;;  %v647_v51 = vshll.u32 %v2631_v31, 16  ;;  %817 = vst [vmem:[#allocation2 + $0x80] sm:$0xf] %v2631_v31  ;;  %v2815_v59 = vld [vmem:[%s3333_s16 + $0x30] sm:$0xff]   ;;  %v538_v63 = vsel %vm3340_vm2, 0, %v537_v46  ;;  %v3116_v9 = vld [vmem:[%s3769_s3 + $0x1d8] sm:$0xff]  }
  0x2e   : > { %v3097_v24 = vld [vmem:[#allocation2 + $0xc] ss:$36 sps:$4 sm:$0xff]   ;;  %v2630_v30 = vpack.c.bf16 %v584_v22, %v584_v22  ;;  %2920 = vmatpush3.bf16.msra.mxu0 %v3100_v7  ;;  %v646_v61 = vrot.slane %v644_v50, 7  ;;  %v541_v0 = vsel %vm3340_vm2, 0, %v540_v47  ;;  %v695_v1 = vld [vmem:[#allocation2 + $0x78] sm:$0xf]  ;;  %v464_v10 = vpack.c.bf16 %v457_v58, %v457_v58 }
  0x2f   : > { %470 = vst [vmem:[#allocation2 + $0x70] sm:$0xf] %v463_v3  ;;  %2015 = vmatprep.mubr.bf16.mxu1 %v3097_v24  ;;  %v410_v41 = vsel %vm3387_vm5, %v363_v26, %v409_v13  ;;  %2921 = vmatprep.subr.bf16.mxu0 %v3102_v12  ;;  %v3114_v2 = vld [vmem:[%s3769_s3 + $0x190] sm:$0xff]   ;;  %v305_v3 = vadd.f32 %v3347_v37, %v292_v55  ;;  %v365_v4 = vshrl.u32 %v2624_v56, 16  ;;  %v368_v5 = vshll.u32 %v2624_v56, 16  ;;  %v3117_v24 = vld [vmem:[%s3769_s3 + $0x118] sm:$0xff]  }
  0x30   : > { %2016 = vmatmul.mubr.bf16.vlgmr.msra.gmra.mrb[0].mxu1 %v3095_v20  ;;  %411 = vst [vmem:[#allocation2 + $0x6c] sm:$0xf] %v410_v41  ;;  %v637_v48 = vshrl.u32 %v2630_v30, 16  ;;  %v640_v49 = vshll.u32 %v2630_v30, 16  ;;  %816 = vst [vmem:[#allocation2 + $0x5c] sm:$0xf] %v2630_v30  ;;  %v649_v8 = vor.u32 %v647_v51, %v646_v61  ;;  %v2698_v11 = vunpack.c.l.bf16 %v2815_v59 }
  0x31   : > { %2960 = vmatpush3.bf16.msra.mxu1 %v3101_v18  ;;  %521 = vst [vmem:[#allocation2 + $0x98] sm:$0xf] %v2624_v56  ;;  %539 = vst [vmem:[#allocation2 + $0x9c] sm:$0x1] %v538_v63  ;;  %v1128_v12 = vld [vmem:[#allocation2 + $0x48] sm:$0xff]  ;;  %v312_v13 = vmax.f32 %v305_v3, 0.0  ;;  %v2699_v16 = vunpack.c.h.bf16 %v2815_v59 }
  0x32   : > { %2961 = vmatprep.subr.bf16.mxu1 %v3103_v21  ;;  %v639_v60 = vrot.slane %v637_v48, 7  ;;  %2922 = vmatpush3.bf16.msra.mxu0 %v3104_v25  ;;  %542 = vst [vmem:[#allocation2 + $0xc0] sm:$0x1] %v541_v0  ;;  %v367_v14 = vrot.slane %v365_v4, 7  ;;  %v458_v15 = vmax.f32 %v451_v6, 0.0  ;;  %v696_v18 = vsel %vm3387_vm5, %v649_v8, %v695_v1  ;;  %v3125_v44 = vld [vmem:[%s3769_s3 + $0x1e0] sm:$0xff]  }
  0x33   : > { %2923 = vmatprep.subr.bf16.mxu0 %v3111_v42  ;;  %v412_v19 = vld [vmem:[#allocation2 + $0x90] sm:$0xf]  ;;  %471 = vst [vmem:[#allocation2 + $0x94] sm:$0xf] %v464_v10  ;;  %v570_v20 = vmul.f32 %v2698_v11, %v3338_v33  ;;  %v2663_v21 = vunpack.c.h.bf16 %v3437_v36  ;;  %697 = vst [vmem:[#allocation2 + $0x78] sm:$0xf] %v696_v18  ;;  %v2625_v25 = vpack.c.bf16 %v312_v13, %v312_v13  ;;  %v2675_v36 = vunpack.c.h.bf16 %v3440_v39 }
  0x34   : > { %v642_v7 = vor.u32 %v640_v49, %v639_v60  ;;  %v370_v26 = vor.u32 %v368_v5, %v367_v14  ;;  %v465_v27 = vpack.c.bf16 %v458_v15, %v458_v15  ;;  %v571_v29 = vmul.f32 %v2699_v16, %v3338_v33  ;;  %v415_v39 = vld [vmem:[#allocation2 + $0xb4] sm:$0xf]  ;;  %v3126_v46 = vld [vmem:[%s3769_s3 + $0x120] sm:$0xff]   ;;  %v3128_v47 = vld [vmem:[%s3769_s3 + $0x168] sm:$0xff]  }
  0x35   : > { %2962 = vmatpush3.bf16.msra.mxu1 %v3105_v40  ;;  %v578_v31 = vadd.f32 %v3347_v37, %v570_v20  ;;  %v293_v35 = vmul.f32 %v2663_v21, %v3338_v33  ;;  %v372_v40 = vshrl.u32 %v2625_v25, 16  ;;  %v375_v41 = vshll.u32 %v2625_v25, 16  ;;  %522 = vst [vmem:[#allocation2 + $0xbc] sm:$0xf] %v2625_v25  ;;  %v264_v55 = vld [vmem:[#allocation2 + $0xfc] sm:$0x1] }
  0x36   : > { %v693_v17 = vsel %vm3387_vm5, %v642_v7, %v692_v53  ;;  %2963 = vmatprep.subr.bf16.mxu1 %v3112_v52  ;;  %v3106_v23 = vld [vmem:[#allocation2 + $0x4c] ss:$36 sps:$4 sm:$0xff]   ;;  %2924 = vmatpush3.bf16.msra.mxu0 %v3113_v54  ;;  %v413_v42 = vsel %vm3387_vm5, %v370_v26, %v412_v19  ;;  %472 = vst [vmem:[#allocation2 + $0xb8] sm:$0xf] %v465_v27  ;;  %1058 = vst [vmem:[#allocation2 + $0xac] sm:$0xf] %v465_v27 }
  0x37   : > { %v1133_v22 = vld [vmem:[#allocation2 + $0x6c] sm:$0xff]  ;;  %694 = vst [vmem:[#allocation2 + $0x54] sm:$0xf] %v693_v17  ;;  %2925 = vmatprep.subr.bf16.mxu0 %v3115_v62  ;;  %1958 = vmatprep.mubr.bf16.mxu0 %v3106_v23  ;;  %v579_v43 = vadd.f32 %v3347_v37, %v571_v29  ;;  %414 = vst [vmem:[#allocation2 + $0x90] sm:$0xf] %v413_v42  ;;  %v586_v45 = vmax.f32 %v578_v31, 0.0  ;;  %v445_v48 = vmul.f32 %v2675_v36, %v3338_v33 }
  0x38   : > { %v2510_v30 = vcombine.low %v1128_v12, %v1133_v22  ;;  %v374_v49 = vrot.slane %v372_v40, 7  ;;  %v306_v51 = vadd.f32 %v3347_v37, %v293_v35  ;;  %v3127_v53 = vld [vmem:[%s3769_s3 + $0x1a0] sm:$0xff]   ;;  %v261_v54 = vld [vmem:[#allocation2 + $0xd8] sm:$0x1]  ;;  %v3129_v59 = vld [vmem:[%s3769_s3 + $0x1e8] sm:$0xff]   ;;  %v265_v61 = vsel %vm3340_vm2, 0, %v264_v55 }
  0x39   : > { %2964 = vmatpush3.bf16.msra.mxu1 %v3114_v2  ;;  %v587_v50 = vmax.f32 %v579_v43, 0.0  ;;  %v2632_v52 = vpack.c.bf16 %v586_v45, %v586_v45  ;;  %v452_v56 = vadd.f32 %v3347_v37, %v445_v48  ;;  %v262_v60 = vsel %vm3340_vm2, 0, %v261_v54  ;;  %v2421_v62 = vld [vmem:[%s3333_s16 + $0x78] sm:$0xf]  ;;  %266 = vst [vmem:[#allocation2 + $0xfc] sm:$0x1] %v265_v61 }
  0x3a   : > { %1959 = vmatmul.mubr.bf16.gmra.mrb[4].mxu0 %v2510_v30  ;;  %2965 = vmatprep.subr.bf16.mxu1 %v3116_v9  ;;  %v3515_v57 = vor.u32 %v375_v41, %v374_v49  ;;  %v2437_v63 = vld [vmem:[%s3333_s16 + $0x58] sm:$0xf]  ;;  %263 = vst [vmem:[#allocation2 + $0xd8] sm:$0x1] %v262_v60  ;;  %v281_v3 = vunpack.c.l.bf16 %v2421_v62  ;;  %v3110_v5 = vld [vmem:[#allocation2 + $0x50] ss:$36 sps:$4 sm:$0xff]  }
  0x3b   : > { %2926 = vmatpush3.bf16.msra.mxu0 %v3117_v24  ;;  %v2633_v58 = vpack.c.bf16 %v587_v50, %v587_v50  ;;  %v651_v1 = vshrl.u32 %v2632_v52, 16  ;;  %v654_v2 = vshll.u32 %v2632_v52, 16  ;;  %v439_v4 = vunpack.c.l.bf16 %v2437_v63  ;;  %818 = vst [vmem:[#allocation2 + $0xa4] sm:$0xf] %v2632_v52  ;;  %v698_v9 = vld [vmem:[#allocation2 + $0x9c] sm:$0xf] }
  0x3c   : > { %2927 = vmatprep.subr.bf16.mxu0 %v3124_v32  ;;  %v416_v6 = vsel %vm3387_vm5, %v3515_v57, %v415_v39  ;;  %v3130_v10 = vld [vmem:[%s3769_s3 + $0x128] sm:$0xff]   ;;  %v313_v11 = vmax.f32 %v306_v51, 0.0  ;;  %v701_v13 = vld [vmem:[#allocation2 + $0xc0] sm:$0xf]  ;;  %v294_v15 = vmul.f32 %v3338_v33, %v281_v3  ;;  %v459_v17 = vmax.f32 %v452_v56, 0.0  ;;  %v2816_v25 = vld [vmem:[%s3333_s16 + $0x38] sm:$0xff]  }
  0x3d   : > { %2966 = vmatpush3.bf16.msra.mxu1 %v3118_v38  ;;  %v658_v7 = vshrl.u32 %v2633_v58, 16  ;;  %v661_v8 = vshll.u32 %v2633_v58, 16  ;;  %819 = vst [vmem:[#allocation2 + $0xc8] sm:$0xf] %v2633_v58  ;;  %417 = vst [vmem:[#allocation2 + $0xb4] sm:$0xf] %v416_v6  ;;  %v446_v16 = vmul.f32 %v3338_v33, %v439_v4  ;;  %v2702_v50 = vunpack.c.l.bf16 %v2816_v25 }
  0x3e   : > { %v3108_v0 = vld [vmem:[#allocation2 + $0x54] ss:$36 sps:$4 sm:$0xff]   ;;  %2967 = vmatprep.subr.bf16.mxu1 %v3125_v44  ;;  %v653_v12 = vrot.slane %v651_v1, 7  ;;  %v3131_v14 = vld [vmem:[%s3769_s3 + $0x1a8] sm:$0xff]   ;;  %v543_v19 = vld [vmem:[#allocation2 + $0xe4] sm:$0x1]  ;;  %v2626_v21 = vpack.c.bf16 %v313_v11, %v313_v11  ;;  %v307_v29 = vadd.f32 %v3347_v37, %v294_v15  ;;  %v466_v31 = vpack.c.bf16 %v459_v17, %v459_v17 }
  0x3f   : > { %2928 = vmatpush3.bf16.msra.mxu0 %v3126_v46  ;;  %2023 = vmatprep.mubr.bf16.mxu1 %v3108_v0  ;;  %v2444_v18 = vld [vmem:[%s3333_s16 + $0x78] sm:$0xf]  ;;  %v660_v20 = vrot.slane %v658_v7, 7  ;;  %v544_v23 = vsel %vm3340_vm2, 0, %v543_v19  ;;  %v546_v24 = vld [vmem:[#allocation2 + $0x108] sm:$0x1]  ;;  %v453_v30 = vadd.f32 %v3347_v37, %v446_v16  ;;  %v2703_v55 = vunpack.c.h.bf16 %v2816_v25 }
  0x40   : > { %2929 = vmatprep.subr.bf16.mxu0 %v3128_v47  ;;  %2024 = vmatmul.mubr.bf16.gmra.mrb[4].mxu1 %v3110_v5  ;;  %v489_v22 = vunpack.c.l.bf16 %v2444_v18  ;;  %v3137_v26 = vld [vmem:[%s3769_s3 + $0x170] sm:$0xff]   ;;  %v656_v27 = vor.u32 %v654_v2, %v653_v12  ;;  %545 = vst [vmem:[#allocation2 + $0xe4] sm:$0x1] %v544_v23  ;;  %v379_v35 = vshrl.u32 %v2626_v21, 16  ;;  %v382_v36 = vshll.u32 %v2626_v21, 16  ;;  %v3141_v52 = vld [vmem:[%s3769_s3 + $0x178] sm:$0xff]  }
  0x41   : > { %2968 = vmatpush3.bf16.msra.mxu1 %v3127_v53  ;;  %v663_v32 = vor.u32 %v661_v8, %v660_v20  ;;  %523 = vst [vmem:[#allocation2 + $0xe0] sm:$0xf] %v2626_v21  ;;  %v3138_v40 = vld [vmem:[%s3769_s3 + $0x1f0] sm:$0xff]   ;;  %v314_v44 = vmax.f32 %v307_v29, 0.0  ;;  %v460_v39 = vmax.f32 %v453_v30, 0.0  ;;  %v547_v45 = vsel %vm3340_vm2, 0, %v546_v24 }
  0x42   : > { %2969 = vmatprep.subr.bf16.mxu1 %v3129_v59  ;;  %v496_v38 = vmul.f32 %v3338_v33, %v489_v22  ;;  %v3139_v41 = vld [vmem:[%s3769_s3 + $0x130] sm:$0xff]   ;;  %v699_v43 = vsel %vm3387_vm5, %v656_v27, %v698_v9  ;;  %473 = vst [vmem:[#allocation2 + $0xdc] sm:$0xf] %v466_v31  ;;  %1059 = vst [vmem:[#allocation2 + $0xd0] sm:$0xf] %v466_v31  ;;  %v381_v47 = vrot.slane %v379_v35, 7 }
  0x43   : > { %2930 = vmatpush3.bf16.msra.mxu0 %v3130_v10  ;;  %v1138_v42 = vld [vmem:[#allocation2 + $0x90] sm:$0xff]  ;;  %700 = vst [vmem:[#allocation2 + $0x9c] sm:$0xf] %v699_v43  ;;  %v702_v46 = vsel %vm3387_vm5, %v663_v32, %v701_v13  ;;  %v418_v48 = vld [vmem:[#allocation2 + $0xd8] sm:$0xf]  ;;  %v2627_v53 = vpack.c.bf16 %v314_v44, %v314_v44  ;;  %v467_v54 = vpack.c.bf16 %v460_v39, %v460_v39  ;;  %v2824_v24 = vld [vmem:[%s3333_s16 + $0x60] sm:$0xff]  }
  0x44   : > { %2931 = vmatprep.subr.bf16.mxu0 %v3137_v26  ;;  %v503_v49 = vadd.f32 %v3347_v37, %v496_v38  ;;  %548 = vst [vmem:[#allocation2 + $0x108] sm:$0x1] %v547_v45  ;;  %v3140_v51 = vld [vmem:[%s3769_s3 + $0x1b0] sm:$0xff]   ;;  %703 = vst [vmem:[#allocation2 + $0xc0] sm:$0xf] %v702_v46  ;;  %v3566_v59 = vor.u32 %v382_v36, %v381_v47  ;;  %v572_v61 = vmul.f32 %v2702_v50, %v3338_v33  ;;  %v3142_v6 = vld [vmem:[%s3769_s3 + $0x1f8] sm:$0xff]  }
  0x45   : > { %2970 = vmatpush3.bf16.msra.mxu1 %v3131_v14  ;;  %v1143_v56 = vld [vmem:[#allocation2 + $0xb4] sm:$0xff]  ;;  %v386_v63 = vshrl.u32 %v2627_v53, 16  ;;  %v389_v0 = vshll.u32 %v2627_v53, 16  ;;  %474 = vst [vmem:[#allocation2 + $0x100] sm:$0xf] %v467_v54  ;;  %v573_v1 = vmul.f32 %v2703_v55, %v3338_v33  ;;  %v2705_v14 = vld [vmem:[%s3333_s16] sm:$0xff]   ;;  %v2738_v43 = vunpack.c.l.bf16 %v2824_v24 }
  0x46   : > { %v3119_v58 = vld [vmem:[#allocation2 + $0x94] ss:$36 sps:$4 sm:$0xff]   ;;  %v510_v60 = vmax.f32 %v503_v49, 0.0  ;;  %2971 = vmatprep.subr.bf16.mxu1 %v3138_v40  ;;  %v2519_v62 = vcombine.low %v1138_v42, %v1143_v56  ;;  %v419_v2 = vsel %vm3387_vm5, %v3566_v59, %v418_v48  ;;  %v421_v3 = vld [vmem:[#allocation2 + $0xfc] sm:$0xf]  ;;  %v580_v5 = vadd.f32 %v3347_v37, %v572_v61  ;;  %v2828_v30 = vld [vmem:[%s3333_s16 + $0x40] sm:$0xff]  }
  0x47   : > { %2932 = vmatpush3.bf16.msra.mxu0 %v3139_v41  ;;  %1966 = vmatprep.mubr.bf16.mxu0 %v3119_v58  ;;  %v388_v7 = vrot.slane %v386_v63, 7  ;;  %420 = vst [vmem:[#allocation2 + $0xd8] sm:$0xf] %v419_v2  ;;  %v581_v8 = vadd.f32 %v3347_v37, %v573_v1  ;;  %v3143_v9 = vld [vmem:[%s3769_s3 + $0x138] sm:$0xff]   ;;  %v2706_v18 = vunpack.c.l.bf16 %v2705_v14  ;;  %v2707_v19 = vunpack.c.h.bf16 %v2705_v14  ;;  %v3594_v31 = vld [vmem:[%s3769_s3 + $0x200] sm:$0xff]   ;;  %v2825_v1 = vld [vmem:[%s3333_s16 + $0x68] sm:$0xff]  }
  0x48   : > { %2933 = vmatprep.subr.bf16.mxu0 %v3141_v52  ;;  %v517_v4 = vpack.c.bf16 %v510_v60, %v510_v60  ;;  %1967 = vmatmul.mubr.bf16.gmra.mrb[8].mxu0 %v2519_v62  ;;  %v588_v10 = vmax.f32 %v580_v5, 0.0  ;;  %v3144_v11 = vld [vmem:[%s3769_s3 + $0x1b8] sm:$0xff]   ;;  %v704_v39 = vld [vmem:[#allocation2 + $0xe4] sm:$0xf]  ;;  %v2739_v45 = vunpack.c.h.bf16 %v2824_v24  ;;  %v2754_v46 = vunpack.c.l.bf16 %v2828_v30  ;;  %v2817_v60 = vld [vmem:[%s3333_s16 + $0x8] sm:$0xff]  }
  0x49   : > { %2972 = vmatpush3.bf16.msra.mxu1 %v3140_v51  ;;  %v391_v12 = vor.u32 %v389_v0, %v388_v7  ;;  %v589_v13 = vmax.f32 %v581_v8, 0.0  ;;  %v3123_v16 = vld [vmem:[#allocation2 + $0x98] ss:$36 sps:$4 sm:$0xff]   ;;  %v726_v27 = vmul.f32 %v2706_v18, %v3338_v33  ;;  %v727_v29 = vmul.f32 %v2707_v19, %v3338_v33  ;;  %v3618_v5 = vld [vmem:[%s3768_s2] ss:$0 sm:$0xff] }
  0x4a   : > { %524 = vst [vmem:[#allocation2 + $0x104] sm:$0xf] %v517_v4  ;;  %2973 = vmatprep.subr.bf16.mxu1 %v3142_v6  ;;  %v2634_v17 = vpack.c.bf16 %v588_v10, %v588_v10  ;;  %v822_v22 = vld [vmem:[#allocation2 + $0x18] sm:$0x1]  ;;  %v825_v23 = vld [vmem:[#allocation2 + $0x3c] sm:$0x1]  ;;  %v2755_v47 = vunpack.c.h.bf16 %v2828_v30  ;;  %v862_v53 = vmul.f32 %v2738_v43, %v3338_v33  ;;  %v863_v55 = vmul.f32 %v2739_v45, %v3338_v33 }
  0x4b   : > { %2934 = vmatpush3.bf16.msra.mxu0 %v3143_v9  ;;  %v3121_v15 = vld [vmem:[#allocation2 + $0x9c] ss:$36 sps:$4 sm:$0xff]   ;;  %v422_v20 = vsel %vm3387_vm5, %v391_v12, %v421_v3  ;;  %v2635_v21 = vpack.c.bf16 %v589_v13, %v589_v13  ;;  %v823_v36 = vsel %vm3340_vm2, 0, %v822_v22  ;;  %v826_v38 = vsel %vm3340_vm2, 0, %v825_v23  ;;  %v707_v50 = vld [vmem:[#allocation2 + $0x108] sm:$0xf] }
  0x4c   : > { %2031 = vmatprep.mubr.bf16.mxu1 %v3121_v15  ;;  %423 = vst [vmem:[#allocation2 + $0xfc] sm:$0xf] %v422_v20  ;;  %v665_v25 = vshrl.u32 %v2634_v17, 16  ;;  %v668_v26 = vshll.u32 %v2634_v17, 16  ;;  %820 = vst [vmem:[#allocation2 + $0xec] sm:$0xf] %v2634_v17  ;;  %v734_v41 = vadd.f32 %v3347_v37, %v726_v27  ;;  %v735_v42 = vadd.f32 %v3347_v37, %v727_v29 }
  0x4d   : > { %2974 = vmatpush3.bf16.msra.mxu1 %v3144_v11  ;;  %v672_v32 = vshrl.u32 %v2635_v21, 16  ;;  %v675_v35 = vshll.u32 %v2635_v21, 16  ;;  %821 = vst [vmem:[#allocation2 + $0x110] sm:$0xf] %v2635_v21  ;;  %824 = vst [vmem:[#allocation2 + $0x18] sm:$0x1] %v823_v36  ;;  %3011 = vmatprep.subr.bf16.mxu0 %v3594_v31  ;;  %v1022_v56 = vmul.f32 %v2754_v46, %v3338_v33  ;;  %v2710_v9 = vunpack.c.l.bf16 %v2817_v60 }
  0x4e   : > { %2032 = vmatmul.mubr.bf16.gmra.mrb[8].mxu1 %v3123_v16  ;;  %v667_v40 = vrot.slane %v665_v25, 7  ;;  %827 = vst [vmem:[#allocation2 + $0x3c] sm:$0x1] %v826_v38  ;;  %3035 = vmatprep.subr.bf16.mxu1 %v3594_v31  ;;  %v1148_v48 = vld [vmem:[#allocation2 + $0xd8] sm:$0xff]  ;;  %v742_v51 = vmax.f32 %v734_v41, 0.0  ;;  %v743_v52 = vmax.f32 %v735_v42, 0.0  ;;  %v1023_v58 = vmul.f32 %v2755_v47, %v3338_v33 }
  0x4f   : > { %v674_v44 = vrot.slane %v672_v32, 7  ;;  %v870_v0 = vadd.f32 %v3347_v37, %v862_v53  ;;  %v3132_v3 = vld [vmem:[#allocation2 + $0xdc] ss:$36 sps:$4 sm:$0xff]   ;;  %v871_v33 = vadd.f32 %v3618_v5, %v863_v55  ;;  %v1030_v6 = vadd.f32 %v3618_v5, %v1022_v56  ;;  %v831_v12 = vld [vmem:[#allocation2 + $0x84] sm:$0x1]  ;;  %v2829_v22 = vld [vmem:[%s3333_s16 + $0x48] sm:$0xff]  }
  0x50   : > { %v670_v49 = vor.u32 %v668_v26, %v667_v40  ;;  %v750_v62 = vpack.c.bf16 %v742_v51, %v742_v51  ;;  %v751_v63 = vpack.c.bf16 %v743_v52, %v743_v52  ;;  %v1031_v7 = vadd.f32 %v3618_v5, %v1023_v58  ;;  %v828_v11 = vld [vmem:[#allocation2 + $0x60] sm:$0x1]  ;;  %1974 = vmatprep.mubr.bf16.mxu0 %v3132_v3  ;;  %v834_v53 = vld [vmem:[#allocation2 + $0xa8] sm:$0x1] }
  0x51   : > { %v677_v54 = vor.u32 %v675_v35, %v674_v44  ;;  %v878_v8 = vmax.f32 %v870_v0, 0.0  ;;  %v2711_v10 = vunpack.c.h.bf16 %v2817_v60  ;;  %v879_v13 = vmax.f32 %v871_v33, 0.0  ;;  %v3626_v19 = vld [vmem:[%s3767_s1] ss:$0 sm:$0xff]  ;;  %v2818_v35 = vld [vmem:[%s3333_s16 + $0x10] sm:$0xff]   ;;  %v3649_v3 = vld [vmem:[%s3769_s3 + $0x208] sm:$0xff]  }
  0x52   : > { %v705_v61 = vsel %vm3387_vm5, %v670_v49, %v704_v39  ;;  %758 = vst [vmem:[#allocation2 + $0x10] sm:$0xf] %v750_v62  ;;  %759 = vst [vmem:[#allocation2 + $0x34] sm:$0xf] %v751_v63  ;;  %v1038_v14 = vmax.f32 %v1030_v6, 0.0  ;;  %v2742_v15 = vunpack.c.l.bf16 %v2825_v1  ;;  %v2743_v16 = vunpack.c.h.bf16 %v2825_v1 }
  0x53   : > { %v1153_v2 = vld [vmem:[#allocation2 + $0xfc] sm:$0xff]  ;;  %706 = vst [vmem:[#allocation2 + $0xe4] sm:$0xf] %v705_v61  ;;  %v708_v4 = vsel %vm3387_vm5, %v677_v54, %v707_v50  ;;  %v2636_v17 = vpack.c.bf16 %v878_v8, %v878_v8  ;;  %v1039_v18 = vmax.f32 %v1031_v7, 0.0  ;;  %v728_v20 = vmul.f32 %v3626_v19, %v2710_v9  ;;  %v3147_v61 = vld [vmem:[#allocation2 + $0x14] ss:$36 sps:$4 sm:$0xff]  }
  0x54   : > { %709 = vst [vmem:[#allocation2 + $0x108] sm:$0xf] %v708_v4  ;;  %v2528_v37 = vcombine.low %v1148_v48, %v1153_v2  ;;  %v729_v21 = vmul.f32 %v3626_v19, %v2711_v10  ;;  %v2637_v23 = vpack.c.bf16 %v879_v13, %v879_v13  ;;  %v1046_v24 = vpack.c.bf16 %v1038_v14, %v1038_v14  ;;  %v982_v40 = vld [vmem:[#allocation2 + $0x18] sm:$0xf]  ;;  %v3136_v48 = vld [vmem:[#allocation2 + $0xe0] ss:$36 sps:$4 sm:$0xff]  }
  0x55   : > { %v829_v25 = vsel %vm3340_vm2, 0, %v828_v11  ;;  %v832_v26 = vsel %vm3340_vm2, 0, %v831_v12  ;;  %v919_v27 = vshrl.u32 %v2636_v17, 16  ;;  %v922_v29 = vshll.u32 %v2636_v17, 16  ;;  %1110 = vst [vmem:[#allocation2 + $0x20] sm:$0xf] %v2636_v17 }
  0x56   : > { %1975 = vmatmul.mubr.bf16.gmra.mrb[12].mxu0 %v2528_v37  ;;  %v1047_v30 = vpack.c.bf16 %v1039_v18, %v1039_v18  ;;  %v736_v32 = vadd.f32 %v3618_v5, %v728_v20  ;;  %830 = vst [vmem:[#allocation2 + $0x60] sm:$0x1] %v829_v25  ;;  %833 = vst [vmem:[#allocation2 + $0x84] sm:$0x1] %v832_v26  ;;  %v926_v36 = vshrl.u32 %v2637_v23, 16  ;;  %v929_v38 = vshll.u32 %v2637_v23, 16 }
  0x57   : > { %1054 = vst [vmem:[#allocation2 + $0x1c] sm:$0xf] %v1046_v24  ;;  %v737_v41 = vadd.f32 %v3618_v5, %v729_v21  ;;  %v864_v42 = vmul.f32 %v3626_v19, %v2742_v15  ;;  %1111 = vst [vmem:[#allocation2 + $0x44] sm:$0xf] %v2637_v23  ;;  %v921_v43 = vrot.slane %v919_v27, 7  ;;  %v865_v45 = vmul.f32 %v3626_v19, %v2743_v16  ;;  %v3663_v20 = vld [vmem:[%s3769_s3 + $0x210] sm:$0xff]  }
  0x58   : > { %v985_v44 = vld [vmem:[#allocation2 + $0x3c] sm:$0xf]  ;;  %1055 = vst [vmem:[#allocation2 + $0x40] sm:$0xf] %v1047_v30  ;;  %v744_v39 = vmax.f32 %v736_v32, 0.0  ;;  %v2758_v46 = vunpack.c.l.bf16 %v2829_v22  ;;  %v928_v49 = vrot.slane %v926_v36, 7  ;;  %v2759_v51 = vunpack.c.h.bf16 %v2829_v22  ;;  %2080 = vmatprep.mubr.bf16.mxu0 %v3147_v61 }
  0x59   : > { %v872_v50 = vadd.f32 %v3618_v5, %v864_v42  ;;  %v2714_v52 = vunpack.c.l.bf16 %v2818_v35  ;;  %v3145_v54 = vld [vmem:[#allocation2 + $0x10] ss:$36 sps:$4 sm:$0xff]   ;;  %v924_v55 = vor.u32 %v922_v29, %v921_v43  ;;  %v745_v56 = vmax.f32 %v737_v41, 0.0  ;;  %v837_v14 = vld [vmem:[#allocation2 + $0xcc] sm:$0x1]  ;;  %v2819_v21 = vld [vmem:[%s3333_s16 + $0x18] sm:$0xff]  }
  0x5a   : > { %v752_v58 = vpack.c.bf16 %v744_v39, %v744_v39  ;;  %v873_v60 = vadd.f32 %v3618_v5, %v865_v45  ;;  %v931_v62 = vor.u32 %v929_v38, %v928_v49  ;;  %v1024_v0 = vmul.f32 %v3626_v19, %v2758_v46  ;;  %v840_v26 = vld [vmem:[#allocation2 + $0xf0] sm:$0x1]  ;;  %v843_v27 = vld [vmem:[#allocation2 + $0x114] sm:$0x1]  ;;  %v2827_v43 = vld [vmem:[%s3333_s16 + $0x78] sm:$0xff]  }
  0x5b   : > { %v3134_v47 = vld [vmem:[#allocation2 + $0xe4] ss:$36 sps:$4 sm:$0xff]   ;;  %v880_v63 = vmax.f32 %v872_v50, 0.0  ;;  %v1025_v1 = vmul.f32 %v3626_v19, %v2759_v51  ;;  %v983_v2 = vsel %vm3387_vm5, %v924_v55, %v982_v40  ;;  %v753_v4 = vpack.c.bf16 %v745_v56, %v745_v56  ;;  %v3682_v51 = vld [vmem:[%s3769_s3 + $0x218] sm:$0xff]   ;;  %v2834_v55 = vld [vmem:[%s3333_s16 + $0x70] sm:$0xff]  }
  0x5c   : > { %2039 = vmatprep.mubr.bf16.mxu1 %v3134_v47  ;;  %760 = vst [vmem:[#allocation2 + $0x58] sm:$0xf] %v752_v58  ;;  %v881_v33 = vmax.f32 %v873_v60, 0.0  ;;  %v2715_v6 = vunpack.c.h.bf16 %v2818_v35  ;;  %984 = vst [vmem:[#allocation2 + $0x18] sm:$0xf] %v983_v2  ;;  %v986_v7 = vsel %vm3387_vm5, %v931_v62, %v985_v44  ;;  %v1032_v8 = vadd.f32 %v3618_v5, %v1024_v0 }
  0x5d   : > { %2040 = vmatmul.mubr.bf16.gmra.mrb[12].mxu1 %v3136_v48  ;;  %v2638_v37 = vpack.c.bf16 %v880_v63, %v880_v63  ;;  %v1033_v9 = vadd.f32 %v3618_v5, %v1025_v1  ;;  %987 = vst [vmem:[#allocation2 + $0x3c] sm:$0xf] %v986_v7  ;;  %761 = vst [vmem:[#allocation2 + $0x7c] sm:$0xf] %v753_v4  ;;  %v730_v11 = vmul.f32 %v3626_v19, %v2714_v52  ;;  %v988_v38 = vld [vmem:[#allocation2 + $0x60] sm:$0xf] }
  0x5e   : > { %2081 = vmatmul.mubr.bf16.vlgmr.msra.gmra.mrb[16].mxu0 %v3145_v54  ;;  %v2639_v10 = vpack.c.bf16 %v881_v33, %v881_v33  ;;  %v731_v12 = vmul.f32 %v3626_v19, %v2715_v6  ;;  %v835_v13 = vsel %vm3340_vm2, 0, %v834_v53  ;;  %v1040_v17 = vmax.f32 %v1032_v8, 0.0  ;;  %v991_v39 = vld [vmem:[#allocation2 + $0x84] sm:$0xf]  ;;  %v2831_v48 = vld [vmem:[%s3333_s16 + $0x58] sm:$0xff]  }
  0x5f   : > { %3012 = vmatpush3.bf16.msra.mxu0 %v3594_v31  ;;  %v933_v15 = vshrl.u32 %v2638_v37, 16  ;;  %v936_v16 = vshll.u32 %v2638_v37, 16  ;;  %v1041_v18 = vmax.f32 %v1033_v9, 0.0  ;;  %836 = vst [vmem:[#allocation2 + $0xa8] sm:$0x1] %v835_v13  ;;  %v738_v24 = vadd.f32 %v3618_v5, %v730_v11 }
  0x60   : > { %1112 = vst [vmem:[#allocation2 + $0x68] sm:$0xf] %v2638_v37  ;;  %3013 = vmatprep.subr.bf16.mxu0 %v3649_v3  ;;  %v940_v22 = vshrl.u32 %v2639_v10, 16  ;;  %v943_v23 = vshll.u32 %v2639_v10, 16  ;;  %v739_v25 = vadd.f32 %v3618_v5, %v731_v12  ;;  %1113 = vst [vmem:[#allocation2 + $0x8c] sm:$0xf] %v2639_v10  ;;  %v1048_v30 = vpack.c.bf16 %v1040_v17, %v1040_v17 }
  0x61   : > { %v935_v29 = vrot.slane %v933_v15, 7  ;;  %v1049_v32 = vpack.c.bf16 %v1041_v18, %v1041_v18  ;;  %v838_v35 = vsel %vm3340_vm2, 0, %v837_v14  ;;  %v746_v40 = vmax.f32 %v738_v24, 0.0  ;;  %v3150_v34 = vld [vmem:[#allocation2 + $0x1c] ss:$36 sps:$4 sm:$0xff]  }
  0x62   : > { %v942_v36 = vrot.slane %v940_v22, 7  ;;  %v747_v41 = vmax.f32 %v739_v25, 0.0  ;;  %839 = vst [vmem:[#allocation2 + $0xcc] sm:$0x1] %v838_v35  ;;  %v2718_v42 = vunpack.c.l.bf16 %v2819_v21  ;;  %1056 = vst [vmem:[#allocation2 + $0x64] sm:$0xf] %v1048_v30  ;;  %v2719_v45 = vunpack.c.h.bf16 %v2819_v21  ;;  %2145 = vmatprep.mubr.bf16.mxu1 %v3150_v34 }
  0x63   : > { %3014 = vmatpush3.bf16.msra.mxu0 %v3649_v3  ;;  %v938_v44 = vor.u32 %v936_v16, %v935_v29  ;;  %1057 = vst [vmem:[#allocation2 + $0x88] sm:$0xf] %v1049_v32  ;;  %v841_v46 = vsel %vm3340_vm2, 0, %v840_v26  ;;  %v844_v47 = vsel %vm3340_vm2, 0, %v843_v27  ;;  %v1130_v49 = vld [vmem:[#allocation2 + $0x58] sm:$0xff]  ;;  %v754_v52 = vpack.c.bf16 %v746_v40, %v746_v40  ;;  %v3700_v10 = vld [vmem:[%s3769_s3 + $0x220] sm:$0xff]  }
  0x64   : > { %v945_v50 = vor.u32 %v943_v23, %v942_v36  ;;  %3015 = vmatprep.subr.bf16.mxu0 %v3663_v20  ;;  %v755_v53 = vpack.c.bf16 %v747_v41, %v747_v41  ;;  %v732_v54 = vmul.f32 %v3626_v19, %v2718_v42  ;;  %842 = vst [vmem:[#allocation2 + $0xf0] sm:$0x1] %v841_v46  ;;  %845 = vst [vmem:[#allocation2 + $0x114] sm:$0x1] %v844_v47  ;;  %v3148_v56 = vld [vmem:[#allocation2 + $0x18] ss:$36 sps:$4 sm:$0xff]  }
  0x65   : > { %v989_v58 = vsel %vm3387_vm5, %v938_v44, %v988_v38  ;;  %v733_v60 = vmul.f32 %v3626_v19, %v2719_v45  ;;  %v2750_v61 = vunpack.c.l.bf16 %v2827_v43  ;;  %v2751_v62 = vunpack.c.h.bf16 %v2827_v43  ;;  %v1135_v63 = vld [vmem:[#allocation2 + $0x7c] sm:$0xff]  ;;  %762 = vst [vmem:[#allocation2 + $0xa0] sm:$0xf] %v754_v52  ;;  %2146 = vmatmul.mubr.bf16.vlgmr.msra.gmra.mrb[16].mxu1 %v3148_v56  ;;  %v3722_v27 = vld [vmem:[%s3769_s3 + $0x228] sm:$0xff]  }
  0x66   : > { %v3153_v0 = vld [vmem:[#allocation2 + $0x5c] ss:$36 sps:$4 sm:$0xff]   ;;  %990 = vst [vmem:[#allocation2 + $0x60] sm:$0xf] %v989_v58  ;;  %v992_v1 = vsel %vm3387_vm5, %v945_v50, %v991_v39  ;;  %763 = vst [vmem:[#allocation2 + $0xc4] sm:$0xf] %v755_v53  ;;  %v740_v4 = vadd.f32 %v3618_v5, %v732_v54  ;;  %v2766_v33 = vunpack.c.l.bf16 %v2831_v48  ;;  %v2767_v6 = vunpack.c.h.bf16 %v2831_v48  ;;  %3043 = vmatpush3.bf16.msra.mxu1 %v3594_v31 }
  0x67   : > { %v994_v2 = vld [vmem:[#allocation2 + $0xa8] sm:$0xf]  ;;  %993 = vst [vmem:[#allocation2 + $0x84] sm:$0xf] %v992_v1  ;;  %v2514_v7 = vcombine.low %v1130_v49, %v1135_v63  ;;  %3016 = vmatpush3.bf16.msra.mxu0 %v3663_v20  ;;  %v741_v8 = vadd.f32 %v3618_v5, %v733_v60  ;;  %v2778_v9 = vunpack.c.l.bf16 %v2834_v55  ;;  %2088 = vmatprep.mubr.bf16.mxu0 %v3153_v0  ;;  %v2779_v17 = vunpack.c.h.bf16 %v2834_v55  ;;  %v3172_v50 = vld [vmem:[%s3769_s3 + $0x230] sm:$0xff]  }
  0x68   : > { %v995_v37 = vsel %vm3387_vm5, %v3515_v57, %v994_v2  ;;  %v748_v11 = vmax.f32 %v740_v4, 0.0  ;;  %v868_v12 = vmul.f32 %v3626_v19, %v2750_v61  ;;  %v869_v13 = vmul.f32 %v3626_v19, %v2751_v62  ;;  %3036 = vmatprep.subr.bf16.mxu1 %v3649_v3  ;;  %3017 = vmatprep.subr.bf16.mxu0 %v3682_v51  ;;  %v3162_v55 = vld [vmem:[#allocation2 + $0xac] ss:$36 sps:$4 sm:$0xff]   ;;  %v3173_v62 = vld [vmem:[%s3769_s3 + $0x238] sm:$0xff]  }
  0x69   : > { %996 = vst [vmem:[#allocation2 + $0xa8] sm:$0xf] %v995_v37  ;;  %v1028_v14 = vmul.f32 %v3626_v19, %v2766_v33  ;;  %2089 = vmatmul.mubr.bf16.gmra.mrb[20].mxu0 %v2514_v7  ;;  %v997_v57 = vld [vmem:[#allocation2 + $0xcc] sm:$0xf]  ;;  %v749_v15 = vmax.f32 %v741_v8, 0.0  ;;  %v1029_v16 = vmul.f32 %v3626_v19, %v2767_v6  ;;  %v1082_v18 = vmul.f32 %v3626_v19, %v2778_v9 }
  0x6a   : > { %v998_v21 = vsel %vm3387_vm5, %v3566_v59, %v997_v57  ;;  %v756_v22 = vpack.c.bf16 %v748_v11, %v748_v11  ;;  %v876_v23 = vadd.f32 %v3618_v5, %v868_v12  ;;  %v877_v24 = vadd.f32 %v3618_v5, %v869_v13  ;;  %3044 = vmatpush3.bf16.msra.mxu1 %v3649_v3  ;;  %v3155_v41 = vld [vmem:[#allocation2 + $0x64] ss:$36 sps:$4 sm:$0xff]   ;;  %v3167_v0 = vld [vmem:[#allocation2 + $0xec] ss:$36 sps:$4 sm:$0xff]  }
  0x6b   : > { %3018 = vmatpush3.bf16.msra.mxu0 %v3682_v51  ;;  %999 = vst [vmem:[#allocation2 + $0xcc] sm:$0xf] %v998_v21  ;;  %v757_v31 = vpack.c.bf16 %v749_v15, %v749_v15  ;;  %v1036_v25 = vadd.f32 %v3618_v5, %v1028_v14  ;;  %v1037_v26 = vadd.f32 %v3618_v5, %v1029_v16  ;;  %v1000_v61 = vld [vmem:[#allocation2 + $0xf0] sm:$0xf]  ;;  %v1003_v1 = vld [vmem:[#allocation2 + $0x114] sm:$0xf] }
  0x6c   : > { %3019 = vmatprep.subr.bf16.mxu0 %v3700_v10  ;;  %764 = vst [vmem:[#allocation2 + $0xe8] sm:$0xf] %v756_v22  ;;  %v884_v59 = vmax.f32 %v876_v23, 0.0  ;;  %v1083_v29 = vmul.f32 %v3626_v19, %v2779_v17  ;;  %v1090_v30 = vadd.f32 %v3618_v5, %v1082_v18  ;;  %v1140_v32 = vld [vmem:[#allocation2 + $0xa0] sm:$0xff]  ;;  %v885_v36 = vmax.f32 %v877_v24, 0.0  ;;  %3037 = vmatprep.subr.bf16.mxu1 %v3663_v20 }
  0x6d   : > { %v1145_v35 = vld [vmem:[#allocation2 + $0xc4] sm:$0xff]  ;;  %765 = vst [vmem:[#allocation2 + $0x10c] sm:$0xf] %v757_v31  ;;  %v1044_v38 = vmax.f32 %v1036_v25, 0.0  ;;  %v1045_v40 = vmax.f32 %v1037_v26, 0.0  ;;  %2153 = vmatprep.mubr.bf16.mxu1 %v3155_v41 }
  0x6e   : > { %v3157_v42 = vld [vmem:[#allocation2 + $0x60] ss:$36 sps:$4 sm:$0xff]   ;;  %v2523_v43 = vcombine.low %v1140_v32, %v1145_v35  ;;  %v2642_v44 = vpack.c.bf16 %v884_v59, %v884_v59  ;;  %v1091_v39 = vadd.f32 %v3618_v5, %v1083_v29  ;;  %v1098_v45 = vmax.f32 %v1090_v30, 0.0  ;;  %3045 = vmatpush3.bf16.msra.mxu1 %v3663_v20  ;;  %v3176_v8 = vld [vmem:[#allocation2 + $0x68] ss:$36 sps:$4 sm:$0xff]  }
  0x6f   : > { %v3160_v19 = vld [vmem:[#allocation2 + $0xa4] ss:$36 sps:$4 sm:$0xff]   ;;  %3020 = vmatpush3.bf16.msra.mxu0 %v3700_v10  ;;  %v2643_v46 = vpack.c.bf16 %v885_v36, %v885_v36  ;;  %v1052_v3 = vpack.c.bf16 %v1044_v38, %v1044_v38  ;;  %v1053_v47 = vpack.c.bf16 %v1045_v40, %v1045_v40  ;;  %2154 = vmatmul.mubr.bf16.gmra.mrb[20].mxu1 %v3157_v42 }
  0x70   : > { %3021 = vmatprep.subr.bf16.mxu0 %v3722_v27  ;;  %v961_v48 = vshrl.u32 %v2642_v44, 16  ;;  %v964_v49 = vshll.u32 %v2642_v44, 16  ;;  %v1099_v52 = vmax.f32 %v1091_v39, 0.0  ;;  %v1106_v53 = vpack.c.bf16 %v1098_v45, %v1098_v45  ;;  %1116 = vst [vmem:[#allocation2 + $0xf8] sm:$0xf] %v2642_v44  ;;  %2096 = vmatprep.mubr.bf16.mxu0 %v3160_v19 }
  0x71   : > { %v968_v5 = vshrl.u32 %v2643_v46, 16  ;;  %v971_v54 = vshll.u32 %v2643_v46, 16  ;;  %1060 = vst [vmem:[#allocation2 + $0xf4] sm:$0xf] %v1052_v3  ;;  %1061 = vst [vmem:[#allocation2 + $0x118] sm:$0xf] %v1053_v47  ;;  %2097 = vmatmul.mubr.bf16.gmra.mrb[24].mxu0 %v2523_v43  ;;  %3038 = vmatprep.subr.bf16.mxu1 %v3682_v51 }
  0x72   : > { %1117 = vst [vmem:[#allocation2 + $0x11c] sm:$0xf] %v2643_v46  ;;  %v963_v56 = vrot.slane %v961_v48, 7  ;;  %v1107_v34 = vpack.c.bf16 %v1099_v52, %v1099_v52  ;;  %1114 = vst [vmem:[#allocation2 + $0xb0] sm:$0xf] %v1106_v53  ;;  %2161 = vmatprep.mubr.bf16.mxu1 %v3162_v55  ;;  %3046 = vmatpush3.bf16.msra.mxu1 %v3682_v51 }
  0x73   : > { %3022 = vmatpush3.bf16.msra.mxu0 %v3722_v27  ;;  %v1150_v58 = vld [vmem:[#allocation2 + $0xe8] sm:$0xff]  ;;  %v970_v60 = vrot.slane %v968_v5, 7  ;;  %2104 = vmatprep.mubr.bf16.mxu0 %v3167_v0  ;;  %v3174_v37 = vld [vmem:[#allocation2 + $0x20] ss:$36 sps:$4 sm:$0xff]  }
  0x74   : > { %v1155_v63 = vld [vmem:[#allocation2 + $0x10c] sm:$0xff]  ;;  %v966_v20 = vor.u32 %v964_v49, %v963_v56  ;;  %3023 = vmatprep.subr.bf16.mxu0 %v3172_v50  ;;  %1115 = vst [vmem:[#allocation2 + $0xd4] sm:$0xf] %v1107_v34  ;;  %3039 = vmatprep.subr.bf16.mxu1 %v3700_v10 }
  0x75   : > { %v3164_v2 = vld [vmem:[#allocation2 + $0xa8] ss:$36 sps:$4 sm:$0xff]   ;;  %v973_v4 = vor.u32 %v971_v54, %v970_v60  ;;  %v2532_v6 = vcombine.low %v1150_v58, %v1155_v63 }
  0x76   : > { %v1001_v33 = vsel %vm3387_vm5, %v966_v20, %v1000_v61  ;;  %3047 = vmatpush3.bf16.msra.mxu1 %v3700_v10 }
  0x77   : > { %1002 = vst [vmem:[#allocation2 + $0xf0] sm:$0xf] %v1001_v33  ;;  %v1004_v7 = vsel %vm3387_vm5, %v973_v4, %v1003_v1  ;;  %3024 = vmatpush3.bf16.msra.mxu0 %v3172_v50  ;;  %2162 = vmatmul.mubr.bf16.gmra.mrb[24].mxu1 %v3164_v2 }
  0x78   : > { %1005 = vst [vmem:[#allocation2 + $0x114] sm:$0xf] %v1004_v7  ;;  %3025 = vmatprep.subr.bf16.mxu0 %v3173_v62  ;;  %3040 = vmatprep.subr.bf16.mxu1 %v3722_v27  ;;  %v3169_v9 = vld [vmem:[#allocation2 + $0xf4] ss:$36 sps:$4 sm:$0xff]  }
  0x79   : > { %2105 = vmatmul.mubr.bf16.gmra.mrb[28].mxu0 %v2532_v6  ;;  %2169 = vmatprep.mubr.bf16.mxu1 %v3169_v9  ;;  %v3177_v28 = vld [vmem:[#allocation2 + $0xf8] ss:$36 sps:$4 sm:$0xff]  }
  0x7a   : > { %3027 = vmatprep.mubr.bf16.mxu0 %v3174_v37  ;;  %3048 = vmatpush3.bf16.msra.mxu1 %v3722_v27 }
  0x7b   : > { %3026 = vmatpush3.bf16.msra.mxu0 %v3173_v62  ;;  %v3175_v51 = vld [vmem:[#allocation2 + $0xb0] ss:$36 sps:$4 sm:$0xff]   ;;  %3041 = vmatprep.subr.bf16.mxu1 %v3172_v50 }
  0x7e   : > { %3049 = vmatpush3.bf16.msra.mxu1 %v3172_v50 }
  0x7f   : > { %v3171_v11 = vld [vmem:[#allocation2 + $0xf0] ss:$36 sps:$4 sm:$0xff]   ;;  %3042 = vmatprep.subr.bf16.mxu1 %v3173_v62 }
  0x80   : > { %2170 = vmatmul.mubr.bf16.gmra.mrb[28].mxu1 %v3171_v11 }
  0x81   : > { %3028 = vmatmul.mubr.bf16.vlgmr.msra.gmra.mrb[32].mxu0 %v3176_v8  ;;  %3031 = vmatprep.mubr.bf16.mxu1 %v3175_v51 }
  0x82   : > { %3050 = vmatpush3.bf16.msra.mxu1 %v3173_v62 }
  0x88   : > { %3032 = vmatmul.mubr.bf16.vlgmr.msra.gmra.mrb[32].mxu1 %v3177_v28 }
 0x100   : > { %v2855_v10 = vpop.f32.mrb[0].mxu0 }
 0x101   : > { %v2856_v12 = vpop.f32.mrb[1].mxu0 }
 0x102   : > { %v2857_v14 = vadd.f32 %v2856_v12, %v2855_v10  ;;  %v2858_v57 = vpop.f32.mrb[2].mxu0 }
 0x103   : > { %v2895_v13 = vpop.f32.mrb[0].mxu1  ;;  %v2859_v16 = vpop.f32.mrb[3].mxu0 }
 0x104   : > { %v2896_v15 = vpop.f32.mrb[1].mxu1  ;;  %v2860_v21 = vadd.f32 %v2859_v16, %v2858_v57 }
 0x105   : > { %v2897_v17 = vadd.f32 %v2896_v15, %v2895_v13  ;;  %v2898_v18 = vpop.f32.mrb[2].mxu1 }
 0x106   : > { %v2899_v22 = vpop.f32.mrb[3].mxu1 }
 0x107   : > { %v2018_v23 = vadd.f32 %v2897_v17, %v2857_v14  ;;  %v2900_v31 = vadd.f32 %v2899_v22, %v2898_v18 }
 0x109   : > { %v2021_v24 = vadd.f32 %v2900_v31, %v2860_v21 }
 0x10d   : > { %v2861_v25 = vpop.f32.mrb[4].mxu0 }
 0x10e   : > { %v2862_v26 = vpop.f32.mrb[5].mxu0 }
 0x10f   : > { %v2863_v27 = vadd.f32 %v2862_v26, %v2861_v25  ;;  %v2864_v59 = vpop.f32.mrb[6].mxu0 }
 0x110   : > { %v2865_v29 = vpop.f32.mrb[7].mxu0 }
 0x111   : > { %v2866_v30 = vadd.f32 %v2865_v29, %v2864_v59 }
 0x113   : > { %v2901_v32 = vpop.f32.mrb[4].mxu1 }
 0x114   : > { %v2902_v35 = vpop.f32.mrb[5].mxu1 }
 0x115   : > { %v2903_v36 = vadd.f32 %v2902_v35, %v2901_v32  ;;  %v2904_v38 = vpop.f32.mrb[6].mxu1 }
 0x116   : > { %v2905_v40 = vpop.f32.mrb[7].mxu1 }
 0x117   : > { %v2026_v41 = vadd.f32 %v2903_v36, %v2863_v27  ;;  %v2906_v42 = vadd.f32 %v2905_v40, %v2904_v38 }
 0x119   : > { %v2029_v43 = vadd.f32 %v2906_v42, %v2866_v30 }
 0x11b   : > { %v2867_v44 = vpop.f32.mrb[8].mxu0 }
 0x11c   : > { %v2868_v39 = vpop.f32.mrb[9].mxu0 }
 0x11d   : > { %v2869_v45 = vadd.f32 %v2868_v39, %v2867_v44  ;;  %v2870_v19 = vpop.f32.mrb[10].mxu0 }
 0x11e   : > { %v2871_v46 = vpop.f32.mrb[11].mxu0 }
 0x11f   : > { %v2872_v3 = vadd.f32 %v2871_v46, %v2870_v19 }
 0x121   : > { %v2907_v47 = vpop.f32.mrb[8].mxu1 }
 0x122   : > { %v2908_v48 = vpop.f32.mrb[9].mxu1 }
 0x123   : > { %v2909_v49 = vadd.f32 %v2908_v48, %v2907_v47  ;;  %v2910_v50 = vpop.f32.mrb[10].mxu1 }
 0x124   : > { %v2911_v52 = vpop.f32.mrb[11].mxu1 }
 0x125   : > { %v2034_v53 = vadd.f32 %v2909_v49, %v2869_v45  ;;  %v2912_v5 = vadd.f32 %v2911_v52, %v2910_v50 }
 0x127   : > { %v2037_v54 = vadd.f32 %v2912_v5, %v2872_v3 }
 0x129   : > { %v2873_v55 = vpop.f32.mrb[12].mxu0 }
 0x12a   : > { %v2874_v56 = vpop.f32.mrb[13].mxu0 }
 0x12b   : > { %v2875_v34 = vadd.f32 %v2874_v56, %v2873_v55  ;;  %v2876_v58 = vpop.f32.mrb[14].mxu0 }
 0x12c   : > { %v2877_v60 = vpop.f32.mrb[15].mxu0 }
 0x12d   : > { %v2878_v61 = vadd.f32 %v2877_v60, %v2876_v58 }
 0x130   : > { %v2913_v62 = vpop.f32.mrb[12].mxu1 }
 0x131   : > { %v2914_v63 = vpop.f32.mrb[13].mxu1  ;;  %v2935_v1 = vpop.f32.mrb[16].mxu0 }
 0x132   : > { %v2915_v0 = vadd.f32 %v2914_v63, %v2913_v62  ;;  %v2916_v20 = vpop.f32.mrb[14].mxu1  ;;  %v2936_v4 = vpop.f32.mrb[17].mxu0 }
 0x133   : > { %v2917_v2 = vpop.f32.mrb[15].mxu1  ;;  %v2937_v7 = vadd.f32 %v2936_v4, %v2935_v1  ;;  %v2938_v37 = vpop.f32.mrb[18].mxu0 }
 0x134   : > { %v2042_v33 = vadd.f32 %v2915_v0, %v2875_v34  ;;  %v2918_v6 = vadd.f32 %v2917_v2, %v2916_v20  ;;  %v2939_v51 = vpop.f32.mrb[19].mxu0 }
 0x135   : > { %v2083_v9 = vadd.f32 %v2937_v7, %v2018_v23  ;;  %v2940_v11 = vadd.f32 %v2939_v51, %v2938_v37 }
 0x136   : > { %v2045_v8 = vadd.f32 %v2918_v6, %v2878_v61 }
 0x137   : > { %v2086_v28 = vadd.f32 %v2940_v11, %v2021_v24 }
 0x138   : > { %v2975_v10 = vpop.f32.mrb[16].mxu1 }
 0x139   : > { %v2976_v12 = vpop.f32.mrb[17].mxu1 }
 0x13a   : > { %v2977_v14 = vadd.f32 %v2976_v12, %v2975_v10  ;;  %v2978_v57 = vpop.f32.mrb[18].mxu1 }
 0x13b   : > { %v2979_v16 = vpop.f32.mrb[19].mxu1 }
 0x13c   : > { %v2941_v13 = vpop.f32.mrb[20].mxu0  ;;  %v2980_v21 = vadd.f32 %v2979_v16, %v2978_v57  ;;  %v2148_v31 = vadd.f32 %v2977_v14, %v2083_v9 }
 0x13d   : > { %v2942_v15 = vpop.f32.mrb[21].mxu0 }
 0x13e   : > { %v2943_v17 = vadd.f32 %v2942_v15, %v2941_v13  ;;  %v2944_v18 = vpop.f32.mrb[22].mxu0  ;;  %v2151_v27 = vadd.f32 %v2980_v21, %v2086_v28 }
 0x13f   : > { %v2945_v22 = vpop.f32.mrb[23].mxu0 }
 0x140   : > { %v2091_v25 = vadd.f32 %v2943_v17, %v2026_v41  ;;  %v2946_v26 = vadd.f32 %v2945_v22, %v2944_v18 }
 0x142   : > { %v2094_v59 = vadd.f32 %v2946_v26, %v2029_v43  ;;  %v2981_v29 = vpop.f32.mrb[20].mxu1 }
 0x143   : > { %v2982_v23 = vpop.f32.mrb[21].mxu1 }
 0x144   : > { %v2947_v30 = vpop.f32.mrb[24].mxu0  ;;  %v2983_v24 = vadd.f32 %v2982_v23, %v2981_v29  ;;  %v2984_v32 = vpop.f32.mrb[22].mxu1 }
 0x145   : > { %v2948_v35 = vpop.f32.mrb[25].mxu0  ;;  %v2985_v36 = vpop.f32.mrb[23].mxu1 }
 0x146   : > { %v2949_v38 = vadd.f32 %v2948_v35, %v2947_v30  ;;  %v2950_v40 = vpop.f32.mrb[26].mxu0  ;;  %v2986_v42 = vadd.f32 %v2985_v36, %v2984_v32  ;;  %v2156_v39 = vadd.f32 %v2983_v24, %v2091_v25 }
 0x147   : > { %v2951_v44 = vpop.f32.mrb[27].mxu0 }
 0x148   : > { %v2099_v45 = vadd.f32 %v2949_v38, %v2034_v53  ;;  %v2952_v19 = vadd.f32 %v2951_v44, %v2950_v40  ;;  %v2159_v46 = vadd.f32 %v2986_v42, %v2094_v59 }
 0x14a   : > { %v2102_v3 = vadd.f32 %v2952_v19, %v2037_v54  ;;  %v2987_v41 = vpop.f32.mrb[24].mxu1 }
 0x14b   : > { %v2988_v47 = vpop.f32.mrb[25].mxu1 }
 0x14c   : > { %v2953_v48 = vpop.f32.mrb[28].mxu0  ;;  %v2989_v43 = vadd.f32 %v2988_v47, %v2987_v41  ;;  %v2990_v49 = vpop.f32.mrb[26].mxu1 }
 0x14d   : > { %v2954_v50 = vpop.f32.mrb[29].mxu0  ;;  %v2991_v52 = vpop.f32.mrb[27].mxu1 }
 0x14e   : > { %v2955_v5 = vadd.f32 %v2954_v50, %v2953_v48  ;;  %v2956_v55 = vpop.f32.mrb[30].mxu0  ;;  %v2992_v56 = vadd.f32 %v2991_v52, %v2990_v49  ;;  %v2164_v58 = vadd.f32 %v2989_v43, %v2099_v45 }
 0x14f   : > { %v2957_v34 = vpop.f32.mrb[31].mxu0 }
 0x150   : > { %v2107_v60 = vadd.f32 %v2955_v5, %v2042_v33  ;;  %v2958_v61 = vadd.f32 %v2957_v34, %v2956_v55  ;;  %v2167_v62 = vadd.f32 %v2992_v56, %v2102_v3 }
 0x152   : > { %v2110_v53 = vadd.f32 %v2958_v61, %v2045_v8 }
 0x153   : > { %v2993_v63 = vpop.f32.mrb[28].mxu1 }
 0x154   : > { %v3029_v0 = vpop.f32.mrb[32].mxu0  ;;  %v2994_v54 = vpop.f32.mrb[29].mxu1 }
 0x155   : > { %v2221_v20 = vadd.f32 %v3029_v0, %v2156_v39  ;;  %v2212_v1 = vpop.f32.mrb[33].mxu0  ;;  %v2995_v2 = vadd.f32 %v2994_v54, %v2993_v63  ;;  %v2996_v4 = vpop.f32.mrb[30].mxu1 }
 0x156   : > { %v2213_v6 = vadd.f32 %v2212_v1, %v2148_v31  ;;  %v3030_v7 = vpop.f32.mrb[34].mxu0  ;;  %v2997_v37 = vpop.f32.mrb[31].mxu1 }
 0x157   : > { %v2224_v51 = vadd.f32 %v3030_v7, %v2159_v46  ;;  %v2215_v9 = vpop.f32.mrb[35].mxu0  ;;  %v2998_v11 = vadd.f32 %v2997_v37, %v2996_v4  ;;  %v2172_v28 = vadd.f32 %v2995_v2, %v2107_v60  ;;  %v2299_v15 = vmul.f32 %v2221_v20, %v2221_v20 }
 0x158   : > { %v2216_v33 = vadd.f32 %v2215_v9, %v2151_v27  ;;  %v2297_v8 = vmul.f32 %v2213_v6, %v2213_v6 }
 0x159   : > { %v2792_v10 = vpack.c.bf16 %v2224_v51, %v2221_v20  ;;  %v2175_v12 = vadd.f32 %v2998_v11, %v2110_v53  ;;  %v2300_v25 = vmul.f32 %v2224_v51, %v2224_v51 }
 0x15a   : > { %v2787_v13 = vpack.c.bf16 %v2216_v33, %v2213_v6  ;;  %v2283_v14 = vadd.f32 %v2216_v33, %v2213_v6  ;;  %v2298_v57 = vmul.f32 %v2216_v33, %v2216_v33 }
 0x15b   : > { %2836 = vst [vmem:[%s3753_s21 + $0x8] sm:$0xff] %v2792_v10   ;;  %v3033_v16 = vpop.f32.mrb[32].mxu1 }
 0x15c   : > { %2788 = vst [vmem:[%s3753_s21] sm:$0xff] %v2787_v13   ;;  %v2284_v17 = vadd.f32 %v2283_v14, %v2221_v20  ;;  %v2305_v18 = vadd.f32 %v2298_v57, %v2297_v8  ;;  %v2237_v21 = vadd.f32 %v3033_v16, %v2172_v28  ;;  %v2228_v22 = vpop.f32.mrb[33].mxu1 }
 0x15d   : > { %v2229_v31 = vadd.f32 %v2228_v22, %v2164_v58  ;;  %v3034_v26 = vpop.f32.mrb[34].mxu1 }
 0x15e   : > { %v2306_v27 = vadd.f32 %v2305_v18, %v2299_v15  ;;  %v2285_v59 = vadd.f32 %v2284_v17, %v2224_v51  ;;  %v2240_v29 = vadd.f32 %v3034_v26, %v2175_v12  ;;  %v2231_v23 = vpop.f32.mrb[35].mxu1  ;;  %v2303_v39 = vmul.f32 %v2237_v21, %v2237_v21 }
 0x15f   : > { %v2301_v30 = vmul.f32 %v2229_v31, %v2229_v31  ;;  %v2232_v24 = vadd.f32 %v2231_v23, %v2167_v62 }
 0x160   : > { %v2286_v32 = vadd.f32 %v2285_v59, %v2229_v31  ;;  %v2307_v35 = vadd.f32 %v2306_v27, %v2300_v25  ;;  %v2802_v36 = vpack.c.bf16 %v2240_v29, %v2237_v21  ;;  %v2304_v46 = vmul.f32 %v2240_v29, %v2240_v29 }
 0x161   : > { %v2797_v38 = vpack.c.bf16 %v2232_v24, %v2229_v31  ;;  %v2302_v42 = vmul.f32 %v2232_v24, %v2232_v24 }
 0x162   : > { %v2287_v40 = vadd.f32 %v2286_v32, %v2232_v24  ;;  %v2308_v44 = vadd.f32 %v2307_v35, %v2301_v30  ;;  %2838 = vst [vmem:[%s3753_s21 + $0x18] sm:$0xff] %v2802_v36  }
 0x163   : > { %2837 = vst [vmem:[%s3753_s21 + $0x10] sm:$0xff] %v2797_v38  }
 0x164   : > { %v2288_v45 = vadd.f32 %v2287_v40, %v2237_v21  ;;  %v2309_v19 = vadd.f32 %v2308_v44, %v2302_v42 }
 0x166   : > { %v2289_v3 = vadd.f32 %v2288_v45, %v2240_v29  ;;  %v2310_v41 = vadd.f32 %v2309_v19, %v2303_v39 }
 0x168   : > { %v2290_v47 = vrot.slane %v2289_v3, 4  ;;  %v2311_v48 = vadd.f32 %v2310_v41, %v2304_v46 }
 0x16a   : > { %v2291_v43 = vadd.f32 %v2290_v47, %v2289_v3  ;;  %v2312_v49 = vrot.slane %v2311_v48, 4 }
 0x16c   : > { %v2292_v50 = vrot.slane %v2291_v43, 2  ;;  %v2313_v52 = vadd.f32 %v2312_v49, %v2311_v48 }
 0x16e   : > { %v2293_v5 = vadd.f32 %v2292_v50, %v2291_v43  ;;  %v2314_v55 = vrot.slane %v2313_v52, 2 }
 0x170   : > { %v2294_v56 = vrot.slane %v2293_v5, 1  ;;  %v2315_v34 = vadd.f32 %v2314_v55, %v2313_v52 }
 0x172   : > { %v2295_v58 = vadd.f32 %v2294_v56, %v2293_v5  ;;  %v2316_v60 = vrot.slane %v2315_v34, 1 }
 0x174   : > { %2296 = vst [vmem:[%s235_s25] sm:$0x1] %v2295_v58  ;;  %v2317_v61 = vadd.f32 %v2316_v60, %v2315_v34 }
 0x176   : > { %2318 = vst [vmem:[%s235_s25 + $0x1] sm:$0x1] %v2317_v61 }
 0x177 PF: > { %s16_s18 = sadd.s32 1, %s3186_s18  }
 0x178   : > { %p13_p4 = scmp.ge.s32.totalorder %s16_s18, 4  }
 0x17a   :  { %15 = sbr.rel (!%p13_p4) target bundleno = 1 (0x1), region = 82 }

// kernel: conv_stem_forward.7
= control target key start
LH: loop header
LB: loop body
LE: loop exit
PB: predicated region body
PF: predicated region fallthrough
CT: control target
= control target key end

     0   :  { %s2129_s18 = smov 0   ;;  %s2564_s0 = inlined_call_operand.vmem [shape: bf16[2,4,4,4,128], index: 0, kind: input, shape index: {}]   ;;  %s2565_s1 = inlined_call_operand.vmem [shape: f32[1,128], index: 1, kind: input, shape index: {}]   ;;  %s2566_s2 = inlined_call_operand.vmem [shape: f32[1,128], index: 2, kind: input, shape index: {}]   ;;  %s2567_s3 = inlined_call_operand.vmem [shape: bf16[1152,128], index: 3, kind: input, shape index: {}]   ;;  %s2568_s4 = inlined_call_operand.vmem [shape: bf16[2,16,128], index: 4, kind: output, shape index: {0}]   ;;  %s2569_s5 = inlined_call_operand.vmem [shape: f32[2,2,128], index: 5, kind: output, shape index: {1}]  }
   0x1 LB: > { %s1746_s19 = sadd.s32 4294967295, %s2093_s18   ;;  %p1750_p0 = scmp.ge.s32.totalorder %s2093_s18, 1  ;;  %s2093_s18 = sphi %s2129_s18, %s16_s18  }
   0x2   : > { %p190_p1 = scmp.lt.s32.totalorder %s2093_s18, 3 }
   0x4   : > { %p191_p2 = pnand %p1750_p0, %p190_p1 }
   0x5   : > { %v2001_v0 = vld [vmem:[%s2567_s3 + $0x40] sm:$0xff] (!%p191_p2)   ;;  %v2095_v3 = vmov (!%p191_p2), 0   ;;  %v2005_v5 = vld [vmem:[%s2567_s3 + $0x48] sm:$0xff] (!%p191_p2)   ;;  %v2009_v9 = vld [vmem:[%s2567_s3 + $0x50] sm:$0xff] (!%p191_p2)   ;;  %p222_p3 = scmp.lt.s32.totalorder (!%p191_p2), %s1746_s19, 1  ;;  %v292_v30 = vlaneseq (!%p191_p2)  ;;  %vm240_vm0 = vcmask (!%p191_p2), 1040384  }
   0x6   : > { %194 = sbr.rel (%p191_p2) target bundleno = 361 (0x169), region = 36  ;;  %v2002_v1 = vld [vmem:[%s2567_s3] sm:$0xff] (!%p191_p2)   ;;  %1872 = vmatprep.subr.bf16.mxu0 (!%p191_p2), %v2001_v0  ;;  %239 = vst [vmem:[#allocation2] sm:$0x3] (!%p191_p2), %v2095_v3  ;;  %347 = vst [vmem:[#allocation2 + $0x2] sm:$0x3] (!%p191_p2), %v2095_v3 }
   0x7   : > { %v2003_v2 = vld [vmem:[%s2567_s3 + $0xc0] sm:$0xff] (!%p191_p2)   ;;  %370 = vst [vmem:[#allocation2 + $0x4] sm:$0x3] (!%p191_p2), %v2095_v3  ;;  %1873 = vmatpush3.bf16.msra.mxu0 (!%p191_p2), %v2002_v1  ;;  %v2006_v6 = vld [vmem:[%s2567_s3 + $0x8] sm:$0xff] (!%p191_p2)   ;;  %v2010_v10 = vld [vmem:[%s2567_s3 + $0x10] sm:$0xff] (!%p191_p2)   ;;  %v293_v34 = vshrl.u32 (!%p191_p2), %v292_v30, 7 }
   0x8   : > { %v2004_v4 = vld [vmem:[%s2567_s3 + $0x80] sm:$0xff] (!%p191_p2)   ;;  %1894 = vmatprep.subr.bf16.mxu1 (!%p191_p2), %v2003_v2  ;;  %1874 = vmatprep.subr.bf16.mxu0 (!%p191_p2), %v2005_v5  ;;  %v2007_v7 = vld [vmem:[%s2567_s3 + $0xc8] sm:$0xff] (!%p191_p2)   ;;  %v2011_v11 = vld [vmem:[%s2567_s3 + $0xd0] sm:$0xff] (!%p191_p2)   ;;  %vm241_vm1 = vsmask.f32 (!%p191_p2), 256  ;;  %vm335_vm3 = vcmask (!%p191_p2), 1041408  }
   0x9   : > { %1895 = vmatpush3.bf16.msra.mxu1 (!%p191_p2), %v2004_v4  ;;  %v2008_v8 = vld [vmem:[%s2567_s3 + $0x88] sm:$0xff] (!%p191_p2)   ;;  %v2012_v12 = vld [vmem:[%s2567_s3 + $0x90] sm:$0xff] (!%p191_p2)   ;;  %v2013_v13 = vld [vmem:[%s2567_s3 + $0x58] sm:$0xff] (!%p191_p2)   ;;  %v2096_v43 = vmov (!%p191_p2), 1983009808   ;;  %vm2098_vm6 = vmmov (!%p191_p2), 0  }
   0xa   : > { %1896 = vmatprep.subr.bf16.mxu1 (!%p191_p2), %v2007_v7  ;;  %v2014_v14 = vld [vmem:[%s2567_s3 + $0x18] sm:$0xff] (!%p191_p2)   ;;  %v2017_v17 = vld [vmem:[%s2567_s3 + $0x60] sm:$0xff] (!%p191_p2)   ;;  %v2021_v21 = vld [vmem:[%s2567_s3 + $0x68] sm:$0xff] (!%p191_p2)   ;;  %v290_v44 = vunpack.c.l.s4 (!%p191_p2), %v2096_v43  ;;  %vm336_vm4 = vsmask.f32 (!%p191_p2), 7938 }
   0xb   : > { %1875 = vmatpush3.bf16.msra.mxu0 (!%p191_p2), %v2006_v6  ;;  %v2015_v15 = vld [vmem:[%s2567_s3 + $0xd8] sm:$0xff] (!%p191_p2)   ;;  %v2018_v18 = vld [vmem:[%s2567_s3 + $0x20] sm:$0xff] (!%p191_p2)   ;;  %v2022_v22 = vld [vmem:[%s2567_s3 + $0x28] sm:$0xff] (!%p191_p2)  }
   0xc   : > { %1876 = vmatprep.subr.bf16.mxu0 (!%p191_p2), %v2009_v9  ;;  %v2016_v16 = vld [vmem:[%s2567_s3 + $0x98] sm:$0xff] (!%p191_p2)   ;;  %v2019_v19 = vld [vmem:[%s2567_s3 + $0xe0] sm:$0xff] (!%p191_p2)   ;;  %v2023_v23 = vld [vmem:[%s2567_s3 + $0xe8] sm:$0xff] (!%p191_p2)   ;;  %v291_v52 = vunpack.c.0.s8 (!%p191_p2), %v290_v44 }
   0xd   : > { %1897 = vmatpush3.bf16.msra.mxu1 %v2008_v8  ;;  %v2020_v20 = vld [vmem:[%s2567_s3 + $0xa0] sm:$0xff]   ;;  %v2024_v24 = vld [vmem:[%s2567_s3 + $0xa8] sm:$0xff]   ;;  %v2025_v25 = vld [vmem:[%s2567_s3 + $0x70] sm:$0xff]   ;;  %s2575_s19 = smov (!%p222_p3, %s1746_s19), 1 }
   0xe   : > { %1898 = vmatprep.subr.bf16.mxu1 %v2011_v11  ;;  %v2026_v26 = vld [vmem:[%s2567_s3 + $0x30] sm:$0xff]   ;;  %v2029_v29 = vld [vmem:[%s2567_s3 + $0x78] sm:$0xff]   ;;  %s1863_s9 = sshll.u32 %s2575_s19, 5  ;;  %v2248_v35 = vld [vmem:[%s2565_s1] ss:$0 sm:$0xff]  ;;  %v2275_v61 = vsub.s32 %v291_v52, %v293_v34  ;;  %s1864_s11 = sshll.u32 %s2575_s19, 3 }
   0xf   : > { %1877 = vmatpush3.bf16.msra.mxu0 %v2010_v10  ;;  %v2027_v27 = vld [vmem:[%s2567_s3 + $0xf0] sm:$0xff]   ;;  %v2030_v31 = vld [vmem:[%s2567_s3 + $0x38] sm:$0xff]   ;;  %s2243_s16 = scalar_lea.vmem %s2564_s0, %s1863_s9  ;;  %vm2250_vm2 = vmand %vm240_vm0, %vm241_vm1  ;;  %s231_s13 = scalar_lea.vmem %s2568_s4, %s1864_s11 }
  0x10   : > { %1878 = vmatprep.subr.bf16.mxu0 %v2013_v13  ;;  %v2028_v28 = vld [vmem:[%s2567_s3 + $0xb0] sm:$0xff]   ;;  %v2031_v32 = vld [vmem:[%s2567_s3 + $0xf8] sm:$0xff]   ;;  %v243_v37 = vld [vmem:[#allocation2] sm:$0x1]  ;;  %s1755_s14 = sshll.u32 %s2575_s19, 1 }
  0x11   : > { %1899 = vmatpush3.bf16.msra.mxu1 %v2012_v12  ;;  %v2032_v33 = vld [vmem:[%s2567_s3 + $0xb8] sm:$0xff]   ;;  %v246_v38 = vld [vmem:[#allocation2 + $0x12] sm:$0x1]  ;;  %v244_v39 = vsel %vm2250_vm2, 0, %v243_v37  ;;  %v249_v41 = vld [vmem:[#allocation2 + $0x24] sm:$0x1]  ;;  %s235_s20 = scalar_lea.vmem %s2569_s5, %s1755_s14 }
  0x12   : > { %1900 = vmatprep.subr.bf16.mxu1 %v2015_v15  ;;  %v247_v40 = vsel %vm2250_vm2, 0, %v246_v38  ;;  %v252_v42 = vld [vmem:[#allocation2 + $0x36] sm:$0x1]  ;;  %245 = vst [vmem:[#allocation2] sm:$0x1] %v244_v39  ;;  %v250_v45 = vsel %vm2250_vm2, 0, %v249_v41  ;;  %vm2313_vm5 = vmand %vm335_vm3, %vm336_vm4 }
  0x13   : > { %1879 = vmatpush3.bf16.msra.mxu0 %v2014_v14  ;;  %248 = vst [vmem:[#allocation2 + $0x12] sm:$0x1] %v247_v40  ;;  %v253_v46 = vsel %vm2250_vm2, 0, %v252_v42  ;;  %v1756_v47 = vld [vmem:[%s2243_s16 + $0x18] sm:$0x3]  ;;  %v2041_v39 = vld [vmem:[%s2567_s3 + $0x1c0] sm:$0xff]  }
  0x14   : > { %1880 = vmatprep.subr.bf16.mxu0 %v2017_v17  ;;  %v1757_v48 = vld [vmem:[%s2243_s16 + $0x1a] sm:$0x3]  ;;  %251 = vst [vmem:[#allocation2 + $0x24] sm:$0x1] %v250_v45  ;;  %254 = vst [vmem:[#allocation2 + $0x36] sm:$0x1] %v253_v46  ;;  %v259_v50 = vunpack.c.l.bf16 %v1756_v47 }
  0x15   : > { %1901 = vmatpush3.bf16.msra.mxu1 %v2016_v16  ;;  %v1758_v49 = vld [vmem:[%s2243_s16 + $0x1c] sm:$0x3]  ;;  %v260_v51 = vunpack.c.l.bf16 %v1757_v48  ;;  %v1761_v53 = vld [vmem:[%s2243_s16 + $0x10] sm:$0x3]  ;;  %v2269_v54 = vld [vmem:[%s2566_s2] ss:$0 sm:$0xff] }
  0x16   : > { %1902 = vmatprep.subr.bf16.mxu1 %v2019_v19  ;;  %v261_v55 = vunpack.c.l.bf16 %v1758_v49  ;;  %v1762_v56 = vld [vmem:[%s2243_s16 + $0x12] sm:$0x3]  ;;  %v1763_v57 = vld [vmem:[%s2243_s16 + $0x14] sm:$0x3]  ;;  %v352_v58 = vunpack.c.l.bf16 %v1761_v53  ;;  %v268_v59 = vmul.f32 %v2248_v35, %v259_v50  ;;  %v1764_v63 = vld [vmem:[%s2243_s16 + $0x18] sm:$0x3] }
  0x17   : > { %1881 = vmatpush3.bf16.msra.mxu0 %v2018_v18  ;;  %v269_v60 = vmul.f32 %v2248_v35, %v260_v51  ;;  %v353_v62 = vunpack.c.l.bf16 %v1762_v56  ;;  %v1765_v0 = vld [vmem:[%s2243_s16 + $0x1a] sm:$0x3]  ;;  %v1766_v1 = vld [vmem:[%s2243_s16 + $0x1c] sm:$0x3]  ;;  %v354_v3 = vunpack.c.l.bf16 %v1763_v57  ;;  %v374_v5 = vunpack.c.l.bf16 %v1764_v63  ;;  %v395_v38 = vld [vmem:[#allocation2 + $0x18] sm:$0x1] }
  0x18   : > { %1882 = vmatprep.subr.bf16.mxu0 %v2021_v21  ;;  %v270_v2 = vmul.f32 %v2248_v35, %v261_v55  ;;  %v355_v4 = vmul.f32 %v2248_v35, %v352_v58  ;;  %v277_v6 = vadd.f32 %v2269_v54, %v268_v59  ;;  %v375_v9 = vunpack.c.l.bf16 %v1765_v0  ;;  %v398_v44 = vld [vmem:[#allocation2 + $0x2a] sm:$0x1]  ;;  %v401_v45 = vld [vmem:[#allocation2 + $0x3c] sm:$0x1]  ;;  %v1767_v50 = vld [vmem:[%s2243_s16 + $0x8] sm:$0x3] }
  0x19   : > { %1903 = vmatpush3.bf16.msra.mxu1 %v2020_v20  ;;  %v278_v7 = vadd.f32 %v2269_v54, %v269_v60  ;;  %v356_v8 = vmul.f32 %v2248_v35, %v353_v62  ;;  %v357_v11 = vmul.f32 %v2248_v35, %v354_v3  ;;  %v376_v13 = vunpack.c.l.bf16 %v1766_v1  ;;  %v1768_v51 = vld [vmem:[%s2243_s16 + $0xa] sm:$0x3]  ;;  %v1769_v52 = vld [vmem:[%s2243_s16 + $0xc] sm:$0x3]  ;;  %v1770_v60 = vld [vmem:[%s2243_s16 + $0xe] sm:$0x3] }
  0x1a   : > { %1904 = vmatprep.subr.bf16.mxu1 %v2023_v23  ;;  %v279_v10 = vadd.f32 %v2269_v54, %v270_v2  ;;  %v358_v12 = vadd.f32 %v2269_v54, %v355_v4  ;;  %v280_v14 = vmax.f32 %v277_v6, 0.0  ;;  %v377_v17 = vmul.f32 %v2248_v35, %v374_v5  ;;  %v338_v56 = vld [vmem:[#allocation2 + $0x12] sm:$0x3] }
  0x1b   : > { %1883 = vmatpush3.bf16.msra.mxu0 %v2022_v22  ;;  %v281_v15 = vmax.f32 %v278_v7, 0.0  ;;  %v359_v16 = vadd.f32 %v2269_v54, %v356_v8  ;;  %v360_v19 = vadd.f32 %v2269_v54, %v357_v11  ;;  %v378_v21 = vmul.f32 %v2248_v35, %v375_v9  ;;  %v341_v57 = vld [vmem:[#allocation2 + $0x24] sm:$0x3]  ;;  %v344_v0 = vld [vmem:[#allocation2 + $0x36] sm:$0x3] }
  0x1c   : > { %1884 = vmatprep.subr.bf16.mxu0 %v2025_v25  ;;  %v282_v18 = vmax.f32 %v279_v10, 0.0  ;;  %v361_v20 = vmax.f32 %v358_v12, 0.0  ;;  %v283_v22 = vpack.c.bf16 %v280_v14, %v280_v14  ;;  %v379_v25 = vmul.f32 %v2248_v35, %v376_v13 }
  0x1d   : > { %1905 = vmatpush3.bf16.msra.mxu1 %v2024_v24  ;;  %v284_v23 = vpack.c.bf16 %v281_v15, %v281_v15  ;;  %v362_v24 = vmax.f32 %v359_v16, 0.0  ;;  %v380_v30 = vadd.f32 %v2269_v54, %v377_v17  ;;  %v381_v37 = vadd.f32 %v2269_v54, %v378_v21 }
  0x1e   : > { %1906 = vmatprep.subr.bf16.mxu1 %v2027_v27  ;;  %v285_v27 = vpack.c.bf16 %v282_v18, %v282_v18  ;;  %v382_v42 = vadd.f32 %v2269_v54, %v379_v25  ;;  %v396_v7 = vsel %vm2250_vm2, 0, %v395_v38  ;;  %v399_v10 = vsel %vm2250_vm2, 0, %v398_v44 }
  0x1f   : > { %1885 = vmatpush3.bf16.msra.mxu0 %v2026_v26  ;;  %v2039_v26 = vld [vmem:[%s2567_s3 + $0x140] sm:$0xff]   ;;  %v365_v34 = vpack.c.bf16 %v362_v24, %v362_v24  ;;  %v383_v43 = vmax.f32 %v380_v30, 0.0  ;;  %v384_v58 = vmax.f32 %v381_v37, 0.0  ;;  %397 = vst [vmem:[#allocation2 + $0x18] sm:$0x1] %v396_v7  ;;  %v402_v11 = vsel %vm2250_vm2, 0, %v401_v45 }
  0x20   : > { %1886 = vmatprep.subr.bf16.mxu0 %v2029_v29  ;;  %v364_v29 = vpack.c.bf16 %v361_v20, %v361_v20  ;;  %v309_v40 = vrot.slane %v285_v27, %v2275_v61  ;;  %v385_v59 = vmax.f32 %v382_v42, 0.0  ;;  %400 = vst [vmem:[#allocation2 + $0x2a] sm:$0x1] %v399_v10  ;;  %403 = vst [vmem:[#allocation2 + $0x3c] sm:$0x1] %v402_v11  ;;  %v409_v13 = vunpack.c.l.bf16 %v1767_v50  ;;  %v2040_v11 = vld [vmem:[%s2567_s3 + $0x100] sm:$0xff]  }
  0x21   : > { %1907 = vmatpush3.bf16.msra.mxu1 %v2028_v28  ;;  %v363_v28 = vmax.f32 %v360_v19, 0.0  ;;  %368 = vst [vmem:[#allocation2 + $0x26] sm:$0x3] %v365_v34  ;;  %v386_v1 = vpack.c.bf16 %v383_v43, %v383_v43  ;;  %v387_v5 = vpack.c.bf16 %v384_v58, %v384_v58  ;;  %v410_v14 = vunpack.c.l.bf16 %v1768_v51 }
  0x22   : > { %1908 = vmatprep.subr.bf16.mxu1 %v2031_v32  ;;  %v295_v32 = vrot.slane %v283_v22, %v2275_v61  ;;  %367 = vst [vmem:[#allocation2 + $0x14] sm:$0x3] %v364_v29  ;;  %v325_v53 = vshrl.u32 %v309_v40, 16  ;;  %v328_v55 = vshll.u32 %v309_v40, 16  ;;  %v388_v6 = vpack.c.bf16 %v385_v59, %v385_v59 }
  0x23   : > { %1887 = vmatpush3.bf16.msra.mxu0 %v2030_v31  ;;  %v392_v31 = vld [vmem:[#allocation2 + $0x6] sm:$0x1]  ;;  %v366_v41 = vpack.c.bf16 %v363_v28, %v363_v28  ;;  %389 = vst [vmem:[#allocation2 + $0x16] sm:$0x3] %v386_v1  ;;  %390 = vst [vmem:[#allocation2 + $0x28] sm:$0x3] %v387_v5  ;;  %v411_v15 = vunpack.c.l.bf16 %v1769_v52  ;;  %v412_v18 = vunpack.c.l.bf16 %v1770_v60  ;;  %v413_v20 = vmul.f32 %v2248_v35, %v409_v13 }
  0x24   : > { %1916 = vmatprep.subr.bf16.mxu0 %v2039_v26  ;;  %v311_v46 = vshrl.u32 %v295_v32, 16  ;;  %v314_v47 = vshll.u32 %v295_v32, 16  ;;  %v393_v2 = vsel %vm2250_vm2, 0, %v392_v31  ;;  %v327_v3 = vrot.slane %v325_v53, 7  ;;  %391 = vst [vmem:[#allocation2 + $0x3a] sm:$0x3] %v388_v6 }
  0x25   : > { %1909 = vmatpush3.bf16.msra.mxu1 %v2032_v33  ;;  %v302_v33 = vrot.slane %v284_v23, %v2275_v61  ;;  %369 = vst [vmem:[#allocation2 + $0x38] sm:$0x3] %v366_v41  ;;  %394 = vst [vmem:[#allocation2 + $0x6] sm:$0x1] %v393_v2  ;;  %v414_v21 = vmul.f32 %v2248_v35, %v410_v14  ;;  %v415_v22 = vmul.f32 %v2248_v35, %v411_v15  ;;  %v506_v13 = vld [vmem:[%s2243_s16 + $0x2] sm:$0x3] }
  0x26   : > { %1938 = vmatprep.subr.bf16.mxu1 %v2041_v39  ;;  %v313_v62 = vrot.slane %v311_v46, 7  ;;  %v330_v12 = vor.u32 %v328_v55, %v327_v3  ;;  %v416_v23 = vmul.f32 %v2248_v35, %v412_v18  ;;  %v417_v24 = vadd.f32 %v2269_v54, %v413_v20  ;;  %v496_v51 = vld [vmem:[#allocation2 + $0x18] sm:$0x3]  ;;  %v1771_v20 = vld [vmem:[%s2243_s16 + $0x8] sm:$0x3] }
  0x27   : > { %v318_v48 = vshrl.u32 %v302_v33, 16  ;;  %v321_v49 = vshll.u32 %v302_v33, 16  ;;  %v418_v25 = vadd.f32 %v2269_v54, %v414_v21  ;;  %v419_v26 = vadd.f32 %v2269_v54, %v415_v22  ;;  %v499_v55 = vld [vmem:[#allocation2 + $0x2a] sm:$0x3]  ;;  %v502_v60 = vld [vmem:[#allocation2 + $0x3c] sm:$0x3] }
  0x28   : > { %v316_v8 = vor.u32 %v314_v47, %v313_v62  ;;  %v345_v19 = vsel %vm2313_vm5, %v330_v12, %v344_v0  ;;  %v420_v27 = vadd.f32 %v2269_v54, %v416_v23  ;;  %v421_v28 = vmax.f32 %v417_v24, 0.0  ;;  %v505_v12 = vld [vmem:[%s2243_s16] sm:$0x3] }
  0x29   : > { %v320_v63 = vrot.slane %v318_v48, 7  ;;  %346 = vst [vmem:[#allocation2 + $0x36] sm:$0x3] %v345_v19  ;;  %v422_v29 = vmax.f32 %v418_v25, 0.0  ;;  %v423_v30 = vmax.f32 %v419_v26, 0.0  ;;  %v509_v18 = vunpack.c.l.bf16 %v505_v12 }
  0x2a   : > { %v339_v16 = vsel %vm2313_vm5, %v316_v8, %v338_v56  ;;  %v424_v31 = vmax.f32 %v420_v27, 0.0  ;;  %v425_v32 = vpack.c.bf16 %v421_v28, %v421_v28  ;;  %v510_v19 = vunpack.c.l.bf16 %v506_v13  ;;  %v1772_v25 = vld [vmem:[%s2243_s16 + $0xa] sm:$0x3]  ;;  %v1773_v26 = vld [vmem:[%s2243_s16 + $0xc] sm:$0x3] }
  0x2b   : > { %v323_v9 = vor.u32 %v321_v49, %v320_v63  ;;  %340 = vst [vmem:[#allocation2 + $0x12] sm:$0x3] %v339_v16  ;;  %v426_v33 = vpack.c.bf16 %v422_v29, %v422_v29  ;;  %v427_v34 = vpack.c.bf16 %v423_v30, %v423_v30  ;;  %v507_v16 = vld [vmem:[%s2243_s16 + $0x4] sm:$0x3]  ;;  %v1774_v27 = vld [vmem:[%s2243_s16 + $0xe] sm:$0x3] }
  0x2c   : > { %v428_v37 = vpack.c.bf16 %v424_v31, %v424_v31  ;;  %v439_v38 = vrot.slane %v425_v32, %v2275_v61  ;;  %v493_v50 = vld [vmem:[#allocation2 + $0x6] sm:$0x3]  ;;  %v511_v23 = vunpack.c.l.bf16 %v507_v16  ;;  %v2043_v31 = vld [vmem:[%s2567_s3 + $0x148] sm:$0xff]   ;;  %v513_v32 = vmul.f32 %v2248_v35, %v509_v18  ;;  %v2053_v16 = vld [vmem:[%s2567_s3 + $0x1d8] sm:$0xff]  }
  0x2d   : > { %v342_v17 = vsel %vm2313_vm5, %v323_v9, %v341_v57  ;;  %v446_v39 = vrot.slane %v426_v33, %v2275_v61  ;;  %v453_v40 = vrot.slane %v427_v34, %v2275_v61  ;;  %v2042_v30 = vld [vmem:[%s2567_s3 + $0x180] sm:$0xff]   ;;  %v514_v33 = vmul.f32 %v2248_v35, %v510_v19  ;;  %v561_v34 = vld [vmem:[#allocation2 + $0xc] sm:$0x1] }
  0x2e   : > { %343 = vst [vmem:[#allocation2 + $0x24] sm:$0x3] %v342_v17  ;;  %v460_v41 = vrot.slane %v428_v37, %v2275_v61  ;;  %v462_v42 = vshrl.u32 %v439_v38, 16  ;;  %v465_v43 = vshll.u32 %v439_v38, 16  ;;  %v508_v17 = vld [vmem:[%s2243_s16 + $0x6] sm:$0x3]  ;;  %v515_v38 = vmul.f32 %v2248_v35, %v511_v23 }
  0x2f   : > { %v469_v44 = vshrl.u32 %v446_v39, 16  ;;  %v472_v45 = vshll.u32 %v446_v39, 16  ;;  %v476_v46 = vshrl.u32 %v453_v40, 16  ;;  %v479_v47 = vshll.u32 %v453_v40, 16  ;;  %v2045_v37 = vld [vmem:[%s2567_s3 + $0x1c8] sm:$0xff]  }
  0x30   : > { %v483_v48 = vshrl.u32 %v460_v41, 16  ;;  %v486_v49 = vshll.u32 %v460_v41, 16  ;;  %v464_v52 = vrot.slane %v462_v42, 7  ;;  %v512_v24 = vunpack.c.l.bf16 %v508_v17  ;;  %v2044_v42 = vld [vmem:[%s2567_s3 + $0x108] sm:$0xff]  }
  0x31   : > { %v471_v53 = vrot.slane %v469_v44, 7  ;;  %v478_v56 = vrot.slane %v476_v46, 7  ;;  %v537_v40 = vunpack.c.l.bf16 %v1771_v20  ;;  %v538_v41 = vunpack.c.l.bf16 %v1772_v25  ;;  %v2047_v44 = vld [vmem:[%s2567_s3 + $0x150] sm:$0xff]  }
  0x32   : > { %v485_v57 = vrot.slane %v483_v48, 7  ;;  %v467_v58 = vor.u32 %v465_v43, %v464_v52  ;;  %v2033_v5 = vld [vmem:[#allocation2] ss:$18 sps:$4 sm:$0xff]   ;;  %v516_v39 = vmul.f32 %v2248_v35, %v512_v24  ;;  %v2046_v43 = vld [vmem:[%s2567_s3 + $0x188] sm:$0xff]   ;;  %v518_v46 = vadd.f32 %v2269_v54, %v514_v33 }
  0x33   : > { %v474_v59 = vor.u32 %v472_v45, %v471_v53  ;;  %v481_v62 = vor.u32 %v479_v47, %v478_v56  ;;  %v907_v7 = vrot.slane %v2033_v5, %v2275_v61  ;;  %v517_v45 = vadd.f32 %v2269_v54, %v513_v32  ;;  %v567_v56 = vld [vmem:[#allocation2 + $0x30] sm:$0x1] }
  0x34   : > { %v488_v63 = vor.u32 %v486_v49, %v485_v57  ;;  %v494_v0 = vsel %vm2313_vm5, %v467_v58, %v493_v50  ;;  %v539_v47 = vunpack.c.l.bf16 %v1773_v26  ;;  %v540_v48 = vunpack.c.l.bf16 %v1774_v27  ;;  %v2049_v49 = vld [vmem:[%s2567_s3 + $0x1d0] sm:$0xff]  }
  0x35   : > { %v497_v1 = vsel %vm2313_vm5, %v474_v59, %v496_v51  ;;  %495 = vst [vmem:[#allocation2 + $0x6] sm:$0x3] %v494_v0  ;;  %v500_v2 = vsel %vm2313_vm5, %v481_v62, %v499_v55  ;;  %v2035_v6 = vld [vmem:[#allocation2 + $0x24] ss:$18 sps:$4 sm:$0xff]   ;;  %v519_v50 = vadd.f32 %v2269_v54, %v515_v38  ;;  %v520_v51 = vadd.f32 %v2269_v54, %v516_v39  ;;  %v564_v55 = vld [vmem:[#allocation2 + $0x1e] sm:$0x1] }
  0x36   : > { %498 = vst [vmem:[#allocation2 + $0x18] sm:$0x3] %v497_v1  ;;  %v503_v3 = vsel %vm2313_vm5, %v488_v63, %v502_v60  ;;  %501 = vst [vmem:[#allocation2 + $0x2a] sm:$0x3] %v500_v2  ;;  %v921_v10 = vrot.slane %v2035_v6, %v2275_v61  ;;  %v541_v52 = vmul.f32 %v2248_v35, %v537_v40  ;;  %v562_v53 = vsel %vm2250_vm2, 0, %v561_v34  ;;  %v2048_v0 = vld [vmem:[%s2567_s3 + $0x110] sm:$0xff]  }
  0x37   : > { %504 = vst [vmem:[#allocation2 + $0x3c] sm:$0x3] %v503_v3  ;;  %v521_v57 = vmax.f32 %v517_v45, 0.0  ;;  %v522_v58 = vmax.f32 %v518_v46, 0.0  ;;  %v542_v59 = vmul.f32 %v2248_v35, %v538_v41  ;;  %v543_v60 = vmul.f32 %v2248_v35, %v539_v47  ;;  %563 = vst [vmem:[#allocation2 + $0xc] sm:$0x1] %v562_v53 }
  0x38   : > { %v930_v21 = vcombine.high %v907_v7, %v921_v10  ;;  %v929_v22 = vcombine.low %v907_v7, %v921_v10  ;;  %v570_v62 = vld [vmem:[#allocation2 + $0x42] sm:$0x1]  ;;  %v1775_v63 = vld [vmem:[%s2243_s16 + $0x18] sm:$0x3]  ;;  %v523_v1 = vmax.f32 %v519_v50, 0.0  ;;  %v524_v2 = vmax.f32 %v520_v51, 0.0 }
  0x39   : > { %v544_v3 = vmul.f32 %v2248_v35, %v540_v48  ;;  %v545_v5 = vadd.f32 %v2269_v54, %v541_v52  ;;  %v1776_v6 = vld [vmem:[%s2243_s16 + $0x1a] sm:$0x3]  ;;  %v1777_v7 = vld [vmem:[%s2243_s16 + $0x1c] sm:$0x3]  ;;  %v525_v10 = vpack.c.bf16 %v521_v57, %v521_v57  ;;  %v546_v12 = vadd.f32 %v2269_v54, %v542_v59  ;;  %v2057_v48 = vld [vmem:[%s2567_s3 + $0x1e0] sm:$0xff]  }
  0x3a   : > { %1459 = vmatprep.mubr.bf16.mxu0 %v930_v21  ;;  %v547_v13 = vadd.f32 %v2269_v54, %v543_v60  ;;  %v527_v17 = vpack.c.bf16 %v523_v1, %v523_v1  ;;  %v528_v18 = vpack.c.bf16 %v524_v2, %v524_v2  ;;  %v1780_v21 = vld [vmem:[%s2243_s16 + $0x12] sm:$0x3]  ;;  %v565_v25 = vsel %vm2250_vm2, 0, %v564_v55  ;;  %v2052_v38 = vld [vmem:[%s2567_s3 + $0x118] sm:$0xff]   ;;  %v2059_v1 = vld [vmem:[%s2567_s3 + $0x168] sm:$0xff]  }
  0x3b   : > { %1460 = vmatmul.mubr.bf16.vlgmr.msra.gmra.mrb[0].mxu0 %v929_v22  ;;  %v548_v19 = vadd.f32 %v2269_v54, %v544_v3  ;;  %v549_v20 = vmax.f32 %v545_v5, 0.0  ;;  %v1781_v22 = vld [vmem:[%s2243_s16 + $0x14] sm:$0x3]  ;;  %529 = vst [vmem:[#allocation2 + $0x8] sm:$0x3] %v525_v10  ;;  %v550_v23 = vmax.f32 %v546_v12, 0.0  ;;  %v578_v34 = vunpack.c.l.bf16 %v1776_v6 }
  0x3c   : > { %1917 = vmatpush3.bf16.msra.mxu0 %v2040_v11  ;;  %v526_v11 = vpack.c.bf16 %v522_v58, %v522_v58  ;;  %v551_v24 = vmax.f32 %v547_v13, 0.0  ;;  %v568_v26 = vsel %vm2250_vm2, 0, %v567_v56  ;;  %531 = vst [vmem:[#allocation2 + $0x2c] sm:$0x3] %v527_v17  ;;  %532 = vst [vmem:[#allocation2 + $0x3e] sm:$0x3] %v528_v18  ;;  %v678_v46 = vunpack.c.l.bf16 %v1780_v21 }
  0x3d   : > { %v2037_v8 = vld [vmem:[#allocation2 + $0x4] ss:$18 sps:$4 sm:$0xff]   ;;  %1918 = vmatprep.subr.bf16.mxu0 %v2043_v31  ;;  %v552_v27 = vmax.f32 %v548_v19, 0.0  ;;  %566 = vst [vmem:[#allocation2 + $0x1e] sm:$0x1] %v565_v25  ;;  %v554_v32 = vpack.c.bf16 %v550_v23, %v550_v23  ;;  %v679_v47 = vunpack.c.l.bf16 %v1781_v22  ;;  %v2060_v17 = vld [vmem:[%s2567_s3 + $0x128] sm:$0xff]  }
  0x3e   : > { %v2038_v9 = vld [vmem:[#allocation2 + $0x28] ss:$18 sps:$4 sm:$0xff]   ;;  %v914_v14 = vrot.slane %v2037_v8, %v2275_v61  ;;  %v2050_v8 = vld [vmem:[%s2567_s3 + $0x190] sm:$0xff]   ;;  %530 = vst [vmem:[#allocation2 + $0x1a] sm:$0x3] %v526_v11  ;;  %v555_v33 = vpack.c.bf16 %v551_v24, %v551_v24  ;;  %v682_v56 = vmul.f32 %v2248_v35, %v678_v46  ;;  %v2056_v58 = vld [vmem:[%s2567_s3 + $0x120] sm:$0xff]  }
  0x3f   : > { %v928_v15 = vrot.slane %v2038_v9, %v2275_v61  ;;  %v2051_v9 = vld [vmem:[%s2567_s3 + $0x158] sm:$0xff]   ;;  %569 = vst [vmem:[#allocation2 + $0x30] sm:$0x1] %v568_v26  ;;  %v1782_v31 = vld [vmem:[%s2243_s16 + $0x16] sm:$0x3]  ;;  %v556_v40 = vpack.c.bf16 %v552_v27, %v552_v27  ;;  %v683_v57 = vmul.f32 %v2248_v35, %v679_v47  ;;  %v2062_v22 = vld [vmem:[%s2567_s3 + $0x1a8] sm:$0xff]  }
  0x40   : > { %1919 = vmatpush3.bf16.msra.mxu0 %v2044_v42  ;;  %v2054_v39 = vld [vmem:[%s2567_s3 + $0x198] sm:$0xff]   ;;  %558 = vst [vmem:[#allocation2 + $0x1c] sm:$0x3] %v554_v32  ;;  %559 = vst [vmem:[#allocation2 + $0x2e] sm:$0x3] %v555_v33  ;;  %v680_v51 = vunpack.c.l.bf16 %v1782_v31  ;;  %v686_v5 = vadd.f32 %v2269_v54, %v682_v56  ;;  %v2063_v23 = vld [vmem:[%s2567_s3 + $0x170] sm:$0xff]  }
  0x41   : > { %v932_v28 = vcombine.high %v914_v14, %v928_v15  ;;  %v931_v29 = vcombine.low %v914_v14, %v928_v15  ;;  %v1778_v14 = vld [vmem:[%s2243_s16 + $0x1e] sm:$0x3]  ;;  %v1779_v15 = vld [vmem:[%s2243_s16 + $0x10] sm:$0x3]  ;;  %1920 = vmatprep.subr.bf16.mxu0 %v2047_v44  ;;  %v582_v44 = vmul.f32 %v2248_v35, %v578_v34  ;;  %560 = vst [vmem:[#allocation2 + $0x40] sm:$0x3] %v556_v40 }
  0x42   : > { %v580_v36 = vunpack.c.l.bf16 %v1778_v14  ;;  %v677_v42 = vunpack.c.l.bf16 %v1779_v15  ;;  %v687_v6 = vadd.f32 %v2269_v54, %v683_v57  ;;  %v1783_v12 = vld [vmem:[%s2243_s16 + $0x18] sm:$0x3]  ;;  %v690_v15 = vmax.f32 %v686_v5, 0.0  ;;  %v2065_v24 = vld [vmem:[%s2567_s3 + $0x1f0] sm:$0xff]   ;;  %v1784_v33 = vld [vmem:[%s2243_s16 + $0x1a] sm:$0x3] }
  0x43   : > { %1500 = vmatprep.mubr.bf16.mxu1 %v932_v28  ;;  %v553_v28 = vpack.c.bf16 %v549_v20, %v549_v20  ;;  %v586_v53 = vadd.f32 %v2269_v54, %v582_v44  ;;  %v1785_v34 = vld [vmem:[%s2243_s16 + $0x1c] sm:$0x3]  ;;  %v2066_v46 = vld [vmem:[%s2567_s3 + $0x1b0] sm:$0xff]  }
  0x44   : > { %1501 = vmatmul.mubr.bf16.vlgmr.msra.gmra.mrb[0].mxu1 %v931_v29  ;;  %v571_v29 = vsel %vm2250_vm2, 0, %v570_v62  ;;  %1921 = vmatpush3.bf16.msra.mxu0 %v2048_v0  ;;  %v681_v52 = vmul.f32 %v2248_v35, %v677_v42  ;;  %v684_v62 = vmul.f32 %v2248_v35, %v680_v51  ;;  %v2058_v0 = vld [vmem:[%s2567_s3 + $0x1a0] sm:$0xff]   ;;  %v694_v27 = vpack.c.bf16 %v690_v15, %v690_v15  ;;  %v2067_v47 = vld [vmem:[%s2567_s3 + $0x178] sm:$0xff]  }
  0x45   : > { %1939 = vmatpush3.bf16.msra.mxu1 %v2042_v30  ;;  %v577_v30 = vunpack.c.l.bf16 %v1775_v63  ;;  %572 = vst [vmem:[#allocation2 + $0x42] sm:$0x1] %v571_v29  ;;  %557 = vst [vmem:[#allocation2 + $0xa] sm:$0x3] %v553_v28  ;;  %1922 = vmatprep.subr.bf16.mxu0 %v2051_v9  ;;  %v590_v2 = vmax.f32 %v586_v53, 0.0  ;;  %v705_v28 = vunpack.c.l.bf16 %v1783_v12  ;;  %v706_v51 = vunpack.c.l.bf16 %v1784_v33  ;;  %v2069_v53 = vld [vmem:[%s2567_s3 + $0x1f8] sm:$0xff]  }
  0x46   : > { %1940 = vmatprep.subr.bf16.mxu1 %v2045_v37  ;;  %v579_v37 = vunpack.c.l.bf16 %v1777_v7  ;;  %v685_v63 = vadd.f32 %v2269_v54, %v681_v52  ;;  %v2061_v7 = vld [vmem:[%s2567_s3 + $0x1e8] sm:$0xff]   ;;  %v688_v10 = vadd.f32 %v2269_v54, %v684_v62  ;;  %698 = vst [vmem:[#allocation2 + $0x20] sm:$0x3] %v694_v27  ;;  %v707_v52 = vunpack.c.l.bf16 %v1785_v34  ;;  %v664_v57 = vld [vmem:[#allocation2 + $0x1e] sm:$0x3] }
  0x47   : > { %v581_v41 = vmul.f32 %v2248_v35, %v577_v30  ;;  %v594_v13 = vpack.c.bf16 %v590_v2, %v590_v2 }
  0x48   : > { %v583_v45 = vmul.f32 %v2248_v35, %v579_v37  ;;  %1923 = vmatpush3.bf16.msra.mxu0 %v2052_v38  ;;  %v689_v11 = vmax.f32 %v685_v63, 0.0  ;;  %v692_v20 = vmax.f32 %v688_v10, 0.0  ;;  %v711_v2 = vmul.f32 %v2248_v35, %v707_v52 }
  0x49   : > { %1941 = vmatpush3.bf16.msra.mxu1 %v2046_v43  ;;  %v2055_v43 = vld [vmem:[%s2567_s3 + $0x160] sm:$0xff]   ;;  %v585_v50 = vadd.f32 %v2269_v54, %v581_v41  ;;  %v614_v25 = vrot.slane %v594_v13, %v2275_v61  ;;  %v2064_v41 = vld [vmem:[%s2567_s3 + $0x130] sm:$0xff]  }
  0x4a   : > { %1942 = vmatprep.subr.bf16.mxu1 %v2049_v49  ;;  %v584_v49 = vmul.f32 %v2248_v35, %v580_v36  ;;  %v587_v55 = vadd.f32 %v2269_v54, %v583_v45  ;;  %1924 = vmatprep.subr.bf16.mxu0 %v2055_v43  ;;  %v693_v21 = vpack.c.bf16 %v689_v11, %v689_v11  ;;  %v1786_v36 = vld [vmem:[%s2243_s16 + $0x1e] sm:$0x3] }
  0x4b   : > { %v589_v60 = vmax.f32 %v585_v50, 0.0  ;;  %v637_v37 = vshrl.u32 %v614_v25, 16  ;;  %v640_v38 = vshll.u32 %v614_v25, 16  ;;  %v696_v45 = vpack.c.bf16 %v692_v20, %v692_v20  ;;  %v661_v50 = vld [vmem:[#allocation2 + $0xc] sm:$0x3]  ;;  %v2074_v11 = vld [vmem:[%s2567_s3 + $0x1b8] sm:$0xff]  }
  0x4c   : > { %v588_v59 = vadd.f32 %v2269_v54, %v584_v49  ;;  %v591_v3 = vmax.f32 %v587_v55, 0.0  ;;  %1925 = vmatpush3.bf16.msra.mxu0 %v2056_v58  ;;  %697 = vst [vmem:[#allocation2 + $0xe] sm:$0x3] %v693_v21  ;;  %v667_v58 = vld [vmem:[#allocation2 + $0x30] sm:$0x3]  ;;  %v715_v13 = vadd.f32 %v2269_v54, %v711_v2  ;;  %v2097_v20 = vmov 0.0  }
  0x4d   : > { %1943 = vmatpush3.bf16.msra.mxu1 %v2050_v8  ;;  %v593_v9 = vpack.c.bf16 %v589_v60, %v589_v60  ;;  %1926 = vmatprep.subr.bf16.mxu0 %v2059_v1  ;;  %700 = vst [vmem:[#allocation2 + $0x44] sm:$0x3] %v696_v45  ;;  %v709_v60 = vmul.f32 %v2248_v35, %v705_v28  ;;  %v2070_v4 = vld [vmem:[#allocation2 + $0x8] ss:$18 sps:$4 sm:$0xff]  }
  0x4e   : > { %1944 = vmatprep.subr.bf16.mxu1 %v2053_v16  ;;  %v592_v8 = vmax.f32 %v588_v59, 0.0  ;;  %v595_v14 = vpack.c.bf16 %v591_v3, %v591_v3  ;;  %v691_v16 = vmax.f32 %v687_v6, 0.0  ;;  %v708_v59 = vunpack.c.l.bf16 %v1786_v36  ;;  %v2068_v3 = vld [vmem:[%s2567_s3 + $0x138] sm:$0xff]   ;;  %v2082_v36 = vld [vmem:[%s2567_s3 + $0x228] sm:$0xff]  }
  0x4f   : > { %v607_v19 = vrot.slane %v593_v9, %v2275_v61  ;;  %v710_v1 = vmul.f32 %v2248_v35, %v706_v51  ;;  %v943_v25 = vrot.slane %v2070_v4, %v2275_v61 }
  0x50   : > { %v596_v18 = vpack.c.bf16 %v592_v8, %v592_v8  ;;  %v621_v26 = vrot.slane %v595_v14, %v2275_v61  ;;  %v695_v32 = vpack.c.bf16 %v691_v16, %v691_v16  ;;  %1927 = vmatpush3.bf16.msra.mxu0 %v2060_v17  ;;  %v713_v8 = vadd.f32 %v2269_v54, %v709_v60 }
  0x51   : > { %1945 = vmatpush3.bf16.msra.mxu1 %v2054_v39  ;;  %v630_v30 = vshrl.u32 %v607_v19, 16  ;;  %v633_v31 = vshll.u32 %v607_v19, 16  ;;  %1928 = vmatprep.subr.bf16.mxu0 %v2063_v23  ;;  %v714_v12 = vadd.f32 %v2269_v54, %v710_v1  ;;  %v719_v17 = vmax.f32 %v715_v13, 0.0 }
  0x52   : > { %1946 = vmatprep.subr.bf16.mxu1 %v2057_v48  ;;  %v628_v29 = vrot.slane %v596_v18, %v2275_v61  ;;  %v644_v39 = vshrl.u32 %v621_v26, 16  ;;  %v647_v40 = vshll.u32 %v621_v26, 16  ;;  %699 = vst [vmem:[#allocation2 + $0x32] sm:$0x3] %v695_v32  ;;  %v639_v48 = vrot.slane %v637_v37, 7  ;;  %v2077_v32 = vld [vmem:[%s2567_s3 + $0x200] sm:$0xff]  }
  0x53   : > { %v632_v42 = vrot.slane %v630_v30, 7  ;;  %v717_v15 = vmax.f32 %v713_v8, 0.0  ;;  %v718_v16 = vmax.f32 %v714_v12, 0.0  ;;  %v2078_v37 = vld [vmem:[%s2567_s3 + $0x208] sm:$0xff]  }
  0x54   : > { %v651_v43 = vshrl.u32 %v628_v29, 16  ;;  %v654_v44 = vshll.u32 %v628_v29, 16  ;;  %v646_v49 = vrot.slane %v644_v39, 7  ;;  %v642_v62 = vor.u32 %v640_v38, %v639_v48  ;;  %1929 = vmatpush3.bf16.msra.mxu0 %v2064_v41  ;;  %v2079_v38 = vld [vmem:[%s2567_s3 + $0x210] sm:$0xff]   ;;  %v2080_v39 = vld [vmem:[%s2567_s3 + $0x218] sm:$0xff]  }
  0x55   : > { %1947 = vmatpush3.bf16.msra.mxu1 %v2058_v0  ;;  %v635_v55 = vor.u32 %v633_v31, %v632_v42  ;;  %v670_v0 = vld [vmem:[#allocation2 + $0x42] sm:$0x3]  ;;  %1930 = vmatprep.subr.bf16.mxu0 %v2067_v47  ;;  %v721_v19 = vpack.c.bf16 %v717_v15, %v717_v15  ;;  %v722_v21 = vpack.c.bf16 %v718_v16, %v718_v16 }
  0x56   : > { %1948 = vmatprep.subr.bf16.mxu1 %v2061_v7  ;;  %v653_v56 = vrot.slane %v651_v43, 7  ;;  %v649_v63 = vor.u32 %v647_v40, %v646_v49  ;;  %v712_v7 = vmul.f32 %v2248_v35, %v708_v59  ;;  %v665_v9 = vsel %vm2313_vm5, %v642_v62, %v664_v57  ;;  %v2081_v40 = vld [vmem:[%s2567_s3 + $0x220] sm:$0xff]   ;;  %v2083_v43 = vld [vmem:[%s2567_s3 + $0x230] sm:$0xff]  }
  0x57   : > { %v662_v6 = vsel %vm2313_vm5, %v635_v55, %v661_v50  ;;  %666 = vst [vmem:[#allocation2 + $0x1e] sm:$0x3] %v665_v9  ;;  %725 = vst [vmem:[#allocation2 + $0x10] sm:$0x3] %v721_v19 }
  0x58   : > { %v656_v5 = vor.u32 %v654_v44, %v653_v56  ;;  %663 = vst [vmem:[#allocation2 + $0xc] sm:$0x3] %v662_v6  ;;  %v668_v10 = vsel %vm2313_vm5, %v649_v63, %v667_v58  ;;  %v716_v14 = vadd.f32 %v2269_v54, %v712_v7  ;;  %1931 = vmatpush3.bf16.msra.mxu0 %v2068_v3  ;;  %726 = vst [vmem:[#allocation2 + $0x22] sm:$0x3] %v722_v21 }
  0x59   : > { %1949 = vmatpush3.bf16.msra.mxu1 %v2062_v22  ;;  %669 = vst [vmem:[#allocation2 + $0x30] sm:$0x3] %v668_v10  ;;  %1969 = vmatprep.subr.bf16.mxu0 %v2097_v20  ;;  %v723_v22 = vpack.c.bf16 %v719_v17, %v719_v17 }
  0x5a   : > { %1950 = vmatprep.subr.bf16.mxu1 %v2065_v24  ;;  %v671_v35 = vsel %vm2313_vm5, %v656_v5, %v670_v0  ;;  %v720_v18 = vmax.f32 %v716_v14, 0.0  ;;  %v2072_v24 = vld [vmem:[#allocation2 + $0x2c] ss:$18 sps:$4 sm:$0xff]  }
  0x5b   : > { %672 = vst [vmem:[#allocation2 + $0x42] sm:$0x3] %v671_v35  ;;  %727 = vst [vmem:[#allocation2 + $0x34] sm:$0x3] %v723_v22  ;;  %v957_v27 = vrot.slane %v2072_v24, %v2275_v61 }
  0x5c   : > { %v724_v23 = vpack.c.bf16 %v720_v18, %v720_v18 }
  0x5d   : > { %1951 = vmatpush3.bf16.msra.mxu1 %v2066_v46  ;;  %v966_v30 = vcombine.high %v943_v25, %v957_v27  ;;  %v965_v31 = vcombine.low %v943_v25, %v957_v27  ;;  %v2084_v46 = vld [vmem:[%s2567_s3 + $0x238] sm:$0xff]  }
  0x5e   : > { %1952 = vmatprep.subr.bf16.mxu1 %v2069_v53  ;;  %728 = vst [vmem:[#allocation2 + $0x46] sm:$0x3] %v724_v23 }
  0x5f   : > { %v2075_v54 = vld [vmem:[#allocation2 + $0xc] ss:$18 sps:$4 sm:$0xff]   ;;  %1541 = vmatprep.mubr.bf16.mxu0 %v966_v30  ;;  %v2085_v41 = vld [vmem:[#allocation2 + $0x10] ss:$18 sps:$4 sm:$0x33]  }
  0x60   : > { %v950_v28 = vrot.slane %v2075_v54, %v2275_v61  ;;  %1542 = vmatmul.mubr.bf16.vlgmr.msra.gmra.mrb[4].mxu0 %v965_v31  ;;  %v977_v44 = vrot.slane %v2085_v41, %v2275_v61 }
  0x61   : > { %1953 = vmatpush3.bf16.msra.mxu1 %v2074_v11  ;;  %1970 = vmatpush3.bf16.msra.mxu0 %v2077_v32 }
  0x62   : > { %v2076_v26 = vld [vmem:[#allocation2 + $0x30] ss:$18 sps:$4 sm:$0xff]   ;;  %1971 = vmatprep.subr.bf16.mxu0 %v2097_v20  ;;  %1985 = vmatprep.mubr.msk.bf16.mxu0 %vm2098_vm6, %v2097_v20 }
  0x63   : > { %v964_v29 = vrot.slane %v2076_v26, %v2275_v61 }
  0x65   : > { %v968_v33 = vcombine.high %v950_v28, %v964_v29  ;;  %v967_v34 = vcombine.low %v950_v28, %v964_v29  ;;  %1972 = vmatpush3.bf16.msra.mxu0 %v2078_v37  ;;  %v2086_v42 = vld [vmem:[#allocation2 + $0x34] ss:$18 sps:$4 sm:$0x33]  }
  0x66   : > { %1973 = vmatprep.subr.bf16.mxu0 %v2097_v20  ;;  %v984_v45 = vrot.slane %v2086_v42, %v2275_v61 }
  0x67   : > { %1582 = vmatprep.mubr.bf16.mxu1 %v968_v33 }
  0x68   : > { %1583 = vmatmul.mubr.bf16.vlgmr.msra.gmra.mrb[4].mxu1 %v967_v34  ;;  %v985_v47 = vcombine.low %v977_v44, %v984_v45 }
  0x69   : > { %1974 = vmatpush3.bf16.msra.mxu0 %v2079_v38 }
  0x6a   : > { %1975 = vmatprep.subr.bf16.mxu0 %v2097_v20 }
  0x6d   : > { %1976 = vmatpush3.bf16.msra.mxu0 %v2080_v39 }
  0x6e   : > { %1977 = vmatprep.subr.bf16.mxu0 %v2097_v20 }
  0x71   : > { %1978 = vmatpush3.bf16.msra.mxu0 %v2081_v40 }
  0x72   : > { %1979 = vmatprep.subr.bf16.mxu0 %v2097_v20 }
  0x75   : > { %1980 = vmatpush3.bf16.msra.mxu0 %v2082_v36 }
  0x76   : > { %1981 = vmatprep.subr.bf16.mxu0 %v2097_v20 }
  0x79   : > { %1982 = vmatpush3.bf16.msra.mxu0 %v2083_v43 }
  0x7a   : > { %1983 = vmatprep.subr.bf16.mxu0 %v2097_v20 }
  0x7d   : > { %1984 = vmatpush3.bf16.msra.mxu0 %v2084_v46 }
  0x80   : > { %1986 = vmatmul.mubr.bf16.vlgmr.msra.gmra.mrb[8].mxu0 %v985_v47 }
 0x10e   : > { %v1888_v48 = vpop.f32.mrb[0].mxu0 }
 0x10f   : > { %v1889_v50 = vpop.f32.mrb[1].mxu0 }
 0x110   : > { %v1890_v51 = vadd.f32 %v1889_v50, %v1888_v48  ;;  %v1891_v53 = vpop.f32.mrb[2].mxu0 }
 0x111   : > { %v1892_v57 = vpop.f32.mrb[3].mxu0 }
 0x112   : > { %v1893_v58 = vadd.f32 %v1892_v57, %v1891_v53 }
 0x117   : > { %v1910_v49 = vpop.f32.mrb[0].mxu1 }
 0x118   : > { %v1911_v52 = vpop.f32.mrb[1].mxu1 }
 0x119   : > { %v1912_v55 = vadd.f32 %v1911_v52, %v1910_v49  ;;  %v1913_v56 = vpop.f32.mrb[2].mxu1 }
 0x11a   : > { %v1914_v61 = vpop.f32.mrb[3].mxu1 }
 0x11b   : > { %v1503_v59 = vadd.f32 %v1912_v55, %v1890_v51  ;;  %v1915_v60 = vadd.f32 %v1914_v61, %v1913_v56 }
 0x11d   : > { %v1506_v62 = vadd.f32 %v1915_v60, %v1893_v58 }
 0x133   : > { %v1932_v63 = vpop.f32.mrb[4].mxu0 }
 0x134   : > { %v1933_v0 = vpop.f32.mrb[5].mxu0 }
 0x135   : > { %v1934_v2 = vadd.f32 %v1933_v0, %v1932_v63  ;;  %v1935_v3 = vpop.f32.mrb[6].mxu0 }
 0x136   : > { %v1936_v6 = vpop.f32.mrb[7].mxu0 }
 0x137   : > { %v1544_v9 = vadd.f32 %v1934_v2, %v1503_v59  ;;  %v1937_v10 = vadd.f32 %v1936_v6, %v1935_v3 }
 0x139   : > { %v1547_v35 = vadd.f32 %v1937_v10, %v1506_v62 }
 0x13b   : > { %v1954_v1 = vpop.f32.mrb[4].mxu1 }
 0x13c   : > { %v1955_v5 = vpop.f32.mrb[5].mxu1 }
 0x13d   : > { %v1956_v7 = vadd.f32 %v1955_v5, %v1954_v1  ;;  %v1957_v8 = vpop.f32.mrb[6].mxu1 }
 0x13e   : > { %v1958_v11 = vpop.f32.mrb[7].mxu1 }
 0x13f   : > { %v1959_v12 = vadd.f32 %v1958_v11, %v1957_v8  ;;  %v1585_v13 = vadd.f32 %v1956_v7, %v1544_v9 }
 0x141   : > { %v1588_v14 = vadd.f32 %v1959_v12, %v1547_v35 }
 0x153   : > { %v1625_v15 = vpop.f32.mrb[8].mxu0 }
 0x154   : > { %v1626_v16 = vadd.f32 %v1625_v15, %v1585_v13  ;;  %v1987_v17 = vpop.f32.mrb[9].mxu0 }
 0x155   : > { %v1628_v18 = vpop.f32.mrb[10].mxu0 }
 0x156   : > { %v1629_v19 = vadd.f32 %v1628_v18, %v1588_v14  ;;  %v1988_v20 = vpop.f32.mrb[11].mxu0  ;;  %v1650_v21 = vmul.f32 %v1626_v16, %v1626_v16 }
 0x158   : > { %v1870_v22 = vpack.c.bf16 %v1629_v19, %v1626_v16  ;;  %v1642_v23 = vadd.f32 %v1629_v19, %v1626_v16  ;;  %v1651_v4 = vmul.f32 %v1629_v19, %v1629_v19 }
 0x15a   : > { %1871 = vst [vmem:[%s231_s13] sm:$0xff] %v1870_v22   ;;  %v1643_v24 = vrot.slane %v1642_v23, 4  ;;  %v1652_v54 = vadd.f32 %v1651_v4, %v1650_v21 }
 0x15c   : > { %v1644_v25 = vadd.f32 %v1643_v24, %v1642_v23  ;;  %v1653_v26 = vrot.slane %v1652_v54, 4 }
 0x15e   : > { %v1645_v27 = vrot.slane %v1644_v25, 2  ;;  %v1654_v28 = vadd.f32 %v1653_v26, %v1652_v54 }
 0x160   : > { %v1646_v29 = vadd.f32 %v1645_v27, %v1644_v25  ;;  %v1655_v30 = vrot.slane %v1654_v28, 2 }
 0x162   : > { %v1647_v31 = vrot.slane %v1646_v29, 1  ;;  %v1656_v32 = vadd.f32 %v1655_v30, %v1654_v28 }
 0x164   : > { %v1648_v33 = vadd.f32 %v1647_v31, %v1646_v29  ;;  %v1657_v34 = vrot.slane %v1656_v32, 1 }
 0x166   : > { %1649 = vst [vmem:[%s235_s20] sm:$0x1] %v1648_v33  ;;  %v1658_v37 = vadd.f32 %v1657_v34, %v1656_v32 }
 0x168   : > { %1659 = vst [vmem:[%s235_s20 + $0x1] sm:$0x1] %v1658_v37 }
 0x169 PF: > { %s16_s18 = sadd.s32 1, %s2093_s18  }
 0x16a   : > { %p13_p4 = scmp.ge.s32.totalorder %s16_s18, 4  }
 0x16c   :  { %15 = sbr.rel (!%p13_p4) target bundleno = 1 (0x1), region = 82 }

// kernel: conv_stem_forward.8
= control target key start
LH: loop header
LB: loop body
LE: loop exit
PB: predicated region body
PF: predicated region fallthrough
CT: control target
= control target key end

     0   :  { %s1790_s18 = smov 0   ;;  %s2155_s0 = inlined_call_operand.vmem [shape: bf16[2,4,2,2,128], index: 0, kind: input, shape index: {}]   ;;  %s2156_s1 = inlined_call_operand.vmem [shape: f32[1,128], index: 1, kind: input, shape index: {}]   ;;  %s2157_s2 = inlined_call_operand.vmem [shape: f32[1,128], index: 2, kind: input, shape index: {}]   ;;  %s2158_s3 = inlined_call_operand.vmem [shape: bf16[1152,128], index: 3, kind: input, shape index: {}]   ;;  %s2159_s4 = inlined_call_operand.vmem [shape: bf16[2,4,128], index: 4, kind: output, shape index: {0}]   ;;  %s2160_s5 = inlined_call_operand.vmem [shape: f32[2,2,128], index: 5, kind: output, shape index: {1}]  }
   0x1 LB: > { %s1448_s19 = sadd.s32 4294967295, %s1754_s18   ;;  %p1452_p0 = scmp.ge.s32.totalorder %s1754_s18, 1  ;;  %s1754_s18 = sphi %s1790_s18, %s16_s18  }
   0x2   : > { %p189_p1 = scmp.lt.s32.totalorder %s1754_s18, 3 }
   0x4   : > { %p190_p2 = pnand %p1452_p0, %p189_p1 }
   0x5   : > { %v1672_v0 = vld [vmem:[%s2158_s3 + $0x40] sm:$0xff] (!%p190_p2)   ;;  %v1756_v3 = vmov (!%p190_p2), 0   ;;  %v1676_v5 = vld [vmem:[%s2158_s3 + $0x48] sm:$0xff] (!%p190_p2)   ;;  %v1680_v9 = vld [vmem:[%s2158_s3 + $0x50] sm:$0xff] (!%p190_p2)   ;;  %p219_p3 = scmp.lt.s32.totalorder (!%p190_p2), %s1448_s19, 1  ;;  %v255_v24 = vlaneseq (!%p190_p2)  ;;  %vm235_vm0 = vcmask (!%p190_p2), 1040384  }
   0x6   : > { %193 = sbr.rel (%p190_p2) target bundleno = 353 (0x161), region = 36  ;;  %v1673_v1 = vld [vmem:[%s2158_s3] sm:$0xff] (!%p190_p2)   ;;  %1543 = vmatprep.subr.bf16.mxu0 (!%p190_p2), %v1672_v0  ;;  %234 = vst [vmem:[#allocation2] sm:$0x1] (!%p190_p2), %v1756_v3  ;;  %276 = vst [vmem:[#allocation2 + $0x1] sm:$0x1] (!%p190_p2), %v1756_v3 }
   0x7   : > { %v1674_v2 = vld [vmem:[%s2158_s3 + $0xc0] sm:$0xff] (!%p190_p2)   ;;  %297 = vst [vmem:[#allocation2 + $0x2] sm:$0x1] (!%p190_p2), %v1756_v3  ;;  %1544 = vmatpush3.bf16.msra.mxu0 (!%p190_p2), %v1673_v1  ;;  %v1677_v6 = vld [vmem:[%s2158_s3 + $0x8] sm:$0xff] (!%p190_p2)   ;;  %v1681_v10 = vld [vmem:[%s2158_s3 + $0x10] sm:$0xff] (!%p190_p2)   ;;  %v256_v29 = vshrl.u32 (!%p190_p2), %v255_v24, 7 }
   0x8   : > { %v1675_v4 = vld [vmem:[%s2158_s3 + $0x80] sm:$0xff] (!%p190_p2)   ;;  %1565 = vmatprep.subr.bf16.mxu1 (!%p190_p2), %v1674_v2  ;;  %1545 = vmatprep.subr.bf16.mxu0 (!%p190_p2), %v1676_v5  ;;  %v1678_v7 = vld [vmem:[%s2158_s3 + $0xc8] sm:$0xff] (!%p190_p2)   ;;  %v1682_v11 = vld [vmem:[%s2158_s3 + $0xd0] sm:$0xff] (!%p190_p2)   ;;  %vm236_vm1 = vsmask.f32 (!%p190_p2), 256  ;;  %vm1759_vm5 = vmmov (!%p190_p2), 0  }
   0x9   : > { %1566 = vmatpush3.bf16.msra.mxu1 (!%p190_p2), %v1675_v4  ;;  %v1679_v8 = vld [vmem:[%s2158_s3 + $0x88] sm:$0xff] (!%p190_p2)   ;;  %v1683_v12 = vld [vmem:[%s2158_s3 + $0x90] sm:$0xff] (!%p190_p2)   ;;  %v1684_v13 = vld [vmem:[%s2158_s3 + $0x58] sm:$0xff] (!%p190_p2)   ;;  %v283_v34 = vsub.s32 (!%p190_p2), 0, %v256_v29  ;;  %v1757_v43 = vmov (!%p190_p2), 1966171168  }
   0xa   : > { %1567 = vmatprep.subr.bf16.mxu1 (!%p190_p2), %v1678_v7  ;;  %v1685_v14 = vld [vmem:[%s2158_s3 + $0x18] sm:$0xff] (!%p190_p2)   ;;  %v1688_v17 = vld [vmem:[%s2158_s3 + $0x60] sm:$0xff] (!%p190_p2)   ;;  %v1692_v21 = vld [vmem:[%s2158_s3 + $0x68] sm:$0xff] (!%p190_p2)   ;;  %v253_v44 = vunpack.c.l.s4 (!%p190_p2), %v1757_v43  ;;  %vm271_vm3 = vsmask.f32 (!%p190_p2), 7938  ;;  %vm1346_vm6 = vcmask (!%p190_p2), 1043456  }
   0xb   : > { %1546 = vmatpush3.bf16.msra.mxu0 (!%p190_p2), %v1677_v6  ;;  %v1686_v15 = vld [vmem:[%s2158_s3 + $0xd8] sm:$0xff] (!%p190_p2)   ;;  %v1689_v18 = vld [vmem:[%s2158_s3 + $0x20] sm:$0xff] (!%p190_p2)   ;;  %v1693_v22 = vld [vmem:[%s2158_s3 + $0x28] sm:$0xff] (!%p190_p2)  }
   0xc   : > { %1547 = vmatprep.subr.bf16.mxu0 (!%p190_p2), %v1680_v9  ;;  %v1687_v16 = vld [vmem:[%s2158_s3 + $0x98] sm:$0xff] (!%p190_p2)   ;;  %v1690_v19 = vld [vmem:[%s2158_s3 + $0xe0] sm:$0xff] (!%p190_p2)   ;;  %v1694_v23 = vld [vmem:[%s2158_s3 + $0xe8] sm:$0xff] (!%p190_p2)   ;;  %v254_v50 = vunpack.c.0.s8 (!%p190_p2), %v253_v44 }
   0xd   : > { %1568 = vmatpush3.bf16.msra.mxu1 %v1679_v8  ;;  %v1691_v20 = vld [vmem:[%s2158_s3 + $0xa0] sm:$0xff]   ;;  %v1695_v25 = vld [vmem:[%s2158_s3 + $0xa8] sm:$0xff]   ;;  %v1696_v26 = vld [vmem:[%s2158_s3 + $0x70] sm:$0xff]   ;;  %s2166_s19 = smov (!%p219_p3, %s1448_s19), 1 }
   0xe   : > { %1569 = vmatprep.subr.bf16.mxu1 %v1682_v11  ;;  %v1697_v27 = vld [vmem:[%s2158_s3 + $0x30] sm:$0xff]   ;;  %v1700_v31 = vld [vmem:[%s2158_s3 + $0x78] sm:$0xff]   ;;  %s1453_s7 = sshll.u32 %s2166_s19, 3  ;;  %v1909_v36 = vld [vmem:[%s2156_s1] sm:$0x1]  ;;  %v1942_v63 = vsub.s32 %v254_v50, %v256_v29  ;;  %s1454_s9 = sshll.u32 %s2166_s19, 1 }
   0xf   : > { %1548 = vmatpush3.bf16.msra.mxu0 %v1681_v10  ;;  %v1698_v28 = vld [vmem:[%s2158_s3 + $0xf0] sm:$0xff]   ;;  %v1701_v32 = vld [vmem:[%s2158_s3 + $0x38] sm:$0xff]   ;;  %s1904_s16 = scalar_lea.vmem %s2155_s0, %s1453_s7  ;;  %vm1912_vm2 = vmand %vm235_vm0, %vm236_vm1  ;;  %v1922_v45 = vrot.slane %v1909_v36, %v283_v34  ;;  %s226_s12 = scalar_lea.vmem %s2159_s4, %s1454_s9 }
  0x10   : > { %1549 = vmatprep.subr.bf16.mxu0 %v1684_v13  ;;  %v1699_v30 = vld [vmem:[%s2158_s3 + $0xb0] sm:$0xff]   ;;  %v1702_v33 = vld [vmem:[%s2158_s3 + $0xf8] sm:$0xff]   ;;  %v238_v38 = vld [vmem:[#allocation2] sm:$0x1]  ;;  %s230_s14 = scalar_lea.vmem %s2160_s5, %s1454_s9 }
  0x11   : > { %1570 = vmatpush3.bf16.msra.mxu1 %v1683_v12  ;;  %v1703_v35 = vld [vmem:[%s2158_s3 + $0xb8] sm:$0xff]   ;;  %v241_v39 = vld [vmem:[#allocation2 + $0x9] sm:$0x1]  ;;  %v239_v40 = vsel %vm1912_vm2, 0, %v238_v38  ;;  %v1456_v42 = vld [vmem:[%s1904_s16 + $0x6] sm:$0x1] }
  0x12   : > { %1571 = vmatprep.subr.bf16.mxu1 %v1686_v15  ;;  %v242_v41 = vsel %vm1912_vm2, 0, %v241_v39  ;;  %v1927_v46 = vld [vmem:[%s2157_s2] sm:$0x1]  ;;  %240 = vst [vmem:[#allocation2] sm:$0x1] %v239_v40  ;;  %v246_v47 = vunpack.c.l.bf16 %v1456_v42  ;;  %vm1980_vm4 = vmand %vm235_vm0, %vm271_vm3 }
  0x13   : > { %1550 = vmatpush3.bf16.msra.mxu0 %v1685_v14  ;;  %243 = vst [vmem:[#allocation2 + $0x9] sm:$0x1] %v242_v41  ;;  %v1457_v48 = vld [vmem:[%s1904_s16 + $0x4] sm:$0x1]  ;;  %v1458_v49 = vld [vmem:[%s1904_s16 + $0x6] sm:$0x1]  ;;  %v1932_v52 = vrot.slane %v1927_v46, %v283_v34 }
  0x14   : > { %1551 = vmatprep.subr.bf16.mxu0 %v1688_v17  ;;  %v279_v51 = vunpack.c.l.bf16 %v1457_v48  ;;  %v299_v53 = vunpack.c.l.bf16 %v1458_v49  ;;  %v305_v54 = vld [vmem:[#allocation2 + $0x3] sm:$0x1]  ;;  %v308_v55 = vld [vmem:[#allocation2 + $0xc] sm:$0x1]  ;;  %v1459_v56 = vld [vmem:[%s1904_s16 + $0x2] sm:$0x1]  ;;  %v247_v57 = vmul.f32 %v246_v47, %v1909_v36 }
  0x15   : > { %1572 = vmatpush3.bf16.msra.mxu1 %v1687_v16  ;;  %v306_v58 = vsel %vm1912_vm2, 0, %v305_v54  ;;  %v309_v59 = vsel %vm1912_vm2, 0, %v308_v55  ;;  %v1460_v60 = vld [vmem:[%s1904_s16 + $0x3] sm:$0x1]  ;;  %v314_v61 = vunpack.c.l.bf16 %v1459_v56  ;;  %v368_v62 = vld [vmem:[%s1904_s16] sm:$0x1] }
  0x16   : > { %1573 = vmatprep.subr.bf16.mxu1 %v1690_v19  ;;  %v286_v0 = vmul.f32 %v1922_v45, %v279_v51  ;;  %v300_v1 = vmul.f32 %v299_v53, %v1922_v45  ;;  %307 = vst [vmem:[#allocation2 + $0x3] sm:$0x1] %v306_v58  ;;  %310 = vst [vmem:[#allocation2 + $0xc] sm:$0x1] %v309_v59  ;;  %v315_v2 = vunpack.c.l.bf16 %v1460_v60  ;;  %v369_v3 = vld [vmem:[%s1904_s16 + $0x1] sm:$0x1]  ;;  %v370_v7 = vunpack.c.l.bf16 %v368_v62 }
  0x17   : > { %1552 = vmatpush3.bf16.msra.mxu0 %v1689_v18  ;;  %v1461_v4 = vld [vmem:[%s1904_s16 + $0x2] sm:$0x1]  ;;  %v248_v5 = vadd.f32 %v247_v57, %v1927_v46  ;;  %v316_v6 = vmul.f32 %v314_v61, %v1909_v36  ;;  %v371_v8 = vunpack.c.l.bf16 %v369_v3  ;;  %v1462_v9 = vld [vmem:[%s1904_s16 + $0x3] sm:$0x1]  ;;  %v1464_v41 = vld [vmem:[%s1904_s16 + $0x7] sm:$0x1] }
  0x18   : > { %1553 = vmatprep.subr.bf16.mxu0 %v1692_v21  ;;  %v293_v10 = vadd.f32 %v1932_v52, %v286_v0  ;;  %v301_v11 = vadd.f32 %v300_v1, %v1932_v52  ;;  %v317_v12 = vmul.f32 %v315_v2, %v1909_v36  ;;  %v384_v13 = vunpack.c.l.bf16 %v1461_v4  ;;  %v1707_v18 = vld [vmem:[%s2158_s3 + $0x140] sm:$0xff]  }
  0x19   : > { %1574 = vmatpush3.bf16.msra.mxu1 %v1691_v20  ;;  %v249_v14 = vmax.f32 %v248_v5, 0.0  ;;  %v318_v15 = vadd.f32 %v316_v6, %v1927_v46  ;;  %v372_v16 = vmul.f32 %v370_v7, %v1922_v45  ;;  %v373_v17 = vmul.f32 %v371_v8, %v1922_v45  ;;  %v1709_v34 = vld [vmem:[%s2158_s3 + $0x1c0] sm:$0xff]  }
  0x1a   : > { %1575 = vmatprep.subr.bf16.mxu1 %v1694_v23  ;;  %v294_v19 = vmax.f32 %v293_v10, 0.0  ;;  %v302_v20 = vmax.f32 %v301_v11, 0.0  ;;  %v319_v21 = vadd.f32 %v317_v12, %v1927_v46  ;;  %v396_v23 = vld [vmem:[#allocation2 + $0x6] sm:$0x1]  ;;  %v1465_v42 = vld [vmem:[%s1904_s16 + $0x4] sm:$0x1]  ;;  %v405_v3 = vunpack.c.l.bf16 %v1464_v41 }
  0x1b   : > { %1554 = vmatpush3.bf16.msra.mxu0 %v1693_v22  ;;  %v385_v22 = vunpack.c.l.bf16 %v1462_v9  ;;  %v250_v24 = vpack.c.bf16 %v249_v14, %v249_v14  ;;  %v397_v48 = vsel %vm1912_vm2, 0, %v396_v23  ;;  %v273_v50 = vld [vmem:[#allocation2 + $0x9] sm:$0x1]  ;;  %v1466_v55 = vld [vmem:[%s1904_s16 + $0x5] sm:$0x1]  ;;  %v460_v7 = vunpack.c.l.bf16 %v1465_v42 }
  0x1c   : > { %1555 = vmatprep.subr.bf16.mxu0 %v1696_v26  ;;  %v374_v26 = vadd.f32 %v372_v16, %v1932_v52  ;;  %v295_v29 = vpack.c.bf16 %v294_v19, %v294_v19  ;;  %398 = vst [vmem:[#allocation2 + $0x6] sm:$0x1] %v397_v48  ;;  %v407_v10 = vmul.f32 %v405_v3, %v1909_v36  ;;  %v1710_v56 = vld [vmem:[%s2158_s3 + $0x180] sm:$0xff]  }
  0x1d   : > { %1576 = vmatpush3.bf16.msra.mxu1 %v1695_v25  ;;  %v320_v25 = vmax.f32 %v318_v15, 0.0  ;;  %v387_v44 = vmul.f32 %v385_v22, %v1922_v45  ;;  %v362_v58 = vld [vmem:[#allocation2 + $0x3] sm:$0x1]  ;;  %v365_v1 = vld [vmem:[#allocation2 + $0xc] sm:$0x1]  ;;  %v462_v14 = vmul.f32 %v460_v7, %v1922_v45 }
  0x1e   : > { %1577 = vmatprep.subr.bf16.mxu1 %v1698_v28  ;;  %v399_v28 = vld [vmem:[#allocation2 + $0xf] sm:$0x1]  ;;  %v376_v39 = vmax.f32 %v374_v26, 0.0  ;;  %296 = vst [vmem:[#allocation2 + $0xa] sm:$0x1] %v295_v29 }
  0x1f   : > { %1556 = vmatpush3.bf16.msra.mxu0 %v1697_v27  ;;  %v375_v27 = vadd.f32 %v373_v17, %v1932_v52  ;;  %v322_v38 = vpack.c.bf16 %v320_v25, %v320_v25  ;;  %v389_v59 = vadd.f32 %v387_v44, %v1932_v52  ;;  %v400_v61 = vsel %vm1912_vm2, 0, %v399_v28 }
  0x20   : > { %1557 = vmatprep.subr.bf16.mxu0 %v1700_v31  ;;  %v321_v31 = vmax.f32 %v319_v21, 0.0  ;;  %v378_v53 = vpack.c.bf16 %v376_v39, %v376_v39  ;;  %401 = vst [vmem:[#allocation2 + $0xf] sm:$0x1] %v400_v61  ;;  %v409_v17 = vadd.f32 %v407_v10, %v1927_v46  ;;  %v464_v19 = vadd.f32 %v462_v14, %v1932_v52  ;;  %v1714_v61 = vld [vmem:[%s2158_s3 + $0x188] sm:$0xff]   ;;  %v1722_v14 = vld [vmem:[%s2158_s3 + $0x198] sm:$0xff]  }
  0x21   : > { %1578 = vmatpush3.bf16.msra.mxu1 %v1699_v30  ;;  %v303_v30 = vpack.c.bf16 %v302_v20, %v302_v20  ;;  %v377_v40 = vmax.f32 %v375_v27, 0.0  ;;  %v332_v51 = vrot.slane %v322_v38, %v1942_v63  ;;  %v391_v5 = vmax.f32 %v389_v59, 0.0  ;;  %v1712_v59 = vld [vmem:[%s2158_s3 + $0x108] sm:$0xff]  }
  0x22   : > { %1579 = vmatprep.subr.bf16.mxu1 %v1702_v33  ;;  %v1463_v33 = vld [vmem:[%s1904_s16 + $0x6] sm:$0x1]  ;;  %v323_v43 = vpack.c.bf16 %v321_v31, %v321_v31  ;;  %380 = vst [vmem:[#allocation2 + $0x4] sm:$0x1] %v378_v53  ;;  %v411_v21 = vmax.f32 %v409_v17, 0.0  ;;  %v466_v23 = vmax.f32 %v464_v19, 0.0 }
  0x23   : > { %1558 = vmatpush3.bf16.msra.mxu0 %v1701_v32  ;;  %v386_v32 = vmul.f32 %v384_v13, %v1922_v45  ;;  %304 = vst [vmem:[#allocation2 + $0xb] sm:$0x1] %v303_v30  ;;  %v379_v54 = vpack.c.bf16 %v377_v40, %v377_v40  ;;  %v339_v0 = vrot.slane %v332_v51, %v1942_v63  ;;  %v404_v2 = vunpack.c.l.bf16 %v1463_v33  ;;  %v1711_v53 = vld [vmem:[%s2158_s3 + $0x148] sm:$0xff]   ;;  %v1724_v17 = vld [vmem:[%s2158_s3 + $0x120] sm:$0xff]  }
  0x24   : > { %1587 = vmatprep.subr.bf16.mxu0 %v1707_v18  ;;  %v346_v57 = vrot.slane %v323_v43, %v1942_v63  ;;  %v393_v12 = vpack.c.bf16 %v391_v5, %v391_v5  ;;  %v461_v13 = vunpack.c.l.bf16 %v1466_v55  ;;  %v413_v25 = vpack.c.bf16 %v411_v21, %v411_v21  ;;  %v1719_v5 = vld [vmem:[%s2158_s3 + $0x158] sm:$0xff]   ;;  %v1729_v19 = vld [vmem:[%s2158_s3 + $0x1e8] sm:$0xff]   ;;  %v1731_v21 = vld [vmem:[%s2158_s3 + $0x170] sm:$0xff]  }
  0x25   : > { %1580 = vmatpush3.bf16.msra.mxu1 %v1703_v35  ;;  %v258_v35 = vrot.slane %v250_v24, %v1942_v63  ;;  %v388_v47 = vadd.f32 %v386_v32, %v1932_v52  ;;  %381 = vst [vmem:[#allocation2 + $0xd] sm:$0x1] %v379_v54  ;;  %v355_v9 = vshll.u32 %v339_v0, 16  ;;  %v406_v37 = vmul.f32 %v404_v2, %v1909_v36  ;;  %v452_v32 = vld [vmem:[#allocation2 + $0x6] sm:$0x1] }
  0x26   : > { %1609 = vmatprep.subr.bf16.mxu1 %v1709_v34  ;;  %v353_v4 = vrot.slane %v346_v57, %v1942_v63  ;;  %395 = vst [vmem:[#allocation2 + $0xe] sm:$0x1] %v393_v12  ;;  %v463_v36 = vmul.f32 %v461_v13, %v1922_v45  ;;  %v468_v27 = vpack.c.bf16 %v466_v23, %v466_v23  ;;  %v1713_v57 = vld [vmem:[%s2158_s3 + $0x1c8] sm:$0xff]   ;;  %v1468_v0 = vld [vmem:[%s1904_s16 + $0x7] sm:$0x1]  ;;  %v1733_v23 = vld [vmem:[%s2158_s3 + $0x1f0] sm:$0xff]  }
  0x27   : > { %v265_v49 = vrot.slane %v258_v35, %v1942_v63  ;;  %v390_v60 = vmax.f32 %v388_v47, 0.0  ;;  %v363_v15 = vsel %vm1980_vm4, %v355_v9, %v362_v58  ;;  %v408_v16 = vadd.f32 %v406_v37, %v1927_v46  ;;  %v455_v33 = vld [vmem:[#allocation2 + $0xf] sm:$0x1]  ;;  %v1721_v9 = vld [vmem:[%s2158_s3 + $0x1d8] sm:$0xff]  }
  0x28   : > { %v358_v11 = vshll.u32 %v353_v4, 16  ;;  %364 = vst [vmem:[#allocation2 + $0x3] sm:$0x1] %v363_v15  ;;  %v465_v22 = vadd.f32 %v463_v36, %v1932_v52  ;;  %v436_v28 = vrot.slane %v413_v25, %v1942_v63  ;;  %470 = vst [vmem:[#allocation2 + $0x7] sm:$0x1] %v468_v27  ;;  %v475_v3 = vunpack.c.l.bf16 %v1468_v0  ;;  %v1716_v4 = vld [vmem:[%s2158_s3 + $0x110] sm:$0xff]  }
  0x29   : > { %v267_v62 = vshll.u32 %v265_v49, 16  ;;  %v392_v6 = vpack.c.bf16 %v390_v60, %v390_v60  ;;  %v410_v20 = vmax.f32 %v408_v16, 0.0  ;;  %v1715_v60 = vld [vmem:[%s2158_s3 + $0x150] sm:$0xff]   ;;  %v1726_v36 = vld [vmem:[%s2158_s3 + $0x1a0] sm:$0xff]   ;;  %v1735_v25 = vld [vmem:[%s2158_s3 + $0x178] sm:$0xff]  }
  0x2a   : > { %v366_v18 = vsel %vm1980_vm4, %v358_v11, %v365_v1  ;;  %v467_v26 = vmax.f32 %v465_v22, 0.0  ;;  %v443_v31 = vrot.slane %v436_v28, %v1942_v63  ;;  %v1717_v1 = vld [vmem:[%s2158_s3 + $0x1d0] sm:$0xff]   ;;  %v477_v7 = vmul.f32 %v475_v3, %v1922_v45  ;;  %v1720_v11 = vld [vmem:[%s2158_s3 + $0x118] sm:$0xff]   ;;  %v1730_v22 = vld [vmem:[%s2158_s3 + $0x1a8] sm:$0xff]  }
  0x2b   : > { %v274_v8 = vsel %vm1980_vm4, %v267_v62, %v273_v50  ;;  %394 = vst [vmem:[#allocation2 + $0x5] sm:$0x1] %v392_v6  ;;  %367 = vst [vmem:[#allocation2 + $0xc] sm:$0x1] %v366_v18  ;;  %v412_v24 = vpack.c.bf16 %v410_v20, %v410_v20  ;;  %v1708_v50 = vld [vmem:[%s2158_s3 + $0x100] sm:$0xff]   ;;  %v1727_v18 = vld [vmem:[%s2158_s3 + $0x168] sm:$0xff]  }
  0x2c   : > { %275 = vst [vmem:[#allocation2 + $0x9] sm:$0x1] %v274_v8  ;;  %v469_v29 = vpack.c.bf16 %v467_v26, %v467_v26  ;;  %v448_v35 = vshll.u32 %v443_v31, 16  ;;  %v1467_v62 = vld [vmem:[%s1904_s16 + $0x6] sm:$0x1]  ;;  %v1718_v8 = vld [vmem:[%s2158_s3 + $0x190] sm:$0xff]   ;;  %v479_v10 = vadd.f32 %v477_v7, %v1932_v52 }
  0x2d   : > { %v422_v46 = vrot.slane %v412_v24, %v1942_v63  ;;  %v474_v2 = vunpack.c.l.bf16 %v1467_v62  ;;  %v1728_v20 = vld [vmem:[%s2158_s3 + $0x128] sm:$0xff]   ;;  %v1732_v24 = vld [vmem:[%s2158_s3 + $0x130] sm:$0xff]   ;;  %v1737_v27 = vld [vmem:[%s2158_s3 + $0x1f8] sm:$0xff]   ;;  %v1758_v31 = vmov 0.0  }
  0x2e   : > { %471 = vst [vmem:[#allocation2 + $0x10] sm:$0x1] %v469_v29  ;;  %v456_v39 = vsel %vm1980_vm4, %v448_v35, %v455_v33  ;;  %v481_v13 = vmax.f32 %v479_v10, 0.0  ;;  %v1734_v26 = vld [vmem:[%s2158_s3 + $0x1b0] sm:$0xff]   ;;  %v1738_v29 = vld [vmem:[%s2158_s3 + $0x1b8] sm:$0xff]   ;;  %v1740_v33 = vld [vmem:[%s2158_s3 + $0x208] sm:$0xff]  }
  0x2f   : > { %v429_v30 = vrot.slane %v422_v46, %v1942_v63  ;;  %457 = vst [vmem:[#allocation2 + $0xf] sm:$0x1] %v456_v39  ;;  %v476_v6 = vmul.f32 %v474_v2, %v1922_v45  ;;  %v1723_v45 = vld [vmem:[%s2158_s3 + $0x160] sm:$0xff]   ;;  %v1736_v46 = vld [vmem:[%s2158_s3 + $0x138] sm:$0xff]   ;;  %v1744_v39 = vld [vmem:[%s2158_s3 + $0x228] sm:$0xff]  }
  0x30   : > { %v483_v16 = vpack.c.bf16 %v481_v13, %v481_v13  ;;  %v1742_v35 = vld [vmem:[%s2158_s3 + $0x218] sm:$0xff]  }
  0x31   : > { %v445_v34 = vshll.u32 %v429_v30, 16  ;;  %v478_v37 = vadd.f32 %v476_v6, %v1932_v52  ;;  %v1725_v52 = vld [vmem:[%s2158_s3 + $0x1e0] sm:$0xff]  }
  0x32   : > { %485 = vst [vmem:[#allocation2 + $0x11] sm:$0x1] %v483_v16  ;;  %v1739_v30 = vld [vmem:[%s2158_s3 + $0x200] sm:$0xff]  }
  0x33   : > { %v453_v38 = vsel %vm1980_vm4, %v445_v34, %v452_v32  ;;  %v1704_v40 = vld [vmem:[#allocation2] ss:$9 sps:$4 sm:$0xff]   ;;  %v480_v12 = vmax.f32 %v478_v37, 0.0  ;;  %v1741_v34 = vld [vmem:[%s2158_s3 + $0x210] sm:$0xff]  }
  0x34   : > { %454 = vst [vmem:[#allocation2 + $0x6] sm:$0x1] %v453_v38  ;;  %v646_v42 = vrot.slane %v1704_v40, %v1942_v63  ;;  %v1743_v38 = vld [vmem:[%s2158_s3 + $0x220] sm:$0xff]  }
  0x35   : > { %v482_v15 = vpack.c.bf16 %v480_v12, %v480_v12 }
  0x36   : > { %v654_v44 = vcombine.high %v646_v42, %v646_v42  ;;  %v662_v47 = vrot.slane %v646_v42, %v1942_v63 }
  0x37   : > { %484 = vst [vmem:[#allocation2 + $0x8] sm:$0x1] %v482_v15 }
  0x38   : > { %v676_v49 = vrot.slane %v654_v44, %v1942_v63  ;;  %v684_v51 = vcombine.high %v662_v47, %v662_v47 }
  0x3a   : > { %1176 = vmatprep.mubr.bf16.mxu0 %v676_v49  ;;  %v686_v55 = vcombine.high %v676_v49, %v676_v49 }
  0x3b   : > { %v1706_v41 = vld [vmem:[#allocation2 + $0x4] ss:$9 sps:$4 sm:$0xff]   ;;  %1177 = vmatmul.mubr.bf16.vlgmr.msra.gmra.mrb[0].mxu0 %v662_v47 }
  0x3c   : > { %v2014_v43 = vrot.slane %v1706_v41, %v1942_v63  ;;  %1588 = vmatpush3.bf16.msra.mxu0 %v1708_v50  ;;  %1216 = vmatprep.mubr.bf16.mxu1 %v686_v55  ;;  %v1745_v41 = vld [vmem:[%s2158_s3 + $0x230] sm:$0xff]  }
  0x3d   : > { %1217 = vmatmul.mubr.bf16.vlgmr.msra.gmra.mrb[0].mxu1 %v684_v51  ;;  %1589 = vmatprep.subr.bf16.mxu0 %v1711_v53 }
  0x3e   : > { %v655_v48 = vcombine.high %v2014_v43, %v2014_v43  ;;  %1610 = vmatpush3.bf16.msra.mxu1 %v1710_v56  ;;  %v669_v28 = vrot.slane %v2014_v43, %v1942_v63  ;;  %v1747_v40 = vld [vmem:[#allocation2 + $0x8] ss:$9 sps:$4 sm:$0x11]   ;;  %v1746_v43 = vld [vmem:[%s2158_s3 + $0x238] sm:$0xff]  }
  0x3f   : > { %1611 = vmatprep.subr.bf16.mxu1 %v1713_v57  ;;  %v695_v42 = vrot.slane %v1747_v40, %v1942_v63 }
  0x40   : > { %v683_v54 = vrot.slane %v655_v48, %v1942_v63  ;;  %1590 = vmatpush3.bf16.msra.mxu0 %v1712_v59  ;;  %v685_v32 = vcombine.high %v669_v28, %v669_v28 }
  0x41   : > { %1591 = vmatprep.subr.bf16.mxu0 %v1715_v60  ;;  %v702_v44 = vrot.slane %v695_v42, %v1942_v63 }
  0x42   : > { %v687_v58 = vcombine.high %v683_v54, %v683_v54  ;;  %1256 = vmatprep.mubr.bf16.mxu0 %v683_v54  ;;  %1612 = vmatpush3.bf16.msra.mxu1 %v1714_v61 }
  0x43   : > { %1613 = vmatprep.subr.bf16.mxu1 %v1717_v1 }
  0x44   : > { %1296 = vmatprep.mubr.bf16.mxu1 %v687_v58  ;;  %1592 = vmatpush3.bf16.msra.mxu0 %v1716_v4 }
  0x45   : > { %1593 = vmatprep.subr.bf16.mxu0 %v1719_v5 }
  0x46   : > { %1614 = vmatpush3.bf16.msra.mxu1 %v1718_v8 }
  0x47   : > { %1615 = vmatprep.subr.bf16.mxu1 %v1721_v9 }
  0x48   : > { %1594 = vmatpush3.bf16.msra.mxu0 %v1720_v11 }
  0x49   : > { %1595 = vmatprep.subr.bf16.mxu0 %v1723_v45 }
  0x4a   : > { %1616 = vmatpush3.bf16.msra.mxu1 %v1722_v14 }
  0x4b   : > { %1617 = vmatprep.subr.bf16.mxu1 %v1725_v52 }
  0x4c   : > { %1596 = vmatpush3.bf16.msra.mxu0 %v1724_v17 }
  0x4d   : > { %1597 = vmatprep.subr.bf16.mxu0 %v1727_v18 }
  0x4e   : > { %1618 = vmatpush3.bf16.msra.mxu1 %v1726_v36 }
  0x4f   : > { %1619 = vmatprep.subr.bf16.mxu1 %v1729_v19 }
  0x50   : > { %1598 = vmatpush3.bf16.msra.mxu0 %v1728_v20 }
  0x51   : > { %1599 = vmatprep.subr.bf16.mxu0 %v1731_v21 }
  0x52   : > { %1620 = vmatpush3.bf16.msra.mxu1 %v1730_v22 }
  0x53   : > { %1621 = vmatprep.subr.bf16.mxu1 %v1733_v23 }
  0x54   : > { %1600 = vmatpush3.bf16.msra.mxu0 %v1732_v24 }
  0x55   : > { %1601 = vmatprep.subr.bf16.mxu0 %v1735_v25 }
  0x56   : > { %1622 = vmatpush3.bf16.msra.mxu1 %v1734_v26 }
  0x57   : > { %1623 = vmatprep.subr.bf16.mxu1 %v1737_v27 }
  0x58   : > { %1602 = vmatpush3.bf16.msra.mxu0 %v1736_v46 }
  0x59   : > { %1640 = vmatprep.subr.bf16.mxu0 %v1758_v31 }
  0x5a   : > { %1624 = vmatpush3.bf16.msra.mxu1 %v1738_v29 }
  0x5b   : > { %1257 = vmatmul.mubr.bf16.vlgmr.msra.gmra.mrb[4].mxu0 %v669_v28 }
  0x5c   : > { %1641 = vmatpush3.bf16.msra.mxu0 %v1739_v30  ;;  %1656 = vmatprep.mubr.msk.bf16.mxu0 %vm1759_vm5, %v1758_v31 }
  0x5d   : > { %1297 = vmatmul.mubr.bf16.vlgmr.msra.gmra.mrb[4].mxu1 %v685_v32  ;;  %1642 = vmatprep.subr.bf16.mxu0 %v1758_v31 }
  0x60   : > { %1643 = vmatpush3.bf16.msra.mxu0 %v1740_v33 }
  0x61   : > { %1644 = vmatprep.subr.bf16.mxu0 %v1758_v31 }
  0x64   : > { %1645 = vmatpush3.bf16.msra.mxu0 %v1741_v34 }
  0x65   : > { %1646 = vmatprep.subr.bf16.mxu0 %v1758_v31 }
  0x68   : > { %1647 = vmatpush3.bf16.msra.mxu0 %v1742_v35 }
  0x69   : > { %1648 = vmatprep.subr.bf16.mxu0 %v1758_v31 }
  0x6c   : > { %1649 = vmatpush3.bf16.msra.mxu0 %v1743_v38 }
  0x6d   : > { %1650 = vmatprep.subr.bf16.mxu0 %v1758_v31 }
  0x70   : > { %1651 = vmatpush3.bf16.msra.mxu0 %v1744_v39 }
  0x71   : > { %1652 = vmatprep.subr.bf16.mxu0 %v1758_v31 }
  0x74   : > { %1653 = vmatpush3.bf16.msra.mxu0 %v1745_v41 }
  0x75   : > { %1654 = vmatprep.subr.bf16.mxu0 %v1758_v31 }
  0x78   : > { %1655 = vmatpush3.bf16.msra.mxu0 %v1746_v43 }
  0x7b   : > { %1657 = vmatmul.mubr.bf16.vlgmr.msra.gmra.mrb[8].mxu0 %v702_v44 }
 0x10e   : > { %v1559_v47 = vpop.f32.mrb[0].mxu0 }
 0x10f   : > { %v1560_v48 = vpop.f32.mrb[1].mxu0 }
 0x110   : > { %v1561_v49 = vadd.f32 %v1560_v48, %v1559_v47  ;;  %v1562_v50 = vpop.f32.mrb[2].mxu0  ;;  %v1581_v51 = vpop.f32.mrb[0].mxu1 }
 0x111   : > { %v1563_v53 = vpop.f32.mrb[3].mxu0  ;;  %v1582_v54 = vpop.f32.mrb[1].mxu1 }
 0x112   : > { %v1583_v55 = vadd.f32 %v1582_v54, %v1581_v51  ;;  %v1584_v56 = vpop.f32.mrb[2].mxu1 }
 0x113   : > { %v1585_v57 = vpop.f32.mrb[3].mxu1 }
 0x114   : > { %v1219_v58 = vadd.f32 %v1583_v55, %v1561_v49 }
 0x12e   : > { %v1603_v59 = vpop.f32.mrb[4].mxu0 }
 0x12f   : > { %v1604_v60 = vpop.f32.mrb[5].mxu0 }
 0x130   : > { %v1605_v61 = vadd.f32 %v1604_v60, %v1603_v59  ;;  %v1606_v62 = vpop.f32.mrb[6].mxu0  ;;  %v1625_v0 = vpop.f32.mrb[4].mxu1 }
 0x131   : > { %v1607_v63 = vpop.f32.mrb[7].mxu0  ;;  %v1626_v1 = vpop.f32.mrb[5].mxu1 }
 0x132   : > { %v1259_v2 = vadd.f32 %v1605_v61, %v1219_v58  ;;  %v1627_v3 = vadd.f32 %v1626_v1, %v1625_v0  ;;  %v1628_v4 = vpop.f32.mrb[6].mxu1 }
 0x133   : > { %v1629_v5 = vpop.f32.mrb[7].mxu1 }
 0x134   : > { %v1299_v6 = vadd.f32 %v1627_v3, %v1259_v2 }
 0x14e   : > { %v1338_v7 = vpop.f32.mrb[8].mxu0 }
 0x14f   : > { %v1339_v8 = vadd.f32 %v1338_v7, %v1299_v6  ;;  %v1658_v9 = vpop.f32.mrb[9].mxu0 }
 0x150   : > { %v1341_v37 = vpop.f32.mrb[10].mxu0 }
 0x151   : > { %v1344_v10 = vpack.c.bf16 %v1339_v8, %v1339_v8  ;;  %v1347_v11 = vsel %vm1346_vm6, %v1339_v8, 0.0  ;;  %v1355_v45 = vmul.f32 %v1339_v8, %v1339_v8  ;;  %v1659_v12 = vpop.f32.mrb[11].mxu0 }
 0x152   : > { %v1348_v13 = vrot.slane %v1347_v11, 4 }
 0x153   : > { %1345 = vst [vmem:[%s226_s12] sm:$0x3] %v1344_v10  ;;  %v1356_v14 = vsel %vm1346_vm6, %v1355_v45, 0.0 }
 0x154   : > { %v1349_v52 = vadd.f32 %v1348_v13, %v1347_v11  ;;  %v1357_v15 = vrot.slane %v1356_v14, 4 }
 0x156   : > { %v1350_v16 = vrot.slane %v1349_v52, 2  ;;  %v1358_v17 = vadd.f32 %v1357_v15, %v1356_v14 }
 0x158   : > { %v1351_v18 = vadd.f32 %v1350_v16, %v1349_v52  ;;  %v1359_v36 = vrot.slane %v1358_v17, 2 }
 0x15a   : > { %v1352_v19 = vrot.slane %v1351_v18, 1  ;;  %v1360_v20 = vadd.f32 %v1359_v36, %v1358_v17 }
 0x15c   : > { %v1353_v21 = vadd.f32 %v1352_v19, %v1351_v18  ;;  %v1361_v22 = vrot.slane %v1360_v20, 1 }
 0x15e   : > { %1354 = vst [vmem:[%s230_s14] sm:$0x1] %v1353_v21  ;;  %v1362_v23 = vadd.f32 %v1361_v22, %v1360_v20 }
 0x160   : > { %1363 = vst [vmem:[%s230_s14 + $0x1] sm:$0x1] %v1362_v23 }
 0x161 PF: > { %s16_s18 = sadd.s32 1, %s1754_s18  }
 0x162   : > { %p13_p4 = scmp.ge.s32.totalorder %s16_s18, 4  }
 0x164   :  { %15 = sbr.rel (!%p13_p4) target bundleno = 1 (0x1), region = 82 }

// kernel: conv_stem_forward.9
= control target key start
LH: loop header
LB: loop body
LE: loop exit
PB: predicated region body
PF: predicated region fallthrough
CT: control target
= control target key end

     0   :  { %v243_v1 = vmov 0.0   ;;  %vm244_vm0 = vmmov 0   ;;  %s324_s0 = inlined_call_operand.vmem [shape: bf16[8,128], index: 0, kind: input, shape index: {}]   ;;  %s325_s1 = inlined_call_operand.vmem [shape: f32[1,128], index: 1, kind: input, shape index: {}]   ;;  %s326_s2 = inlined_call_operand.vmem [shape: f32[1,128], index: 2, kind: input, shape index: {}]   ;;  %s327_s3 = inlined_call_operand.vmem [shape: bf16[128,128], index: 3, kind: input, shape index: {}]   ;;  %s328_s4 = inlined_call_operand.vmem [shape: f32[1,128], index: 4, kind: input, shape index: {}]   ;;  %s329_s5 = inlined_call_operand.hbm [shape: f32[8,128], index: 5, kind: output, shape index: {}]  }
   0x1   :  { %v211_v0 = vld [vmem:[%s327_s3] sm:$0xff]   ;;  %188 = vmatprep.subr.bf16.mxu0 %v243_v1  ;;  %v212_v2 = vld [vmem:[%s327_s3 + $0x8] sm:$0xff]   ;;  %204 = vmatprep.mubr.msk.bf16.mxu0 %vm244_vm0, %v243_v1  ;;  %v213_v3 = vld [vmem:[%s327_s3 + $0x10] sm:$0xff]  }
   0x2   :  { %189 = vmatpush3.bf16.msra.mxu0 %v211_v0 }
   0x3   :  { %190 = vmatprep.subr.bf16.mxu0 %v243_v1 }
   0x6   :  { %191 = vmatpush3.bf16.msra.mxu0 %v212_v2 }
   0x7   :  { %192 = vmatprep.subr.bf16.mxu0 %v243_v1 }
   0x8   :  { %10 = vsyncpa [#allocation3], 0  ;;  %v214_v4 = vld [vmem:[%s327_s3 + $0x18] sm:$0xff]   ;;  %v22_v5 = vld [vmem:[%s324_s0] sm:$0xf]  ;;  %s245_s14 = smov [#allocation2]  }
   0x9   :  { %v23_v6 = vunpack.c.l.bf16 %v22_v5  ;;  %v215_v7 = vld [vmem:[%s327_s3 + $0x20] sm:$0xff]   ;;  %v216_v10 = vld [vmem:[%s327_s3 + $0x28] sm:$0xff]   ;;  %v217_v13 = vld [vmem:[%s327_s3 + $0x30] sm:$0xff]   ;;  %s160_s15 = sshll.u32 %s245_s14, 4  ;;  %s161_s15 = int_to_ptr.vmem [resolvable:$true] %s160_s15 }
   0xa   :  { %193 = vmatpush3.bf16.msra.mxu0 %v213_v3  ;;  %v168_v8 = vld [vmem:[%s325_s1] ss:$0 sm:$0xff]  ;;  %v218_v15 = vld [vmem:[%s327_s3 + $0x38] sm:$0xff]   ;;  %s219_s16 = scalar_lea.vmem %s161_s15, 128  ;;  %p224_p1 = scmp.lt.s32.totalorder %s161_s15, %s161_s15 }
   0xb   :  { %194 = vmatprep.subr.bf16.mxu0 %v243_v1  ;;  %v31_v9 = vmul.f32 %v168_v8, %v23_v6  ;;  %v169_v11 = vld [vmem:[%s326_s2] ss:$0 sm:$0xff]  ;;  %p220_p0 = scmp.ne.s32.totalorder %s161_s15, %s219_s16  ;;  %p225_p2 = scmp.lt.s32.totalorder %s219_s16, %s219_s16 }
   0xc   :  { %v170_v17 = vld [vmem:[%s328_s4] ss:$0 sm:$0xff] }
   0xd   :  { %v39_v12 = vadd.f32 %v169_v11, %v31_v9  ;;  %p226_p3 = por %p225_p2, %p224_p1 }
   0xe   :  { %195 = vmatpush3.bf16.msra.mxu0 %v214_v4 }
   0xf   :  { %196 = vmatprep.subr.bf16.mxu0 %v243_v1  ;;  %v40_v14 = vmax.f32 %v39_v12, 0.0  ;;  %p227_p4 = pnand %p226_p3, %p220_p0 }
  0x11   :  { %v41_v16 = vpack.c.bf16 %v40_v14, %v40_v14 }
  0x12   :  { %197 = vmatpush3.bf16.msra.mxu0 %v215_v7 }
  0x13   :  { %198 = vmatprep.subr.bf16.mxu0 %v243_v1 }
  0x16   :  { %199 = vmatpush3.bf16.msra.mxu0 %v216_v10 }
  0x17   :  { %200 = vmatprep.subr.bf16.mxu0 %v243_v1 }
  0x1a   :  { %201 = vmatpush3.bf16.msra.mxu0 %v217_v13 }
  0x1b   :  { %202 = vmatprep.subr.bf16.mxu0 %v243_v1 }
  0x1e   :  { %203 = vmatpush3.bf16.msra.mxu0 %v218_v15 }
  0x21   :  { %205 = vmatmul.mubr.bf16.vlgmr.msra.gmra.mrb[0].mxu0 %v41_v16 }
  0xf4   :  { %v147_v18 = vpop.f32.mrb[0].mxu0 }
  0xf5   :  { %v148_v19 = vadd.f32 %v170_v17, %v147_v18  ;;  %v206_v20 = vpop.f32.mrb[1].mxu0 }
  0xf6   :  { %v150_v21 = vpop.f32.mrb[2].mxu0 }
  0xf7   :  { %153 = vst [vmem:[#allocation2] sm:$0xff] %v148_v19  ;;  %v207_v22 = vpop.f32.mrb[3].mxu0 }
  0xf8   :  { %230 = shalt.err (!%p227_p4)
}
  0xf9   :  { %s231_s4 = scalar_lea.hbm %s329_s5, 128 }
  0xfa   :  { %p232_p5 = scmp.ne.s32.totalorder %s329_s5, %s231_s4  ;;  %p235_p6 = scmp.lt.u32.totalorder %s231_s4, %s329_s5 }
  0xfc   :  { %p237_p7 = pnand %p235_p6, %p232_p5 }
  0xfe   :  { %240 = shalt.err (!%p237_p7)
}
  0xff   :  { %163 = dma.vmem_to_hbm [thread:$0]  %s161_s15, 128, %s329_s5, [#allocation3]  }
 0x100   :  { %241 = dma.done.wait [#allocation3], 128  }
 0x101   :  { %242 = vsyncadd [#allocation3], 4294967168 }
 0x102   :  { %167 = vsyncpa [#allocation3], 1 }

</bundles_post_ra>
